<compile_context>
chip_gen: v6e
topology: v6e:2x2x1
jax: 0.10.0
libtpu: 0.0.40
codegen_flags: <defaults>
</compile_context>

<pallas_src>
import jax
import jax.numpy as jnp
from jax.experimental import pallas as pl
from jax.experimental.pallas import tpu as pltpu


def _layer_scale_kernel(x_ref, gamma_ref, o_ref):
    # (tm, D_eff) tile * (1, D_eff) gamma -> per-lane VPU multiply.
    # HBM-streaming kernel: compute is free, DMA tile size is the only lever.
    o_ref[...] = x_ref[...] * gamma_ref[...]


def _vmem_capacity_bytes():
    # Generation-aware VMEM capacity; conservative fallback = v7x (64 MiB/TC).
    try:
        return int(pltpu.get_tpu_info().vmem_capacity_bytes)
    except Exception:
        return 64 * 1024 * 1024


def _round_up(n, m):
    return -(-n // m) * m


# Below this, skip pallas_call and let XLA emit (and fuse) the multiply.
_SMALL_TENSOR_BYTES = 2 << 20


def layer_scale(x, gamma):
    """x: (..., D); gamma: (D,). Returns x * gamma (output dtype == x.dtype)."""
    orig_shape = x.shape
    D = orig_shape[-1]
    assert gamma.shape == (D,)
    gamma = gamma.astype(x.dtype)  # keep the hot loop same-dtype (documented)

    itemsize = jnp.dtype(x.dtype).itemsize

    # ---- small-tensor fast path ----
    if x.size * itemsize < _SMALL_TENSOR_BYTES:
        return x * gamma

    x2 = x.reshape(-1, D)  # free glue reshape
    R = x2.shape[0]

    # ---- lane-dense fold: only when the reshape is a free bitcast ----
    fold = 1
    if D < 128 and 128 % D == 0 and R % (128 // D) == 0:
        fold = 128 // D
    D_eff = D * fold
    rows_needed = R // fold
    x_fold = x2.reshape(rows_needed, D_eff) if fold > 1 else x2
    gamma_eff = (jnp.tile(gamma, fold) if fold > 1 else gamma).reshape(1, D_eff)

    # ---- byte-based row-tile selection ----
    vmem_cap = _vmem_capacity_bytes()
    sub = max(8, 32 // itemsize)  # sublane multiple: 8 f32 / 16 bf16 / 32 i8
    # ~8 MiB tiles on v5e/v6e (128 MiB VMEM), ~4 MiB on v7x (64 MiB):
    # keeps every dtype/width on the >=85% HBM-roofline plateau while
    # 2x-in + 2x-out double-buffered tiles stay well under physical VMEM.
    tile_budget = min(vmem_cap // 16, 8 << 20)
    row_bytes = D_eff * itemsize
    tm = max(sub, (tile_budget // row_bytes) // sub * sub)
    # never larger than the (sublane-rounded) data itself
    tm = min(tm, _round_up(rows_needed, sub))
    # keep >=2 grid steps when possible so both v7x TensorCores get a share
    if rows_needed > sub:
        tm = min(tm, _round_up(-(-rows_needed // 2), sub))
    tm = max(tm, sub)

    grid = pl.cdiv(rows_needed, tm)  # ragged last block -> masked stores

    # ---- explicit scoped-VMEM budget for the chosen tile ----
    tile_bytes = tm * D_eff * itemsize
    needed = 4 * tile_bytes + 2 * D_eff * itemsize + (2 << 20)  # + slack
    vmem_limit = int(min(max(needed, 16 << 20), int(vmem_cap * 0.9)))

    out = pl.pallas_call(
        _layer_scale_kernel,
        out_shape=jax.ShapeDtypeStruct((rows_needed, D_eff), x.dtype),
        grid_spec=pltpu.PrefetchScalarGridSpec(
            num_scalar_prefetch=0,
            grid=(grid,),
            in_specs=[
                pl.BlockSpec((tm, D_eff), lambda i: (i, 0)),
                pl.BlockSpec((1, D_eff), lambda i: (0, 0)),
            ],
            out_specs=pl.BlockSpec((tm, D_eff), lambda i: (i, 0)),
        ),
        compiler_params=pltpu.CompilerParams(
            dimension_semantics=("parallel",),
            vmem_limit_bytes=vmem_limit,
        ),
    )(x_fold, gamma_eff)

    return out.reshape(orig_shape)


if __name__ == "__main__":
    init_values = 1e-05
    key = jax.random.PRNGKey(0)

    def check(y, x, gamma, rtol=1e-6):
        ref = x * gamma.astype(x.dtype)
        assert y.shape == x.shape
        assert y.dtype == x.dtype
        assert jnp.allclose(y.astype(jnp.float32), ref.astype(jnp.float32),
                            atol=1e-6, rtol=rtol)

    # 1) Tiny ViT-sized tensor: exercises the small-tensor fast path.
    B, N, D = 2, 8, 32
    x = jax.random.normal(key, (B, N, D), dtype=jnp.float32)
    gamma = jnp.full((D,), init_values, dtype=jnp.float32)
    check(jax.block_until_ready(layer_scale(x, gamma)), x, gamma)

    # 2) Tiny ragged bf16 tensor: fast path, mixed-dtype gamma.
    x2 = jax.random.normal(jax.random.PRNGKey(0), (2, 197, 32), dtype=jnp.bfloat16)
    gamma2 = jnp.full((32,), init_values, dtype=jnp.float32)
    check(jax.block_until_ready(layer_scale(x2, gamma2)), x2, gamma2, rtol=1e-2)

    # 3) Medium tensor: Pallas path, even 2-step grid (v7x megacore-friendly).
    x3 = jax.random.normal(jax.random.PRNGKey(1), (2, 1024, 768), dtype=jnp.float32)
    gamma3 = jnp.full((768,), init_values, dtype=jnp.float32)
    check(jax.block_until_ready(layer_scale(x3, gamma3)), x3, gamma3)

    # 4) Medium ragged tensor: Pallas path with a masked ragged last block.
    x4 = jax.random.normal(jax.random.PRNGKey(2), (5, 197, 768), dtype=jnp.float32)
    gamma4 = jnp.full((768,), init_values, dtype=jnp.float32)
    check(jax.block_until_ready(layer_scale(x4, gamma4)), x4, gamma4)

    # 5) Narrow last dim divisible into 128: Pallas path via the free fold.
    x5 = jax.random.normal(jax.random.PRNGKey(3), (16, 512, 64), dtype=jnp.float32)
    gamma5 = jnp.full((64,), init_values, dtype=jnp.float32)
    check(jax.block_until_ready(layer_scale(x5, gamma5)), x5, gamma5)

    print("KERNEL_OK")
</pallas_src>

<mosaic_0001>
module attributes {stable_mosaic.version = 11 : i64} {
  func.func @_layer_scale_kernel(%arg0: i32, %arg1: memref<1024x768xf32, #tpu.memory_space<vmem>>, %arg2: memref<1x768xf32, #tpu.memory_space<vmem>>, %arg3: memref<1024x768xf32, #tpu.memory_space<vmem>>) attributes {dimension_semantics = [#tpu.dimension_semantics<parallel>], iteration_bounds = array<i64: 2>, scalar_prefetch = 0 : i64, scratch_operands = 0 : i64, tpu.core_type = #tpu.core_type<tc>, window_params = [{transform_indices = @transform_0, window_bounds = array<i64: 1024, 768>}, {pipeline_mode = #tpu.pipeline_mode<synchronous>, transform_indices = @transform_1, window_bounds = array<i64: 1, 768>}, {transform_indices = @transform_2, window_bounds = array<i64: 1024, 768>}]} {
    %c0 = arith.constant 0 : index
    %c0_0 = arith.constant 0 : index
    %0 = vector.load %arg1[%c0, %c0_0] : memref<1024x768xf32, #tpu.memory_space<vmem>>, vector<1024x768xf32>
    %c0_1 = arith.constant 0 : index
    %c0_2 = arith.constant 0 : index
    %1 = vector.load %arg2[%c0_1, %c0_2] : memref<1x768xf32, #tpu.memory_space<vmem>>, vector<1x768xf32>
    %2 = vector.broadcast %1 : vector<1x768xf32> to vector<1024x768xf32>
    %3 = arith.mulf %0, %2 : vector<1024x768xf32>
    %c0_3 = arith.constant 0 : index
    %c0_4 = arith.constant 0 : index
    %4 = vector.load %arg3[%c0_3, %c0_4] : memref<1024x768xf32, #tpu.memory_space<vmem>>, vector<1024x768xf32>
    tpu.vector_store %arg3[%c0_3, %c0_4], %3 {strides = array<i32>} : memref<1024x768xf32, #tpu.memory_space<vmem>>, vector<1024x768xf32>,
    return
  }
  func.func @transform_0(%arg0: i32) -> (i32, i32) {
    %c0_i32 = arith.constant 0 : i32
    %c0_i32_0 = arith.constant 0 : i32
    return %arg0, %c0_i32 : i32, i32
  }
  func.func @transform_1(%arg0: i32) -> (i32, i32) {
    %c0_i32 = arith.constant 0 : i32
    %c0_i32_0 = arith.constant 0 : i32
    %c0_i32_1 = arith.constant 0 : i32
    return %c0_i32, %c0_i32_0 : i32, i32
  }
  func.func @transform_2(%arg0: i32) -> (i32, i32) {
    %c0_i32 = arith.constant 0 : i32
    %c0_i32_0 = arith.constant 0 : i32
    return %arg0, %c0_i32 : i32, i32
  }
}

</mosaic_0001>

<bundles_post_ra>
// kernel: tpu_custom_call.1
= control target key start
LH: loop header
LB: loop body
LE: loop exit
PB: predicated region body
PF: predicated region fallthrough
CT: control target
= control target key end

     0   :  { %7 = vsyncpa [#allocation3], 0  ;;  %s5345_s0 = inlined_call_operand.hbm [shape: f32[2048,768], index: 0, kind: input, shape index: {}]   ;;  %s5346_s1 = inlined_call_operand.hbm [shape: f32[1,768], index: 1, kind: input, shape index: {}]   ;;  %s5347_s2 = inlined_call_operand.hbm [shape: f32[2048,768], index: 2, kind: output, shape index: {}]  }
   0x1   :  { %9 = vsyncpa [#allocation3 + $0x1], 0 }
   0x2   :  { %10 = vsyncpa [#allocation6], 0 }
   0x3   :  { %11 = vsyncpa [#allocation4], 0 }
   0x4   :  { %13 = vsyncpa [#allocation4 + $0x1], 0  ;;  %s2837_s9 = smov 0   ;;  %s2839_s10 = smov 0  }
   0x5   :  { %s2841_s11 = smov 0   ;;  %s2843_s12 = smov 0  }
   0x6 LB: > { %s2858_s13 = sadd.s32 4294967295, %s2813_s12   ;;  %s2612_s14 = sadd.s32 4294967294, %s2813_s12   ;;  %s2813_s12 = sphi %s2843_s12, %s5370_s12   ;;  %s2809_s11 = sphi %s2841_s11, %s5369_s11   ;;  %s2805_s10 = sphi %s2839_s10, %s5368_s10   ;;  %s2801_s9 = sphi %s2837_s9, %s5367_s9  }
   0x7   : > { %s2862_s15 = sadd.s32 1, %s2813_s12   ;;  %s26_s16 = sadd.s32 1, %s2809_s11 }
   0x8   : > { %s23_s17 = ssub.s32 %s2813_s12, %s2862_s15  ;;  %p33_p0 = scmp.ne.s32.totalorder %s2809_s11, %s2805_s10 }
   0x9   : > { %p24_p1 = scmp.eq.s32.totalorder %s23_s17, 0  ;;  %p34_p2 = scmp.eq.s32.totalorder %s2813_s12, 0 }
   0xa   : > { %p39_p3 = scmp.ne.s32.totalorder %s2805_s10, %s2801_s9  ;;  %p5348_p4 = scmp.eq.s32.totalorder %s2858_s13, 0 }
   0xb   : > { %s2874_s18 = scalar_select %p24_p1, %s2809_s11, %s26_s16  }
   0xc   : > { %p2876_p5 = por %p34_p2, %p33_p0  ;;  %p2882_p6 = por %p5348_p4, %p39_p3 }
   0xd   : > { %p84_p7 = scmp.eq.s32.totalorder %s2858_s13, 1  ;;  %p90_p8 = scmp.eq.s32.totalorder %s2612_s14, 1 }
   0xe   : > { %s5353_s20 = scalar_select %p2882_p6, 1, 0 }
   0xf   : > { %p2613_p9 = scmp.ge.s32.totalorder %s2813_s12, 1  ;;  %p97_p10 = scmp.lt.s32.totalorder %s2813_s12, 3 }
  0x10   : > { %p2889_p11 = por %p84_p7, %p33_p0  ;;  %p2893_p12 = por %p90_p8, %p39_p3 }
  0x11   : > { %p2897_p13 = pnand %p2613_p9, %p97_p10  ;;  %s2815_s24 = smov [#allocation5]  }
  0x12   : > { %s5354_s21 = scalar_select %p2889_p11, 1, 0 }
  0x13   : > { %s5355_s22 = scalar_select %p2893_p12, 1, 0 }
  0x14   : > { %s5356_s23 = scalar_select %p2897_p13, 1, 0 }
  0x15   : > { %p2638_p2 = pneg %p2897_p13  ;;  %s110_s25 = sshll.u32 %s2815_s24, 4  ;;  %s111_s25 = int_to_ptr.vmem [resolvable:$true] %s110_s25 }
  0x16   : > { %p2651_p4 = scmp.lt.s32.totalorder %s2813_s12, 2  ;;  %p5357_p0 = scmp.eq.s32.totalorder %s2858_s13, 0 }
  0x17   : > { %s121_s27 = sand.u32 1, %s2809_s11   ;;  %s2702_s30 = scalar_lea.vmem %s111_s25, 96 }
  0x18   : > { %p2907_p7 = pnand %p2638_p2, %p5357_p0  ;;  %p2914_p3 = pnand %p2651_p4, %p2876_p5 }
  0x19   : > { %s2626_s29 = smul.u32 6144, %s121_s27  ;;  %p2703_p9 = scmp.ne.s32.totalorder %s111_s25, %s2702_s30 }
  0x1a   : > { %p2693_p8 = pneg %p2907_p7  ;;  %p2710_p12 = scmp.lt.s32.totalorder %s111_s25, %s111_s25 }
  0x1b   : > { %p2711_p11 = scmp.lt.s32.totalorder %s2702_s30, %s2702_s30 }
  0x1c   : > { %p2705_p10 = pnand %p2703_p9, %p2693_p8 }
  0x1d   : > { %p2712_p2 = por %p2711_p11, %p2710_p12 }
  0x1e   : > { %p2706_p1 = pneg %p2705_p10 }
  0x20   : > { %p2713_p0 = pnand %p2712_p2, %p2706_p1 }
  0x22   : > { %2716 = shalt.err (!%p2713_p0)
}
  0x23   : > { %2641 = dma.hbm_to_vmem [thread:$0]  (!%p2907_p7), %s5346_s1, 96, %s111_s25, [#allocation6]  }
  0x24   : > { %s2627_s5 = smul.u32 98304, %s2813_s12  ;;  %s125_s6 = scalar_lea.vmem [#allocation2], %s2626_s29 }
  0x25   : > { %s133_s7 = sshll.u32 %s125_s6, 4  ;;  %s2933_s17 = scalar_lea.sflag [#allocation3], %s121_s27  ;;  %s2926_s7 = int_to_ptr.vmem [resolvable:$true] %s133_s7 }
  0x26   : > { %s2931_s16 = scalar_lea.hbm %s5345_s0, %s2627_s5  ;;  %p2719_p5 = pneg %p2914_p3 }
  0x27   : > { %s2717_s19 = scalar_lea.hbm %s2931_s16, 98304  ;;  %s2722_s26 = scalar_lea.hbm %s5345_s0, 196608 }
  0x28   : > { %p2718_p4 = scmp.ne.s32.totalorder %s2931_s16, %s2717_s19  ;;  %p2723_p1 = scmp.lt.s32.totalorder %s2931_s16, %s5345_s0 }
  0x29   : > { %p2724_p7 = scmp.lt.s32.totalorder %s2722_s26, %s2717_s19 }
  0x2a   : > { %p2720_p11 = pnand %p2719_p5, %p2718_p4 }
  0x2b   : > { %p2725_p8 = por %p2724_p7, %p2723_p1 }
  0x2c   : > { %p2721_p12 = pneg %p2720_p11 }
  0x2e   : > { %p2726_p9 = pnand %p2725_p8, %p2721_p12 }
  0x30   : > { %2729 = shalt.err (!%p2726_p9)
}
  0x31   : > { %s2730_s27 = scalar_lea.vmem %s2926_s7, 98304  ;;  %s2816_s3 = smov [#allocation2]  }
  0x32   : > { %p2731_p10 = scmp.ne.s32.totalorder %s2926_s7, %s2730_s27  ;;  %s2735_s4 = sshll.u32 %s2816_s3, 4  ;;  %s2736_s4 = int_to_ptr.vmem [resolvable:$false] %s2735_s4 }
  0x33   : > { %s2737_s5 = scalar_lea.vmem %s2736_s4, 196608  ;;  %p2738_p4 = scmp.lt.s32.totalorder %s2926_s7, %s2736_s4 }
  0x34   : > { %p2733_p2 = pnand %p2731_p10, %p2719_p5  ;;  %p2739_p11 = scmp.lt.s32.totalorder %s2737_s5, %s2730_s27 }
  0x36   : > { %p2734_p0 = pneg %p2733_p2  ;;  %p2740_p6 = por %p2739_p11, %p2738_p4 }
  0x38   : > { %p2741_p13 = pnand %p2740_p6, %p2734_p0 }
  0x3a   : > { %2744 = shalt.err (!%p2741_p13)
}
  0x3b   : > { %s2817_s6 = smov 768   ;;  %s2818_s8 = smov 48  }
  0x3c   : > { %2645 = dma.hbm_to_vmem [thread:$0]  (!%p2914_p3), %s2931_s16, 98304, %s2926_s7, %s2933_s17, %s2817_s6, %s2817_s6, %s2818_s8  }
  0x3d   : > { %p5360_p5 = scmp.ne.s32.totalorder %s5356_s23, 0 }
  0x3e   : > { %s2957_s14 = sand.u32 (!%p5360_p5), 1, %s2805_s10   ;;  %p5361_p6 = scmp.ne.s32.totalorder (!%p5360_p5), %s5353_s20, 0 }
  0x3f   : > { %145 = sbr.rel (%p5360_p5) target bundleno = 479 (0x1df), region = 28  ;;  %s148_s24 = scalar_lea.sflag (!%p5360_p5), [#allocation3], %s2957_s14 }
  0x40   : > { %s2628_s19 = smul.u32 (!%p5360_p5), 6144, %s2957_s14 }
  0x42   : > { %s2963_s25 = scalar_lea.vmem (!%p5360_p5), [#allocation2], %s2628_s19 }
  0x44   : > { %2788 = dma.done.wait (%p5361_p6), %s148_s24, 98304  }
  0x45   : > { %2790 = vsyncadd (%p5361_p6), %s148_s24, 4294868992  ;;  %p5362_p13 = scmp.eq.s32.totalorder %s2858_s13, 0 }
  0x47   : > { %2792 = dma.done.wait (%p5362_p13), [#allocation6], 96   ;;  %p5363_p3 = pmov %p5362_p13 }
  0x48   : > { %v948_v0 = vlaneseq  ;;  %v178_v8 = vld [vmem:[%s2963_s25] sm:$0xff]  ;;  %v179_v10 = vld [vmem:[%s2963_s25 + $0x8] sm:$0xff]  ;;  %v180_v13 = vld [vmem:[%s2963_s25 + $0x10] sm:$0xff]  ;;  %s3009_s20 = scalar_lea.vmem [#allocation7], %s2628_s19  ;;  %s2629_s23 = smul.u32 98304, %s2858_s13 }
  0x49   : > { %2794 = vsyncadd (%p5363_p3), [#allocation6], 4294967200  ;;  %v946_v9 = vld [vmem:[#allocation5] sm:$0x3f]  ;;  %v181_v15 = vld [vmem:[%s2963_s25 + $0x18] sm:$0xff]  ;;  %s2529_s28 = sshll.u32 %s3009_s20, 4  ;;  %s5294_s28 = int_to_ptr.vmem [resolvable:$true] %s2529_s28 }
  0x4a   : > { %v949_v1 = vshrl.u32 %v948_v0, 7  ;;  %v182_v17 = vld [vmem:[%s2963_s25 + $0x20] sm:$0xff]  ;;  %v183_v19 = vld [vmem:[%s2963_s25 + $0x28] sm:$0xff]  ;;  %v184_v21 = vld [vmem:[%s2963_s25 + $0x30] sm:$0xff]  ;;  %s5292_s17 = scalar_lea.hbm %s5347_s2, %s2629_s23  ;;  %s2515_s13 = scalar_lea.sflag [#allocation4], %s2957_s14 }
  0x4b   : > { %v185_v22 = vld [vmem:[%s2963_s25 + $0x38] sm:$0xff]  ;;  %v186_v27 = vld [vmem:[%s2963_s25 + $0x40] sm:$0xff]  ;;  %v187_v28 = vld [vmem:[%s2963_s25 + $0x48] sm:$0xff]  ;;  %s2745_s26 = scalar_lea.vmem %s5294_s28, 98304  ;;  %p5364_p1 = scmp.ne.s32.totalorder %s5354_s21, 0 }
  0x4c   : > { %v950_v2 = vsub.s32 0, %v949_v1  ;;  %v954_v3 = vsub.s32 1, %v949_v1  ;;  %v958_v4 = vsub.s32 2, %v949_v1  ;;  %v962_v5 = vsub.s32 3, %v949_v1  ;;  %v188_v29 = vld [vmem:[%s2963_s25 + $0x50] sm:$0xff]  ;;  %v189_v34 = vld [vmem:[%s2963_s25 + $0x58] sm:$0xff]  ;;  %p2746_p12 = scmp.ne.s32.totalorder %s5294_s28, %s2745_s26 }
  0x4d   : > { %v966_v6 = vsub.s32 4, %v949_v1  ;;  %v970_v7 = vsub.s32 5, %v949_v1  ;;  %v190_v35 = vld [vmem:[%s2963_s25 + $0x60] sm:$0xff]  ;;  %v191_v36 = vld [vmem:[%s2963_s25 + $0x68] sm:$0xff]  ;;  %v192_v41 = vld [vmem:[%s2963_s25 + $0x70] sm:$0xff]  ;;  %s2819_s29 = smov [#allocation7]  }
  0x4e   : > { %v2975_v11 = vrot.slane %v946_v9, %v950_v2  ;;  %v2977_v12 = vrot.slane %v946_v9, %v954_v3  ;;  %v2980_v14 = vrot.slane %v946_v9, %v958_v4  ;;  %v2983_v16 = vrot.slane %v946_v9, %v962_v5  ;;  %v193_v42 = vld [vmem:[%s2963_s25 + $0x78] sm:$0xff]  ;;  %v194_v43 = vld [vmem:[%s2963_s25 + $0x80] sm:$0xff]  ;;  %v195_v48 = vld [vmem:[%s2963_s25 + $0x88] sm:$0xff]  ;;  %p2747_p7 = pnand %p2746_p12, %p5364_p1  ;;  %s2749_s30 = sshll.u32 %s2819_s29, 4  ;;  %s2750_s30 = int_to_ptr.vmem [resolvable:$false] %s2749_s30 }
  0x4f   : > { %v2986_v18 = vrot.slane %v946_v9, %v966_v6  ;;  %v2989_v20 = vrot.slane %v946_v9, %v970_v7  ;;  %v196_v49 = vld [vmem:[%s2963_s25 + $0x90] sm:$0xff]  ;;  %v197_v50 = vld [vmem:[%s2963_s25 + $0x98] sm:$0xff]  ;;  %v198_v55 = vld [vmem:[%s2963_s25 + $0xa0] sm:$0xff]  ;;  %s2751_s27 = scalar_lea.vmem %s2750_s30, 196608  ;;  %p2752_p9 = scmp.lt.s32.totalorder %s5294_s28, %s2750_s30 }
  0x50   : > { %v978_v23 = vmul.f32 %v2975_v11, %v178_v8  ;;  %v979_v24 = vmul.f32 %v2977_v12, %v179_v10  ;;  %v980_v25 = vmul.f32 %v2980_v14, %v180_v13  ;;  %v981_v26 = vmul.f32 %v2983_v16, %v181_v15  ;;  %v199_v56 = vld [vmem:[%s2963_s25 + $0xa8] sm:$0xff]  ;;  %v200_v57 = vld [vmem:[%s2963_s25 + $0xb0] sm:$0xff]  ;;  %v201_v61 = vld [vmem:[%s2963_s25 + $0xb8] sm:$0xff]  ;;  %p2748_p8 = pneg %p2747_p7  ;;  %p2753_p10 = scmp.lt.s32.totalorder %s2751_s27, %s2745_s26 }
  0x51   : > { %v982_v30 = vmul.f32 %v2986_v18, %v182_v17  ;;  %v983_v31 = vmul.f32 %v2989_v20, %v183_v19  ;;  %v984_v32 = vmul.f32 %v2975_v11, %v184_v21  ;;  %v985_v33 = vmul.f32 %v2977_v12, %v185_v22  ;;  %v202_v62 = vld [vmem:[%s2963_s25 + $0xc0] sm:$0xff]  ;;  %v203_v63 = vld [vmem:[%s2963_s25 + $0xc8] sm:$0xff]  ;;  %v204_v3 = vld [vmem:[%s2963_s25 + $0xd0] sm:$0xff] }
  0x52   : > { %1746 = vst [vmem:[%s3009_s20] sm:$0xff] %v978_v23  ;;  %1747 = vst [vmem:[%s3009_s20 + $0x8] sm:$0xff] %v979_v24  ;;  %v986_v37 = vmul.f32 %v2980_v14, %v186_v27  ;;  %v987_v38 = vmul.f32 %v2983_v16, %v187_v28  ;;  %v988_v39 = vmul.f32 %v2986_v18, %v188_v29  ;;  %v205_v4 = vld [vmem:[%s2963_s25 + $0xd8] sm:$0xff]  ;;  %v206_v5 = vld [vmem:[%s2963_s25 + $0xe0] sm:$0xff]  ;;  %p2754_p2 = por %p2753_p10, %p2752_p9 }
  0x53   : > { %1748 = vst [vmem:[%s3009_s20 + $0x10] sm:$0xff] %v980_v25  ;;  %1749 = vst [vmem:[%s3009_s20 + $0x18] sm:$0xff] %v981_v26  ;;  %v989_v40 = vmul.f32 %v2989_v20, %v189_v34  ;;  %v990_v44 = vmul.f32 %v2975_v11, %v190_v35  ;;  %v991_v45 = vmul.f32 %v2977_v12, %v191_v36  ;;  %v207_v9 = vld [vmem:[%s2963_s25 + $0xe8] sm:$0xff]  ;;  %v208_v10 = vld [vmem:[%s2963_s25 + $0xf0] sm:$0xff] }
  0x54   : > { %1750 = vst [vmem:[%s3009_s20 + $0x20] sm:$0xff] %v982_v30  ;;  %1751 = vst [vmem:[%s3009_s20 + $0x28] sm:$0xff] %v983_v31  ;;  %v992_v46 = vmul.f32 %v2980_v14, %v192_v41  ;;  %v993_v47 = vmul.f32 %v2983_v16, %v193_v42  ;;  %v994_v51 = vmul.f32 %v2986_v18, %v194_v43  ;;  %v209_v13 = vld [vmem:[%s2963_s25 + $0xf8] sm:$0xff]  ;;  %v210_v21 = vld [vmem:[%s2963_s25 + $0x100] sm:$0xff]  ;;  %p2755_p0 = pnand %p2754_p2, %p2748_p8 }
  0x55   : > { %1752 = vst [vmem:[%s3009_s20 + $0x30] sm:$0xff] %v984_v32  ;;  %1753 = vst [vmem:[%s3009_s20 + $0x38] sm:$0xff] %v985_v33  ;;  %v995_v52 = vmul.f32 %v2989_v20, %v195_v48  ;;  %v996_v53 = vmul.f32 %v2975_v11, %v196_v49  ;;  %v997_v54 = vmul.f32 %v2977_v12, %v197_v50  ;;  %v211_v22 = vld [vmem:[%s2963_s25 + $0x108] sm:$0xff]  ;;  %v212_v23 = vld [vmem:[%s2963_s25 + $0x110] sm:$0xff] }
  0x56   : > { %1754 = vst [vmem:[%s3009_s20 + $0x40] sm:$0xff] %v986_v37  ;;  %1755 = vst [vmem:[%s3009_s20 + $0x48] sm:$0xff] %v987_v38  ;;  %v998_v58 = vmul.f32 %v2980_v14, %v198_v55  ;;  %v999_v59 = vmul.f32 %v2983_v16, %v199_v56  ;;  %v1000_v60 = vmul.f32 %v2986_v18, %v200_v57  ;;  %v213_v27 = vld [vmem:[%s2963_s25 + $0x118] sm:$0xff]  ;;  %v214_v28 = vld [vmem:[%s2963_s25 + $0x120] sm:$0xff] }
  0x57   : > { %1756 = vst [vmem:[%s3009_s20 + $0x50] sm:$0xff] %v988_v39  ;;  %1757 = vst [vmem:[%s3009_s20 + $0x58] sm:$0xff] %v989_v40  ;;  %v1001_v0 = vmul.f32 %v2989_v20, %v201_v61  ;;  %v1002_v1 = vmul.f32 %v2975_v11, %v202_v62  ;;  %v1003_v2 = vmul.f32 %v2977_v12, %v203_v63  ;;  %v215_v29 = vld [vmem:[%s2963_s25 + $0x128] sm:$0xff]  ;;  %v216_v33 = vld [vmem:[%s2963_s25 + $0x130] sm:$0xff] }
  0x58   : > { %1758 = vst [vmem:[%s3009_s20 + $0x60] sm:$0xff] %v990_v44  ;;  %1759 = vst [vmem:[%s3009_s20 + $0x68] sm:$0xff] %v991_v45  ;;  %v1004_v6 = vmul.f32 %v2980_v14, %v204_v3  ;;  %v1005_v7 = vmul.f32 %v2983_v16, %v205_v4  ;;  %v1006_v8 = vmul.f32 %v2986_v18, %v206_v5  ;;  %v217_v34 = vld [vmem:[%s2963_s25 + $0x138] sm:$0xff]  ;;  %v218_v35 = vld [vmem:[%s2963_s25 + $0x140] sm:$0xff] }
  0x59   : > { %1760 = vst [vmem:[%s3009_s20 + $0x70] sm:$0xff] %v992_v46  ;;  %1761 = vst [vmem:[%s3009_s20 + $0x78] sm:$0xff] %v993_v47  ;;  %v1007_v15 = vmul.f32 %v2989_v20, %v207_v9  ;;  %v1008_v17 = vmul.f32 %v2975_v11, %v208_v10  ;;  %v1009_v19 = vmul.f32 %v2977_v12, %v209_v13  ;;  %v219_v39 = vld [vmem:[%s2963_s25 + $0x148] sm:$0xff]  ;;  %v220_v40 = vld [vmem:[%s2963_s25 + $0x150] sm:$0xff] }
  0x5a   : > { %1762 = vst [vmem:[%s3009_s20 + $0x80] sm:$0xff] %v994_v51  ;;  %1763 = vst [vmem:[%s3009_s20 + $0x88] sm:$0xff] %v995_v52  ;;  %v1010_v24 = vmul.f32 %v2980_v14, %v210_v21  ;;  %v1011_v25 = vmul.f32 %v2983_v16, %v211_v22  ;;  %v1012_v26 = vmul.f32 %v2986_v18, %v212_v23  ;;  %v221_v41 = vld [vmem:[%s2963_s25 + $0x158] sm:$0xff]  ;;  %v222_v45 = vld [vmem:[%s2963_s25 + $0x160] sm:$0xff] }
  0x5b   : > { %1764 = vst [vmem:[%s3009_s20 + $0x90] sm:$0xff] %v996_v53  ;;  %1765 = vst [vmem:[%s3009_s20 + $0x98] sm:$0xff] %v997_v54  ;;  %v1013_v30 = vmul.f32 %v2989_v20, %v213_v27  ;;  %v1014_v31 = vmul.f32 %v2975_v11, %v214_v28  ;;  %v1015_v32 = vmul.f32 %v2977_v12, %v215_v29  ;;  %v223_v46 = vld [vmem:[%s2963_s25 + $0x168] sm:$0xff]  ;;  %v224_v47 = vld [vmem:[%s2963_s25 + $0x170] sm:$0xff] }
  0x5c   : > { %1766 = vst [vmem:[%s3009_s20 + $0xa0] sm:$0xff] %v998_v58  ;;  %1767 = vst [vmem:[%s3009_s20 + $0xa8] sm:$0xff] %v999_v59  ;;  %v1016_v36 = vmul.f32 %v2980_v14, %v216_v33  ;;  %v1017_v37 = vmul.f32 %v2983_v16, %v217_v34  ;;  %v1018_v38 = vmul.f32 %v2986_v18, %v218_v35  ;;  %v225_v51 = vld [vmem:[%s2963_s25 + $0x178] sm:$0xff]  ;;  %v226_v52 = vld [vmem:[%s2963_s25 + $0x180] sm:$0xff] }
  0x5d   : > { %1768 = vst [vmem:[%s3009_s20 + $0xb0] sm:$0xff] %v1000_v60  ;;  %1769 = vst [vmem:[%s3009_s20 + $0xb8] sm:$0xff] %v1001_v0  ;;  %v1019_v42 = vmul.f32 %v2989_v20, %v219_v39  ;;  %v1020_v43 = vmul.f32 %v2975_v11, %v220_v40  ;;  %v1021_v44 = vmul.f32 %v2977_v12, %v221_v41  ;;  %v227_v53 = vld [vmem:[%s2963_s25 + $0x188] sm:$0xff]  ;;  %v228_v57 = vld [vmem:[%s2963_s25 + $0x190] sm:$0xff] }
  0x5e   : > { %1770 = vst [vmem:[%s3009_s20 + $0xc0] sm:$0xff] %v1002_v1  ;;  %1771 = vst [vmem:[%s3009_s20 + $0xc8] sm:$0xff] %v1003_v2  ;;  %v1022_v48 = vmul.f32 %v2980_v14, %v222_v45  ;;  %v1023_v49 = vmul.f32 %v2983_v16, %v223_v46  ;;  %v1024_v50 = vmul.f32 %v2986_v18, %v224_v47  ;;  %v229_v58 = vld [vmem:[%s2963_s25 + $0x198] sm:$0xff]  ;;  %v230_v59 = vld [vmem:[%s2963_s25 + $0x1a0] sm:$0xff] }
  0x5f   : > { %1772 = vst [vmem:[%s3009_s20 + $0xd0] sm:$0xff] %v1004_v6  ;;  %1773 = vst [vmem:[%s3009_s20 + $0xd8] sm:$0xff] %v1005_v7  ;;  %v1025_v54 = vmul.f32 %v2989_v20, %v225_v51  ;;  %v1026_v55 = vmul.f32 %v2975_v11, %v226_v52  ;;  %v1027_v56 = vmul.f32 %v2977_v12, %v227_v53  ;;  %v231_v63 = vld [vmem:[%s2963_s25 + $0x1a8] sm:$0xff]  ;;  %v232_v0 = vld [vmem:[%s2963_s25 + $0x1b0] sm:$0xff] }
  0x60   : > { %1774 = vst [vmem:[%s3009_s20 + $0xe0] sm:$0xff] %v1006_v8  ;;  %1775 = vst [vmem:[%s3009_s20 + $0xe8] sm:$0xff] %v1007_v15  ;;  %v1028_v60 = vmul.f32 %v2980_v14, %v228_v57  ;;  %v1029_v61 = vmul.f32 %v2983_v16, %v229_v58  ;;  %v1030_v62 = vmul.f32 %v2986_v18, %v230_v59  ;;  %v233_v1 = vld [vmem:[%s2963_s25 + $0x1b8] sm:$0xff]  ;;  %v234_v5 = vld [vmem:[%s2963_s25 + $0x1c0] sm:$0xff] }
  0x61   : > { %1776 = vst [vmem:[%s3009_s20 + $0xf0] sm:$0xff] %v1008_v17  ;;  %1777 = vst [vmem:[%s3009_s20 + $0xf8] sm:$0xff] %v1009_v19  ;;  %v1031_v2 = vmul.f32 %v2989_v20, %v231_v63  ;;  %v1032_v3 = vmul.f32 %v2975_v11, %v232_v0  ;;  %v1033_v4 = vmul.f32 %v2977_v12, %v233_v1  ;;  %v235_v6 = vld [vmem:[%s2963_s25 + $0x1c8] sm:$0xff]  ;;  %v236_v7 = vld [vmem:[%s2963_s25 + $0x1d0] sm:$0xff] }
  0x62   : > { %1778 = vst [vmem:[%s3009_s20 + $0x100] sm:$0xff] %v1010_v24  ;;  %1779 = vst [vmem:[%s3009_s20 + $0x108] sm:$0xff] %v1011_v25  ;;  %v1034_v8 = vmul.f32 %v2980_v14, %v234_v5  ;;  %v1035_v9 = vmul.f32 %v2983_v16, %v235_v6  ;;  %v1036_v10 = vmul.f32 %v2986_v18, %v236_v7  ;;  %v237_v13 = vld [vmem:[%s2963_s25 + $0x1d8] sm:$0xff]  ;;  %v238_v15 = vld [vmem:[%s2963_s25 + $0x1e0] sm:$0xff] }
  0x63   : > { %1780 = vst [vmem:[%s3009_s20 + $0x110] sm:$0xff] %v1012_v26  ;;  %1781 = vst [vmem:[%s3009_s20 + $0x118] sm:$0xff] %v1013_v30  ;;  %v239_v17 = vld [vmem:[%s2963_s25 + $0x1e8] sm:$0xff]  ;;  %v1037_v19 = vmul.f32 %v2989_v20, %v237_v13  ;;  %v1038_v21 = vmul.f32 %v2975_v11, %v238_v15  ;;  %v240_v23 = vld [vmem:[%s2963_s25 + $0x1f0] sm:$0xff] }
  0x64   : > { %1782 = vst [vmem:[%s3009_s20 + $0x120] sm:$0xff] %v1014_v31  ;;  %1783 = vst [vmem:[%s3009_s20 + $0x128] sm:$0xff] %v1015_v32  ;;  %v1039_v22 = vmul.f32 %v2977_v12, %v239_v17  ;;  %v241_v24 = vld [vmem:[%s2963_s25 + $0x1f8] sm:$0xff]  ;;  %v242_v25 = vld [vmem:[%s2963_s25 + $0x200] sm:$0xff]  ;;  %v1040_v26 = vmul.f32 %v2980_v14, %v240_v23 }
  0x65   : > { %1784 = vst [vmem:[%s3009_s20 + $0x130] sm:$0xff] %v1016_v36  ;;  %1785 = vst [vmem:[%s3009_s20 + $0x138] sm:$0xff] %v1017_v37  ;;  %v1041_v27 = vmul.f32 %v2983_v16, %v241_v24  ;;  %v1042_v28 = vmul.f32 %v2986_v18, %v242_v25  ;;  %v243_v29 = vld [vmem:[%s2963_s25 + $0x208] sm:$0xff]  ;;  %v244_v30 = vld [vmem:[%s2963_s25 + $0x210] sm:$0xff] }
  0x66   : > { %1786 = vst [vmem:[%s3009_s20 + $0x140] sm:$0xff] %v1018_v38  ;;  %1787 = vst [vmem:[%s3009_s20 + $0x148] sm:$0xff] %v1019_v42  ;;  %v245_v31 = vld [vmem:[%s2963_s25 + $0x218] sm:$0xff]  ;;  %v1043_v32 = vmul.f32 %v2989_v20, %v243_v29  ;;  %v1044_v33 = vmul.f32 %v2975_v11, %v244_v30  ;;  %v246_v35 = vld [vmem:[%s2963_s25 + $0x220] sm:$0xff] }
  0x67   : > { %1788 = vst [vmem:[%s3009_s20 + $0x150] sm:$0xff] %v1020_v43  ;;  %1789 = vst [vmem:[%s3009_s20 + $0x158] sm:$0xff] %v1021_v44  ;;  %v1045_v34 = vmul.f32 %v2977_v12, %v245_v31  ;;  %v247_v36 = vld [vmem:[%s2963_s25 + $0x228] sm:$0xff]  ;;  %v248_v37 = vld [vmem:[%s2963_s25 + $0x230] sm:$0xff]  ;;  %v1046_v38 = vmul.f32 %v2980_v14, %v246_v35 }
  0x68   : > { %1790 = vst [vmem:[%s3009_s20 + $0x160] sm:$0xff] %v1022_v48  ;;  %1791 = vst [vmem:[%s3009_s20 + $0x168] sm:$0xff] %v1023_v49  ;;  %v1047_v39 = vmul.f32 %v2983_v16, %v247_v36  ;;  %v1048_v40 = vmul.f32 %v2986_v18, %v248_v37  ;;  %v249_v41 = vld [vmem:[%s2963_s25 + $0x238] sm:$0xff]  ;;  %v250_v42 = vld [vmem:[%s2963_s25 + $0x240] sm:$0xff] }
  0x69   : > { %1792 = vst [vmem:[%s3009_s20 + $0x170] sm:$0xff] %v1024_v50  ;;  %1793 = vst [vmem:[%s3009_s20 + $0x178] sm:$0xff] %v1025_v54  ;;  %v251_v43 = vld [vmem:[%s2963_s25 + $0x248] sm:$0xff]  ;;  %v1049_v44 = vmul.f32 %v2989_v20, %v249_v41  ;;  %v1050_v45 = vmul.f32 %v2975_v11, %v250_v42  ;;  %v252_v47 = vld [vmem:[%s2963_s25 + $0x250] sm:$0xff] }
  0x6a   : > { %1794 = vst [vmem:[%s3009_s20 + $0x180] sm:$0xff] %v1026_v55  ;;  %1795 = vst [vmem:[%s3009_s20 + $0x188] sm:$0xff] %v1027_v56  ;;  %v1051_v46 = vmul.f32 %v2977_v12, %v251_v43  ;;  %v253_v48 = vld [vmem:[%s2963_s25 + $0x258] sm:$0xff]  ;;  %v254_v49 = vld [vmem:[%s2963_s25 + $0x260] sm:$0xff]  ;;  %v1052_v50 = vmul.f32 %v2980_v14, %v252_v47 }
  0x6b   : > { %1796 = vst [vmem:[%s3009_s20 + $0x190] sm:$0xff] %v1028_v60  ;;  %1797 = vst [vmem:[%s3009_s20 + $0x198] sm:$0xff] %v1029_v61  ;;  %v1053_v51 = vmul.f32 %v2983_v16, %v253_v48  ;;  %v1054_v52 = vmul.f32 %v2986_v18, %v254_v49  ;;  %v255_v53 = vld [vmem:[%s2963_s25 + $0x268] sm:$0xff]  ;;  %v256_v54 = vld [vmem:[%s2963_s25 + $0x270] sm:$0xff] }
  0x6c   : > { %1798 = vst [vmem:[%s3009_s20 + $0x1a0] sm:$0xff] %v1030_v62  ;;  %1799 = vst [vmem:[%s3009_s20 + $0x1a8] sm:$0xff] %v1031_v2  ;;  %v257_v55 = vld [vmem:[%s2963_s25 + $0x278] sm:$0xff]  ;;  %v1055_v56 = vmul.f32 %v2989_v20, %v255_v53  ;;  %v1056_v57 = vmul.f32 %v2975_v11, %v256_v54  ;;  %v258_v59 = vld [vmem:[%s2963_s25 + $0x280] sm:$0xff] }
  0x6d   : > { %1800 = vst [vmem:[%s3009_s20 + $0x1b0] sm:$0xff] %v1032_v3  ;;  %1801 = vst [vmem:[%s3009_s20 + $0x1b8] sm:$0xff] %v1033_v4  ;;  %v1057_v58 = vmul.f32 %v2977_v12, %v257_v55  ;;  %v259_v60 = vld [vmem:[%s2963_s25 + $0x288] sm:$0xff]  ;;  %v260_v61 = vld [vmem:[%s2963_s25 + $0x290] sm:$0xff]  ;;  %v1058_v62 = vmul.f32 %v2980_v14, %v258_v59 }
  0x6e   : > { %1802 = vst [vmem:[%s3009_s20 + $0x1c0] sm:$0xff] %v1034_v8  ;;  %1803 = vst [vmem:[%s3009_s20 + $0x1c8] sm:$0xff] %v1035_v9  ;;  %v1059_v63 = vmul.f32 %v2983_v16, %v259_v60  ;;  %v1060_v0 = vmul.f32 %v2986_v18, %v260_v61  ;;  %v261_v1 = vld [vmem:[%s2963_s25 + $0x298] sm:$0xff]  ;;  %v262_v2 = vld [vmem:[%s2963_s25 + $0x2a0] sm:$0xff] }
  0x6f   : > { %1804 = vst [vmem:[%s3009_s20 + $0x1d0] sm:$0xff] %v1036_v10  ;;  %1805 = vst [vmem:[%s3009_s20 + $0x1d8] sm:$0xff] %v1037_v19  ;;  %v263_v3 = vld [vmem:[%s2963_s25 + $0x2a8] sm:$0xff]  ;;  %v1061_v4 = vmul.f32 %v2989_v20, %v261_v1  ;;  %v1062_v5 = vmul.f32 %v2975_v11, %v262_v2  ;;  %v264_v7 = vld [vmem:[%s2963_s25 + $0x2b0] sm:$0xff] }
  0x70   : > { %1806 = vst [vmem:[%s3009_s20 + $0x1e0] sm:$0xff] %v1038_v21  ;;  %1807 = vst [vmem:[%s3009_s20 + $0x1e8] sm:$0xff] %v1039_v22  ;;  %v1063_v6 = vmul.f32 %v2977_v12, %v263_v3  ;;  %v265_v8 = vld [vmem:[%s2963_s25 + $0x2b8] sm:$0xff]  ;;  %v266_v9 = vld [vmem:[%s2963_s25 + $0x2c0] sm:$0xff]  ;;  %v1064_v10 = vmul.f32 %v2980_v14, %v264_v7 }
  0x71   : > { %1808 = vst [vmem:[%s3009_s20 + $0x1f0] sm:$0xff] %v1040_v26  ;;  %1809 = vst [vmem:[%s3009_s20 + $0x1f8] sm:$0xff] %v1041_v27  ;;  %v1065_v13 = vmul.f32 %v2983_v16, %v265_v8  ;;  %v1066_v15 = vmul.f32 %v2986_v18, %v266_v9  ;;  %v267_v17 = vld [vmem:[%s2963_s25 + $0x2c8] sm:$0xff]  ;;  %v268_v19 = vld [vmem:[%s2963_s25 + $0x2d0] sm:$0xff] }
  0x72   : > { %1810 = vst [vmem:[%s3009_s20 + $0x200] sm:$0xff] %v1042_v28  ;;  %1811 = vst [vmem:[%s3009_s20 + $0x208] sm:$0xff] %v1043_v32  ;;  %v269_v21 = vld [vmem:[%s2963_s25 + $0x2d8] sm:$0xff]  ;;  %v1067_v22 = vmul.f32 %v2989_v20, %v267_v17  ;;  %v1068_v23 = vmul.f32 %v2975_v11, %v268_v19  ;;  %v270_v25 = vld [vmem:[%s2963_s25 + $0x2e0] sm:$0xff] }
  0x73   : > { %1812 = vst [vmem:[%s3009_s20 + $0x210] sm:$0xff] %v1044_v33  ;;  %1813 = vst [vmem:[%s3009_s20 + $0x218] sm:$0xff] %v1045_v34  ;;  %v1069_v24 = vmul.f32 %v2977_v12, %v269_v21  ;;  %v271_v26 = vld [vmem:[%s2963_s25 + $0x2e8] sm:$0xff]  ;;  %v272_v27 = vld [vmem:[%s2963_s25 + $0x2f0] sm:$0xff]  ;;  %v1070_v28 = vmul.f32 %v2980_v14, %v270_v25 }
  0x74   : > { %1814 = vst [vmem:[%s3009_s20 + $0x220] sm:$0xff] %v1046_v38  ;;  %1815 = vst [vmem:[%s3009_s20 + $0x228] sm:$0xff] %v1047_v39  ;;  %v1071_v29 = vmul.f32 %v2983_v16, %v271_v26  ;;  %v1072_v30 = vmul.f32 %v2986_v18, %v272_v27  ;;  %v273_v31 = vld [vmem:[%s2963_s25 + $0x2f8] sm:$0xff]  ;;  %v274_v32 = vld [vmem:[%s2963_s25 + $0x300] sm:$0xff] }
  0x75   : > { %1816 = vst [vmem:[%s3009_s20 + $0x230] sm:$0xff] %v1048_v40  ;;  %1817 = vst [vmem:[%s3009_s20 + $0x238] sm:$0xff] %v1049_v44  ;;  %v275_v33 = vld [vmem:[%s2963_s25 + $0x308] sm:$0xff]  ;;  %v1073_v34 = vmul.f32 %v2989_v20, %v273_v31  ;;  %v1074_v35 = vmul.f32 %v2975_v11, %v274_v32  ;;  %v276_v37 = vld [vmem:[%s2963_s25 + $0x310] sm:$0xff] }
  0x76   : > { %1818 = vst [vmem:[%s3009_s20 + $0x240] sm:$0xff] %v1050_v45  ;;  %1819 = vst [vmem:[%s3009_s20 + $0x248] sm:$0xff] %v1051_v46  ;;  %v1075_v36 = vmul.f32 %v2977_v12, %v275_v33  ;;  %v277_v38 = vld [vmem:[%s2963_s25 + $0x318] sm:$0xff]  ;;  %v278_v39 = vld [vmem:[%s2963_s25 + $0x320] sm:$0xff]  ;;  %v1076_v40 = vmul.f32 %v2980_v14, %v276_v37 }
  0x77   : > { %1820 = vst [vmem:[%s3009_s20 + $0x250] sm:$0xff] %v1052_v50  ;;  %1821 = vst [vmem:[%s3009_s20 + $0x258] sm:$0xff] %v1053_v51  ;;  %v1077_v41 = vmul.f32 %v2983_v16, %v277_v38  ;;  %v1078_v42 = vmul.f32 %v2986_v18, %v278_v39  ;;  %v279_v43 = vld [vmem:[%s2963_s25 + $0x328] sm:$0xff]  ;;  %v280_v44 = vld [vmem:[%s2963_s25 + $0x330] sm:$0xff] }
  0x78   : > { %1822 = vst [vmem:[%s3009_s20 + $0x260] sm:$0xff] %v1054_v52  ;;  %1823 = vst [vmem:[%s3009_s20 + $0x268] sm:$0xff] %v1055_v56  ;;  %v281_v45 = vld [vmem:[%s2963_s25 + $0x338] sm:$0xff]  ;;  %v1079_v46 = vmul.f32 %v2989_v20, %v279_v43  ;;  %v1080_v47 = vmul.f32 %v2975_v11, %v280_v44  ;;  %v282_v49 = vld [vmem:[%s2963_s25 + $0x340] sm:$0xff] }
  0x79   : > { %1824 = vst [vmem:[%s3009_s20 + $0x270] sm:$0xff] %v1056_v57  ;;  %1825 = vst [vmem:[%s3009_s20 + $0x278] sm:$0xff] %v1057_v58  ;;  %v1081_v48 = vmul.f32 %v2977_v12, %v281_v45  ;;  %v283_v50 = vld [vmem:[%s2963_s25 + $0x348] sm:$0xff]  ;;  %v284_v51 = vld [vmem:[%s2963_s25 + $0x350] sm:$0xff]  ;;  %v1082_v52 = vmul.f32 %v2980_v14, %v282_v49 }
  0x7a   : > { %1826 = vst [vmem:[%s3009_s20 + $0x280] sm:$0xff] %v1058_v62  ;;  %1827 = vst [vmem:[%s3009_s20 + $0x288] sm:$0xff] %v1059_v63  ;;  %v1083_v53 = vmul.f32 %v2983_v16, %v283_v50  ;;  %v1084_v54 = vmul.f32 %v2986_v18, %v284_v51  ;;  %v285_v55 = vld [vmem:[%s2963_s25 + $0x358] sm:$0xff]  ;;  %v286_v56 = vld [vmem:[%s2963_s25 + $0x360] sm:$0xff] }
  0x7b   : > { %1828 = vst [vmem:[%s3009_s20 + $0x290] sm:$0xff] %v1060_v0  ;;  %1829 = vst [vmem:[%s3009_s20 + $0x298] sm:$0xff] %v1061_v4  ;;  %v287_v57 = vld [vmem:[%s2963_s25 + $0x368] sm:$0xff]  ;;  %v1085_v58 = vmul.f32 %v2989_v20, %v285_v55  ;;  %v1086_v59 = vmul.f32 %v2975_v11, %v286_v56  ;;  %v288_v61 = vld [vmem:[%s2963_s25 + $0x370] sm:$0xff] }
  0x7c   : > { %1830 = vst [vmem:[%s3009_s20 + $0x2a0] sm:$0xff] %v1062_v5  ;;  %1831 = vst [vmem:[%s3009_s20 + $0x2a8] sm:$0xff] %v1063_v6  ;;  %v1087_v60 = vmul.f32 %v2977_v12, %v287_v57  ;;  %v289_v62 = vld [vmem:[%s2963_s25 + $0x378] sm:$0xff]  ;;  %v290_v63 = vld [vmem:[%s2963_s25 + $0x380] sm:$0xff]  ;;  %v1088_v0 = vmul.f32 %v2980_v14, %v288_v61 }
  0x7d   : > { %1832 = vst [vmem:[%s3009_s20 + $0x2b0] sm:$0xff] %v1064_v10  ;;  %1833 = vst [vmem:[%s3009_s20 + $0x2b8] sm:$0xff] %v1065_v13  ;;  %v1089_v1 = vmul.f32 %v2983_v16, %v289_v62  ;;  %v1090_v2 = vmul.f32 %v2986_v18, %v290_v63  ;;  %v291_v3 = vld [vmem:[%s2963_s25 + $0x388] sm:$0xff]  ;;  %v292_v4 = vld [vmem:[%s2963_s25 + $0x390] sm:$0xff] }
  0x7e   : > { %1834 = vst [vmem:[%s3009_s20 + $0x2c0] sm:$0xff] %v1066_v15  ;;  %1835 = vst [vmem:[%s3009_s20 + $0x2c8] sm:$0xff] %v1067_v22  ;;  %v293_v5 = vld [vmem:[%s2963_s25 + $0x398] sm:$0xff]  ;;  %v1091_v6 = vmul.f32 %v2989_v20, %v291_v3  ;;  %v1092_v7 = vmul.f32 %v2975_v11, %v292_v4  ;;  %v294_v9 = vld [vmem:[%s2963_s25 + $0x3a0] sm:$0xff] }
  0x7f   : > { %1836 = vst [vmem:[%s3009_s20 + $0x2d0] sm:$0xff] %v1068_v23  ;;  %1837 = vst [vmem:[%s3009_s20 + $0x2d8] sm:$0xff] %v1069_v24  ;;  %v1093_v8 = vmul.f32 %v2977_v12, %v293_v5  ;;  %v295_v10 = vld [vmem:[%s2963_s25 + $0x3a8] sm:$0xff]  ;;  %v296_v13 = vld [vmem:[%s2963_s25 + $0x3b0] sm:$0xff]  ;;  %v1094_v15 = vmul.f32 %v2980_v14, %v294_v9 }
  0x80   : > { %1838 = vst [vmem:[%s3009_s20 + $0x2e0] sm:$0xff] %v1070_v28  ;;  %1839 = vst [vmem:[%s3009_s20 + $0x2e8] sm:$0xff] %v1071_v29  ;;  %v1095_v17 = vmul.f32 %v2983_v16, %v295_v10  ;;  %v1096_v19 = vmul.f32 %v2986_v18, %v296_v13  ;;  %v297_v21 = vld [vmem:[%s2963_s25 + $0x3b8] sm:$0xff]  ;;  %v298_v22 = vld [vmem:[%s2963_s25 + $0x3c0] sm:$0xff] }
  0x81   : > { %1840 = vst [vmem:[%s3009_s20 + $0x2f0] sm:$0xff] %v1072_v30  ;;  %1841 = vst [vmem:[%s3009_s20 + $0x2f8] sm:$0xff] %v1073_v34  ;;  %v299_v23 = vld [vmem:[%s2963_s25 + $0x3c8] sm:$0xff]  ;;  %v1097_v24 = vmul.f32 %v2989_v20, %v297_v21  ;;  %v1098_v25 = vmul.f32 %v2975_v11, %v298_v22  ;;  %v300_v27 = vld [vmem:[%s2963_s25 + $0x3d0] sm:$0xff] }
  0x82   : > { %1842 = vst [vmem:[%s3009_s20 + $0x300] sm:$0xff] %v1074_v35  ;;  %1843 = vst [vmem:[%s3009_s20 + $0x308] sm:$0xff] %v1075_v36  ;;  %v1099_v26 = vmul.f32 %v2977_v12, %v299_v23  ;;  %v301_v28 = vld [vmem:[%s2963_s25 + $0x3d8] sm:$0xff]  ;;  %v302_v29 = vld [vmem:[%s2963_s25 + $0x3e0] sm:$0xff]  ;;  %v1100_v30 = vmul.f32 %v2980_v14, %v300_v27 }
  0x83   : > { %1844 = vst [vmem:[%s3009_s20 + $0x310] sm:$0xff] %v1076_v40  ;;  %1845 = vst [vmem:[%s3009_s20 + $0x318] sm:$0xff] %v1077_v41  ;;  %v1101_v31 = vmul.f32 %v2983_v16, %v301_v28  ;;  %v1102_v32 = vmul.f32 %v2986_v18, %v302_v29  ;;  %v303_v33 = vld [vmem:[%s2963_s25 + $0x3e8] sm:$0xff]  ;;  %v304_v34 = vld [vmem:[%s2963_s25 + $0x3f0] sm:$0xff] }
  0x84   : > { %1846 = vst [vmem:[%s3009_s20 + $0x320] sm:$0xff] %v1078_v42  ;;  %1847 = vst [vmem:[%s3009_s20 + $0x328] sm:$0xff] %v1079_v46  ;;  %v305_v35 = vld [vmem:[%s2963_s25 + $0x3f8] sm:$0xff]  ;;  %v1103_v36 = vmul.f32 %v2989_v20, %v303_v33  ;;  %v1104_v37 = vmul.f32 %v2975_v11, %v304_v34  ;;  %v306_v39 = vld [vmem:[%s2963_s25 + $0x400] sm:$0xff] }
  0x85   : > { %1848 = vst [vmem:[%s3009_s20 + $0x330] sm:$0xff] %v1080_v47  ;;  %1849 = vst [vmem:[%s3009_s20 + $0x338] sm:$0xff] %v1081_v48  ;;  %v1105_v38 = vmul.f32 %v2977_v12, %v305_v35  ;;  %v307_v40 = vld [vmem:[%s2963_s25 + $0x408] sm:$0xff]  ;;  %v308_v41 = vld [vmem:[%s2963_s25 + $0x410] sm:$0xff]  ;;  %v1106_v42 = vmul.f32 %v2980_v14, %v306_v39 }
  0x86   : > { %1850 = vst [vmem:[%s3009_s20 + $0x340] sm:$0xff] %v1082_v52  ;;  %1851 = vst [vmem:[%s3009_s20 + $0x348] sm:$0xff] %v1083_v53  ;;  %v1107_v43 = vmul.f32 %v2983_v16, %v307_v40  ;;  %v1108_v44 = vmul.f32 %v2986_v18, %v308_v41  ;;  %v309_v45 = vld [vmem:[%s2963_s25 + $0x418] sm:$0xff]  ;;  %v310_v46 = vld [vmem:[%s2963_s25 + $0x420] sm:$0xff] }
  0x87   : > { %1852 = vst [vmem:[%s3009_s20 + $0x350] sm:$0xff] %v1084_v54  ;;  %1853 = vst [vmem:[%s3009_s20 + $0x358] sm:$0xff] %v1085_v58  ;;  %v311_v47 = vld [vmem:[%s2963_s25 + $0x428] sm:$0xff]  ;;  %v1109_v48 = vmul.f32 %v2989_v20, %v309_v45  ;;  %v1110_v49 = vmul.f32 %v2975_v11, %v310_v46  ;;  %v312_v51 = vld [vmem:[%s2963_s25 + $0x430] sm:$0xff] }
  0x88   : > { %1854 = vst [vmem:[%s3009_s20 + $0x360] sm:$0xff] %v1086_v59  ;;  %1855 = vst [vmem:[%s3009_s20 + $0x368] sm:$0xff] %v1087_v60  ;;  %v1111_v50 = vmul.f32 %v2977_v12, %v311_v47  ;;  %v313_v52 = vld [vmem:[%s2963_s25 + $0x438] sm:$0xff]  ;;  %v314_v53 = vld [vmem:[%s2963_s25 + $0x440] sm:$0xff]  ;;  %v1112_v54 = vmul.f32 %v2980_v14, %v312_v51 }
  0x89   : > { %1856 = vst [vmem:[%s3009_s20 + $0x370] sm:$0xff] %v1088_v0  ;;  %1857 = vst [vmem:[%s3009_s20 + $0x378] sm:$0xff] %v1089_v1  ;;  %v1113_v55 = vmul.f32 %v2983_v16, %v313_v52  ;;  %v1114_v56 = vmul.f32 %v2986_v18, %v314_v53  ;;  %v315_v57 = vld [vmem:[%s2963_s25 + $0x448] sm:$0xff]  ;;  %v316_v58 = vld [vmem:[%s2963_s25 + $0x450] sm:$0xff] }
  0x8a   : > { %1858 = vst [vmem:[%s3009_s20 + $0x380] sm:$0xff] %v1090_v2  ;;  %1859 = vst [vmem:[%s3009_s20 + $0x388] sm:$0xff] %v1091_v6  ;;  %v317_v59 = vld [vmem:[%s2963_s25 + $0x458] sm:$0xff]  ;;  %v1115_v60 = vmul.f32 %v2989_v20, %v315_v57  ;;  %v1116_v61 = vmul.f32 %v2975_v11, %v316_v58  ;;  %v318_v63 = vld [vmem:[%s2963_s25 + $0x460] sm:$0xff] }
  0x8b   : > { %1860 = vst [vmem:[%s3009_s20 + $0x390] sm:$0xff] %v1092_v7  ;;  %1861 = vst [vmem:[%s3009_s20 + $0x398] sm:$0xff] %v1093_v8  ;;  %v1117_v62 = vmul.f32 %v2977_v12, %v317_v59  ;;  %v319_v0 = vld [vmem:[%s2963_s25 + $0x468] sm:$0xff]  ;;  %v320_v1 = vld [vmem:[%s2963_s25 + $0x470] sm:$0xff]  ;;  %v1118_v2 = vmul.f32 %v2980_v14, %v318_v63 }
  0x8c   : > { %1862 = vst [vmem:[%s3009_s20 + $0x3a0] sm:$0xff] %v1094_v15  ;;  %1863 = vst [vmem:[%s3009_s20 + $0x3a8] sm:$0xff] %v1095_v17  ;;  %v1119_v3 = vmul.f32 %v2983_v16, %v319_v0  ;;  %v1120_v4 = vmul.f32 %v2986_v18, %v320_v1  ;;  %v321_v5 = vld [vmem:[%s2963_s25 + $0x478] sm:$0xff]  ;;  %v322_v6 = vld [vmem:[%s2963_s25 + $0x480] sm:$0xff] }
  0x8d   : > { %1864 = vst [vmem:[%s3009_s20 + $0x3b0] sm:$0xff] %v1096_v19  ;;  %1865 = vst [vmem:[%s3009_s20 + $0x3b8] sm:$0xff] %v1097_v24  ;;  %v323_v7 = vld [vmem:[%s2963_s25 + $0x488] sm:$0xff]  ;;  %v1121_v8 = vmul.f32 %v2989_v20, %v321_v5  ;;  %v1122_v9 = vmul.f32 %v2975_v11, %v322_v6  ;;  %v324_v13 = vld [vmem:[%s2963_s25 + $0x490] sm:$0xff] }
  0x8e   : > { %1866 = vst [vmem:[%s3009_s20 + $0x3c0] sm:$0xff] %v1098_v25  ;;  %1867 = vst [vmem:[%s3009_s20 + $0x3c8] sm:$0xff] %v1099_v26  ;;  %v1123_v10 = vmul.f32 %v2977_v12, %v323_v7  ;;  %v325_v15 = vld [vmem:[%s2963_s25 + $0x498] sm:$0xff]  ;;  %v326_v17 = vld [vmem:[%s2963_s25 + $0x4a0] sm:$0xff]  ;;  %v1124_v19 = vmul.f32 %v2980_v14, %v324_v13 }
  0x8f   : > { %1868 = vst [vmem:[%s3009_s20 + $0x3d0] sm:$0xff] %v1100_v30  ;;  %1869 = vst [vmem:[%s3009_s20 + $0x3d8] sm:$0xff] %v1101_v31  ;;  %v1125_v21 = vmul.f32 %v2983_v16, %v325_v15  ;;  %v1126_v22 = vmul.f32 %v2986_v18, %v326_v17  ;;  %v327_v23 = vld [vmem:[%s2963_s25 + $0x4a8] sm:$0xff]  ;;  %v328_v24 = vld [vmem:[%s2963_s25 + $0x4b0] sm:$0xff] }
  0x90   : > { %1870 = vst [vmem:[%s3009_s20 + $0x3e0] sm:$0xff] %v1102_v32  ;;  %1871 = vst [vmem:[%s3009_s20 + $0x3e8] sm:$0xff] %v1103_v36  ;;  %v329_v25 = vld [vmem:[%s2963_s25 + $0x4b8] sm:$0xff]  ;;  %v1127_v26 = vmul.f32 %v2989_v20, %v327_v23  ;;  %v1128_v27 = vmul.f32 %v2975_v11, %v328_v24  ;;  %v330_v29 = vld [vmem:[%s2963_s25 + $0x4c0] sm:$0xff] }
  0x91   : > { %1872 = vst [vmem:[%s3009_s20 + $0x3f0] sm:$0xff] %v1104_v37  ;;  %1873 = vst [vmem:[%s3009_s20 + $0x3f8] sm:$0xff] %v1105_v38  ;;  %v1129_v28 = vmul.f32 %v2977_v12, %v329_v25  ;;  %v331_v30 = vld [vmem:[%s2963_s25 + $0x4c8] sm:$0xff]  ;;  %v332_v31 = vld [vmem:[%s2963_s25 + $0x4d0] sm:$0xff]  ;;  %v1130_v32 = vmul.f32 %v2980_v14, %v330_v29 }
  0x92   : > { %1874 = vst [vmem:[%s3009_s20 + $0x400] sm:$0xff] %v1106_v42  ;;  %1875 = vst [vmem:[%s3009_s20 + $0x408] sm:$0xff] %v1107_v43  ;;  %v1131_v33 = vmul.f32 %v2983_v16, %v331_v30  ;;  %v1132_v34 = vmul.f32 %v2986_v18, %v332_v31  ;;  %v333_v35 = vld [vmem:[%s2963_s25 + $0x4d8] sm:$0xff]  ;;  %v334_v36 = vld [vmem:[%s2963_s25 + $0x4e0] sm:$0xff] }
  0x93   : > { %1876 = vst [vmem:[%s3009_s20 + $0x410] sm:$0xff] %v1108_v44  ;;  %1877 = vst [vmem:[%s3009_s20 + $0x418] sm:$0xff] %v1109_v48  ;;  %v335_v37 = vld [vmem:[%s2963_s25 + $0x4e8] sm:$0xff]  ;;  %v1133_v38 = vmul.f32 %v2989_v20, %v333_v35  ;;  %v1134_v39 = vmul.f32 %v2975_v11, %v334_v36  ;;  %v336_v41 = vld [vmem:[%s2963_s25 + $0x4f0] sm:$0xff] }
  0x94   : > { %1878 = vst [vmem:[%s3009_s20 + $0x420] sm:$0xff] %v1110_v49  ;;  %1879 = vst [vmem:[%s3009_s20 + $0x428] sm:$0xff] %v1111_v50  ;;  %v1135_v40 = vmul.f32 %v2977_v12, %v335_v37  ;;  %v337_v42 = vld [vmem:[%s2963_s25 + $0x4f8] sm:$0xff]  ;;  %v338_v43 = vld [vmem:[%s2963_s25 + $0x500] sm:$0xff]  ;;  %v1136_v44 = vmul.f32 %v2980_v14, %v336_v41 }
  0x95   : > { %1880 = vst [vmem:[%s3009_s20 + $0x430] sm:$0xff] %v1112_v54  ;;  %1881 = vst [vmem:[%s3009_s20 + $0x438] sm:$0xff] %v1113_v55  ;;  %v1137_v45 = vmul.f32 %v2983_v16, %v337_v42  ;;  %v1138_v46 = vmul.f32 %v2986_v18, %v338_v43  ;;  %v339_v47 = vld [vmem:[%s2963_s25 + $0x508] sm:$0xff]  ;;  %v340_v48 = vld [vmem:[%s2963_s25 + $0x510] sm:$0xff] }
  0x96   : > { %1882 = vst [vmem:[%s3009_s20 + $0x440] sm:$0xff] %v1114_v56  ;;  %1883 = vst [vmem:[%s3009_s20 + $0x448] sm:$0xff] %v1115_v60  ;;  %v341_v49 = vld [vmem:[%s2963_s25 + $0x518] sm:$0xff]  ;;  %v1139_v50 = vmul.f32 %v2989_v20, %v339_v47  ;;  %v1140_v51 = vmul.f32 %v2975_v11, %v340_v48  ;;  %v342_v53 = vld [vmem:[%s2963_s25 + $0x520] sm:$0xff] }
  0x97   : > { %1884 = vst [vmem:[%s3009_s20 + $0x450] sm:$0xff] %v1116_v61  ;;  %1885 = vst [vmem:[%s3009_s20 + $0x458] sm:$0xff] %v1117_v62  ;;  %v1141_v52 = vmul.f32 %v2977_v12, %v341_v49  ;;  %v343_v54 = vld [vmem:[%s2963_s25 + $0x528] sm:$0xff]  ;;  %v344_v55 = vld [vmem:[%s2963_s25 + $0x530] sm:$0xff]  ;;  %v1142_v56 = vmul.f32 %v2980_v14, %v342_v53 }
  0x98   : > { %1886 = vst [vmem:[%s3009_s20 + $0x460] sm:$0xff] %v1118_v2  ;;  %1887 = vst [vmem:[%s3009_s20 + $0x468] sm:$0xff] %v1119_v3  ;;  %v1143_v57 = vmul.f32 %v2983_v16, %v343_v54  ;;  %v1144_v58 = vmul.f32 %v2986_v18, %v344_v55  ;;  %v345_v59 = vld [vmem:[%s2963_s25 + $0x538] sm:$0xff]  ;;  %v346_v60 = vld [vmem:[%s2963_s25 + $0x540] sm:$0xff] }
  0x99   : > { %1888 = vst [vmem:[%s3009_s20 + $0x470] sm:$0xff] %v1120_v4  ;;  %1889 = vst [vmem:[%s3009_s20 + $0x478] sm:$0xff] %v1121_v8  ;;  %v347_v61 = vld [vmem:[%s2963_s25 + $0x548] sm:$0xff]  ;;  %v1145_v62 = vmul.f32 %v2989_v20, %v345_v59  ;;  %v1146_v63 = vmul.f32 %v2975_v11, %v346_v60  ;;  %v348_v1 = vld [vmem:[%s2963_s25 + $0x550] sm:$0xff] }
  0x9a   : > { %1890 = vst [vmem:[%s3009_s20 + $0x480] sm:$0xff] %v1122_v9  ;;  %1891 = vst [vmem:[%s3009_s20 + $0x488] sm:$0xff] %v1123_v10  ;;  %v1147_v0 = vmul.f32 %v2977_v12, %v347_v61  ;;  %v349_v2 = vld [vmem:[%s2963_s25 + $0x558] sm:$0xff]  ;;  %v350_v3 = vld [vmem:[%s2963_s25 + $0x560] sm:$0xff]  ;;  %v1148_v4 = vmul.f32 %v2980_v14, %v348_v1 }
  0x9b   : > { %1892 = vst [vmem:[%s3009_s20 + $0x490] sm:$0xff] %v1124_v19  ;;  %1893 = vst [vmem:[%s3009_s20 + $0x498] sm:$0xff] %v1125_v21  ;;  %v1149_v5 = vmul.f32 %v2983_v16, %v349_v2  ;;  %v1150_v6 = vmul.f32 %v2986_v18, %v350_v3  ;;  %v351_v7 = vld [vmem:[%s2963_s25 + $0x568] sm:$0xff]  ;;  %v352_v8 = vld [vmem:[%s2963_s25 + $0x570] sm:$0xff] }
  0x9c   : > { %1894 = vst [vmem:[%s3009_s20 + $0x4a0] sm:$0xff] %v1126_v22  ;;  %1895 = vst [vmem:[%s3009_s20 + $0x4a8] sm:$0xff] %v1127_v26  ;;  %v353_v9 = vld [vmem:[%s2963_s25 + $0x578] sm:$0xff]  ;;  %v1151_v10 = vmul.f32 %v2989_v20, %v351_v7  ;;  %v1152_v13 = vmul.f32 %v2975_v11, %v352_v8  ;;  %v354_v17 = vld [vmem:[%s2963_s25 + $0x580] sm:$0xff] }
  0x9d   : > { %1896 = vst [vmem:[%s3009_s20 + $0x4b0] sm:$0xff] %v1128_v27  ;;  %1897 = vst [vmem:[%s3009_s20 + $0x4b8] sm:$0xff] %v1129_v28  ;;  %v1153_v15 = vmul.f32 %v2977_v12, %v353_v9  ;;  %v355_v19 = vld [vmem:[%s2963_s25 + $0x588] sm:$0xff]  ;;  %v356_v21 = vld [vmem:[%s2963_s25 + $0x590] sm:$0xff]  ;;  %v1154_v22 = vmul.f32 %v2980_v14, %v354_v17 }
  0x9e   : > { %1898 = vst [vmem:[%s3009_s20 + $0x4c0] sm:$0xff] %v1130_v32  ;;  %1899 = vst [vmem:[%s3009_s20 + $0x4c8] sm:$0xff] %v1131_v33  ;;  %v1155_v23 = vmul.f32 %v2983_v16, %v355_v19  ;;  %v1156_v24 = vmul.f32 %v2986_v18, %v356_v21  ;;  %v357_v25 = vld [vmem:[%s2963_s25 + $0x598] sm:$0xff]  ;;  %v358_v26 = vld [vmem:[%s2963_s25 + $0x5a0] sm:$0xff] }
  0x9f   : > { %1900 = vst [vmem:[%s3009_s20 + $0x4d0] sm:$0xff] %v1132_v34  ;;  %1901 = vst [vmem:[%s3009_s20 + $0x4d8] sm:$0xff] %v1133_v38  ;;  %v359_v27 = vld [vmem:[%s2963_s25 + $0x5a8] sm:$0xff]  ;;  %v1157_v28 = vmul.f32 %v2989_v20, %v357_v25  ;;  %v1158_v29 = vmul.f32 %v2975_v11, %v358_v26  ;;  %v360_v31 = vld [vmem:[%s2963_s25 + $0x5b0] sm:$0xff] }
  0xa0   : > { %1902 = vst [vmem:[%s3009_s20 + $0x4e0] sm:$0xff] %v1134_v39  ;;  %1903 = vst [vmem:[%s3009_s20 + $0x4e8] sm:$0xff] %v1135_v40  ;;  %v1159_v30 = vmul.f32 %v2977_v12, %v359_v27  ;;  %v361_v32 = vld [vmem:[%s2963_s25 + $0x5b8] sm:$0xff]  ;;  %v362_v33 = vld [vmem:[%s2963_s25 + $0x5c0] sm:$0xff]  ;;  %v1160_v34 = vmul.f32 %v2980_v14, %v360_v31 }
  0xa1   : > { %1904 = vst [vmem:[%s3009_s20 + $0x4f0] sm:$0xff] %v1136_v44  ;;  %1905 = vst [vmem:[%s3009_s20 + $0x4f8] sm:$0xff] %v1137_v45  ;;  %v1161_v35 = vmul.f32 %v2983_v16, %v361_v32  ;;  %v1162_v36 = vmul.f32 %v2986_v18, %v362_v33  ;;  %v363_v37 = vld [vmem:[%s2963_s25 + $0x5c8] sm:$0xff]  ;;  %v364_v38 = vld [vmem:[%s2963_s25 + $0x5d0] sm:$0xff] }
  0xa2   : > { %1906 = vst [vmem:[%s3009_s20 + $0x500] sm:$0xff] %v1138_v46  ;;  %1907 = vst [vmem:[%s3009_s20 + $0x508] sm:$0xff] %v1139_v50  ;;  %v365_v39 = vld [vmem:[%s2963_s25 + $0x5d8] sm:$0xff]  ;;  %v1163_v40 = vmul.f32 %v2989_v20, %v363_v37  ;;  %v1164_v41 = vmul.f32 %v2975_v11, %v364_v38  ;;  %v366_v43 = vld [vmem:[%s2963_s25 + $0x5e0] sm:$0xff] }
  0xa3   : > { %1908 = vst [vmem:[%s3009_s20 + $0x510] sm:$0xff] %v1140_v51  ;;  %1909 = vst [vmem:[%s3009_s20 + $0x518] sm:$0xff] %v1141_v52  ;;  %v1165_v42 = vmul.f32 %v2977_v12, %v365_v39  ;;  %v367_v44 = vld [vmem:[%s2963_s25 + $0x5e8] sm:$0xff]  ;;  %v368_v45 = vld [vmem:[%s2963_s25 + $0x5f0] sm:$0xff]  ;;  %v1166_v46 = vmul.f32 %v2980_v14, %v366_v43 }
  0xa4   : > { %1910 = vst [vmem:[%s3009_s20 + $0x520] sm:$0xff] %v1142_v56  ;;  %1911 = vst [vmem:[%s3009_s20 + $0x528] sm:$0xff] %v1143_v57  ;;  %v1167_v47 = vmul.f32 %v2983_v16, %v367_v44  ;;  %v1168_v48 = vmul.f32 %v2986_v18, %v368_v45  ;;  %v369_v49 = vld [vmem:[%s2963_s25 + $0x5f8] sm:$0xff]  ;;  %v370_v50 = vld [vmem:[%s2963_s25 + $0x600] sm:$0xff] }
  0xa5   : > { %1912 = vst [vmem:[%s3009_s20 + $0x530] sm:$0xff] %v1144_v58  ;;  %1913 = vst [vmem:[%s3009_s20 + $0x538] sm:$0xff] %v1145_v62  ;;  %v371_v51 = vld [vmem:[%s2963_s25 + $0x608] sm:$0xff]  ;;  %v1169_v52 = vmul.f32 %v2989_v20, %v369_v49  ;;  %v1170_v53 = vmul.f32 %v2975_v11, %v370_v50  ;;  %v372_v55 = vld [vmem:[%s2963_s25 + $0x610] sm:$0xff] }
  0xa6   : > { %1914 = vst [vmem:[%s3009_s20 + $0x540] sm:$0xff] %v1146_v63  ;;  %1915 = vst [vmem:[%s3009_s20 + $0x548] sm:$0xff] %v1147_v0  ;;  %v1171_v54 = vmul.f32 %v2977_v12, %v371_v51  ;;  %v373_v56 = vld [vmem:[%s2963_s25 + $0x618] sm:$0xff]  ;;  %v374_v57 = vld [vmem:[%s2963_s25 + $0x620] sm:$0xff]  ;;  %v1172_v58 = vmul.f32 %v2980_v14, %v372_v55 }
  0xa7   : > { %1916 = vst [vmem:[%s3009_s20 + $0x550] sm:$0xff] %v1148_v4  ;;  %1917 = vst [vmem:[%s3009_s20 + $0x558] sm:$0xff] %v1149_v5  ;;  %v1173_v59 = vmul.f32 %v2983_v16, %v373_v56  ;;  %v1174_v60 = vmul.f32 %v2986_v18, %v374_v57  ;;  %v375_v61 = vld [vmem:[%s2963_s25 + $0x628] sm:$0xff]  ;;  %v376_v62 = vld [vmem:[%s2963_s25 + $0x630] sm:$0xff] }
  0xa8   : > { %1918 = vst [vmem:[%s3009_s20 + $0x560] sm:$0xff] %v1150_v6  ;;  %1919 = vst [vmem:[%s3009_s20 + $0x568] sm:$0xff] %v1151_v10  ;;  %v377_v63 = vld [vmem:[%s2963_s25 + $0x638] sm:$0xff]  ;;  %v1175_v0 = vmul.f32 %v2989_v20, %v375_v61  ;;  %v1176_v1 = vmul.f32 %v2975_v11, %v376_v62  ;;  %v378_v3 = vld [vmem:[%s2963_s25 + $0x640] sm:$0xff] }
  0xa9   : > { %1920 = vst [vmem:[%s3009_s20 + $0x570] sm:$0xff] %v1152_v13  ;;  %1921 = vst [vmem:[%s3009_s20 + $0x578] sm:$0xff] %v1153_v15  ;;  %v1177_v2 = vmul.f32 %v2977_v12, %v377_v63  ;;  %v379_v4 = vld [vmem:[%s2963_s25 + $0x648] sm:$0xff]  ;;  %v380_v5 = vld [vmem:[%s2963_s25 + $0x650] sm:$0xff]  ;;  %v1178_v6 = vmul.f32 %v2980_v14, %v378_v3 }
  0xaa   : > { %1922 = vst [vmem:[%s3009_s20 + $0x580] sm:$0xff] %v1154_v22  ;;  %1923 = vst [vmem:[%s3009_s20 + $0x588] sm:$0xff] %v1155_v23  ;;  %v1179_v7 = vmul.f32 %v2983_v16, %v379_v4  ;;  %v1180_v8 = vmul.f32 %v2986_v18, %v380_v5  ;;  %v381_v9 = vld [vmem:[%s2963_s25 + $0x658] sm:$0xff]  ;;  %v382_v10 = vld [vmem:[%s2963_s25 + $0x660] sm:$0xff] }
  0xab   : > { %1924 = vst [vmem:[%s3009_s20 + $0x590] sm:$0xff] %v1156_v24  ;;  %1925 = vst [vmem:[%s3009_s20 + $0x598] sm:$0xff] %v1157_v28  ;;  %v383_v13 = vld [vmem:[%s2963_s25 + $0x668] sm:$0xff]  ;;  %v1181_v15 = vmul.f32 %v2989_v20, %v381_v9  ;;  %v1182_v17 = vmul.f32 %v2975_v11, %v382_v10  ;;  %v384_v21 = vld [vmem:[%s2963_s25 + $0x670] sm:$0xff] }
  0xac   : > { %1926 = vst [vmem:[%s3009_s20 + $0x5a0] sm:$0xff] %v1158_v29  ;;  %1927 = vst [vmem:[%s3009_s20 + $0x5a8] sm:$0xff] %v1159_v30  ;;  %v1183_v19 = vmul.f32 %v2977_v12, %v383_v13  ;;  %v385_v22 = vld [vmem:[%s2963_s25 + $0x678] sm:$0xff]  ;;  %v386_v23 = vld [vmem:[%s2963_s25 + $0x680] sm:$0xff]  ;;  %v1184_v24 = vmul.f32 %v2980_v14, %v384_v21 }
  0xad   : > { %1928 = vst [vmem:[%s3009_s20 + $0x5b0] sm:$0xff] %v1160_v34  ;;  %1929 = vst [vmem:[%s3009_s20 + $0x5b8] sm:$0xff] %v1161_v35  ;;  %v1185_v25 = vmul.f32 %v2983_v16, %v385_v22  ;;  %v1186_v26 = vmul.f32 %v2986_v18, %v386_v23  ;;  %v387_v27 = vld [vmem:[%s2963_s25 + $0x688] sm:$0xff]  ;;  %v388_v28 = vld [vmem:[%s2963_s25 + $0x690] sm:$0xff] }
  0xae   : > { %1930 = vst [vmem:[%s3009_s20 + $0x5c0] sm:$0xff] %v1162_v36  ;;  %1931 = vst [vmem:[%s3009_s20 + $0x5c8] sm:$0xff] %v1163_v40  ;;  %v389_v29 = vld [vmem:[%s2963_s25 + $0x698] sm:$0xff]  ;;  %v1187_v30 = vmul.f32 %v2989_v20, %v387_v27  ;;  %v1188_v31 = vmul.f32 %v2975_v11, %v388_v28  ;;  %v390_v33 = vld [vmem:[%s2963_s25 + $0x6a0] sm:$0xff] }
  0xaf   : > { %1932 = vst [vmem:[%s3009_s20 + $0x5d0] sm:$0xff] %v1164_v41  ;;  %1933 = vst [vmem:[%s3009_s20 + $0x5d8] sm:$0xff] %v1165_v42  ;;  %v1189_v32 = vmul.f32 %v2977_v12, %v389_v29  ;;  %v391_v34 = vld [vmem:[%s2963_s25 + $0x6a8] sm:$0xff]  ;;  %v392_v35 = vld [vmem:[%s2963_s25 + $0x6b0] sm:$0xff]  ;;  %v1190_v36 = vmul.f32 %v2980_v14, %v390_v33 }
  0xb0   : > { %1934 = vst [vmem:[%s3009_s20 + $0x5e0] sm:$0xff] %v1166_v46  ;;  %1935 = vst [vmem:[%s3009_s20 + $0x5e8] sm:$0xff] %v1167_v47  ;;  %v1191_v37 = vmul.f32 %v2983_v16, %v391_v34  ;;  %v1192_v38 = vmul.f32 %v2986_v18, %v392_v35  ;;  %v393_v39 = vld [vmem:[%s2963_s25 + $0x6b8] sm:$0xff]  ;;  %v394_v40 = vld [vmem:[%s2963_s25 + $0x6c0] sm:$0xff] }
  0xb1   : > { %1936 = vst [vmem:[%s3009_s20 + $0x5f0] sm:$0xff] %v1168_v48  ;;  %1937 = vst [vmem:[%s3009_s20 + $0x5f8] sm:$0xff] %v1169_v52  ;;  %v395_v41 = vld [vmem:[%s2963_s25 + $0x6c8] sm:$0xff]  ;;  %v1193_v42 = vmul.f32 %v2989_v20, %v393_v39  ;;  %v1194_v43 = vmul.f32 %v2975_v11, %v394_v40  ;;  %v396_v45 = vld [vmem:[%s2963_s25 + $0x6d0] sm:$0xff] }
  0xb2   : > { %1938 = vst [vmem:[%s3009_s20 + $0x600] sm:$0xff] %v1170_v53  ;;  %1939 = vst [vmem:[%s3009_s20 + $0x608] sm:$0xff] %v1171_v54  ;;  %v1195_v44 = vmul.f32 %v2977_v12, %v395_v41  ;;  %v397_v46 = vld [vmem:[%s2963_s25 + $0x6d8] sm:$0xff]  ;;  %v398_v47 = vld [vmem:[%s2963_s25 + $0x6e0] sm:$0xff]  ;;  %v1196_v48 = vmul.f32 %v2980_v14, %v396_v45 }
  0xb3   : > { %1940 = vst [vmem:[%s3009_s20 + $0x610] sm:$0xff] %v1172_v58  ;;  %1941 = vst [vmem:[%s3009_s20 + $0x618] sm:$0xff] %v1173_v59  ;;  %v1197_v49 = vmul.f32 %v2983_v16, %v397_v46  ;;  %v1198_v50 = vmul.f32 %v2986_v18, %v398_v47  ;;  %v399_v51 = vld [vmem:[%s2963_s25 + $0x6e8] sm:$0xff]  ;;  %v400_v52 = vld [vmem:[%s2963_s25 + $0x6f0] sm:$0xff] }
  0xb4   : > { %1942 = vst [vmem:[%s3009_s20 + $0x620] sm:$0xff] %v1174_v60  ;;  %1943 = vst [vmem:[%s3009_s20 + $0x628] sm:$0xff] %v1175_v0  ;;  %v401_v53 = vld [vmem:[%s2963_s25 + $0x6f8] sm:$0xff]  ;;  %v1199_v54 = vmul.f32 %v2989_v20, %v399_v51  ;;  %v1200_v55 = vmul.f32 %v2975_v11, %v400_v52  ;;  %v402_v57 = vld [vmem:[%s2963_s25 + $0x700] sm:$0xff] }
  0xb5   : > { %1944 = vst [vmem:[%s3009_s20 + $0x630] sm:$0xff] %v1176_v1  ;;  %1945 = vst [vmem:[%s3009_s20 + $0x638] sm:$0xff] %v1177_v2  ;;  %v1201_v56 = vmul.f32 %v2977_v12, %v401_v53  ;;  %v403_v58 = vld [vmem:[%s2963_s25 + $0x708] sm:$0xff]  ;;  %v404_v59 = vld [vmem:[%s2963_s25 + $0x710] sm:$0xff]  ;;  %v1202_v60 = vmul.f32 %v2980_v14, %v402_v57 }
  0xb6   : > { %1946 = vst [vmem:[%s3009_s20 + $0x640] sm:$0xff] %v1178_v6  ;;  %1947 = vst [vmem:[%s3009_s20 + $0x648] sm:$0xff] %v1179_v7  ;;  %v1203_v61 = vmul.f32 %v2983_v16, %v403_v58  ;;  %v1204_v62 = vmul.f32 %v2986_v18, %v404_v59  ;;  %v405_v63 = vld [vmem:[%s2963_s25 + $0x718] sm:$0xff]  ;;  %v406_v0 = vld [vmem:[%s2963_s25 + $0x720] sm:$0xff] }
  0xb7   : > { %1948 = vst [vmem:[%s3009_s20 + $0x650] sm:$0xff] %v1180_v8  ;;  %1949 = vst [vmem:[%s3009_s20 + $0x658] sm:$0xff] %v1181_v15  ;;  %v407_v1 = vld [vmem:[%s2963_s25 + $0x728] sm:$0xff]  ;;  %v1205_v2 = vmul.f32 %v2989_v20, %v405_v63  ;;  %v1206_v3 = vmul.f32 %v2975_v11, %v406_v0  ;;  %v408_v5 = vld [vmem:[%s2963_s25 + $0x730] sm:$0xff] }
  0xb8   : > { %1950 = vst [vmem:[%s3009_s20 + $0x660] sm:$0xff] %v1182_v17  ;;  %1951 = vst [vmem:[%s3009_s20 + $0x668] sm:$0xff] %v1183_v19  ;;  %v1207_v4 = vmul.f32 %v2977_v12, %v407_v1  ;;  %v409_v6 = vld [vmem:[%s2963_s25 + $0x738] sm:$0xff]  ;;  %v410_v7 = vld [vmem:[%s2963_s25 + $0x740] sm:$0xff]  ;;  %v1208_v8 = vmul.f32 %v2980_v14, %v408_v5 }
  0xb9   : > { %1952 = vst [vmem:[%s3009_s20 + $0x670] sm:$0xff] %v1184_v24  ;;  %1953 = vst [vmem:[%s3009_s20 + $0x678] sm:$0xff] %v1185_v25  ;;  %v1209_v9 = vmul.f32 %v2983_v16, %v409_v6  ;;  %v1210_v10 = vmul.f32 %v2986_v18, %v410_v7  ;;  %v411_v13 = vld [vmem:[%s2963_s25 + $0x748] sm:$0xff]  ;;  %v412_v15 = vld [vmem:[%s2963_s25 + $0x750] sm:$0xff] }
  0xba   : > { %1954 = vst [vmem:[%s3009_s20 + $0x680] sm:$0xff] %v1186_v26  ;;  %1955 = vst [vmem:[%s3009_s20 + $0x688] sm:$0xff] %v1187_v30  ;;  %v413_v17 = vld [vmem:[%s2963_s25 + $0x758] sm:$0xff]  ;;  %v1211_v19 = vmul.f32 %v2989_v20, %v411_v13  ;;  %v1212_v21 = vmul.f32 %v2975_v11, %v412_v15  ;;  %v414_v23 = vld [vmem:[%s2963_s25 + $0x760] sm:$0xff] }
  0xbb   : > { %1956 = vst [vmem:[%s3009_s20 + $0x690] sm:$0xff] %v1188_v31  ;;  %1957 = vst [vmem:[%s3009_s20 + $0x698] sm:$0xff] %v1189_v32  ;;  %v1213_v22 = vmul.f32 %v2977_v12, %v413_v17  ;;  %v415_v24 = vld [vmem:[%s2963_s25 + $0x768] sm:$0xff]  ;;  %v416_v25 = vld [vmem:[%s2963_s25 + $0x770] sm:$0xff]  ;;  %v1214_v26 = vmul.f32 %v2980_v14, %v414_v23 }
  0xbc   : > { %1958 = vst [vmem:[%s3009_s20 + $0x6a0] sm:$0xff] %v1190_v36  ;;  %1959 = vst [vmem:[%s3009_s20 + $0x6a8] sm:$0xff] %v1191_v37  ;;  %v1215_v27 = vmul.f32 %v2983_v16, %v415_v24  ;;  %v1216_v28 = vmul.f32 %v2986_v18, %v416_v25  ;;  %v417_v29 = vld [vmem:[%s2963_s25 + $0x778] sm:$0xff]  ;;  %v418_v30 = vld [vmem:[%s2963_s25 + $0x780] sm:$0xff] }
  0xbd   : > { %1960 = vst [vmem:[%s3009_s20 + $0x6b0] sm:$0xff] %v1192_v38  ;;  %1961 = vst [vmem:[%s3009_s20 + $0x6b8] sm:$0xff] %v1193_v42  ;;  %v419_v31 = vld [vmem:[%s2963_s25 + $0x788] sm:$0xff]  ;;  %v1217_v32 = vmul.f32 %v2989_v20, %v417_v29  ;;  %v1218_v33 = vmul.f32 %v2975_v11, %v418_v30  ;;  %v420_v35 = vld [vmem:[%s2963_s25 + $0x790] sm:$0xff] }
  0xbe   : > { %1962 = vst [vmem:[%s3009_s20 + $0x6c0] sm:$0xff] %v1194_v43  ;;  %1963 = vst [vmem:[%s3009_s20 + $0x6c8] sm:$0xff] %v1195_v44  ;;  %v1219_v34 = vmul.f32 %v2977_v12, %v419_v31  ;;  %v421_v36 = vld [vmem:[%s2963_s25 + $0x798] sm:$0xff]  ;;  %v422_v37 = vld [vmem:[%s2963_s25 + $0x7a0] sm:$0xff]  ;;  %v1220_v38 = vmul.f32 %v2980_v14, %v420_v35 }
  0xbf   : > { %1964 = vst [vmem:[%s3009_s20 + $0x6d0] sm:$0xff] %v1196_v48  ;;  %1965 = vst [vmem:[%s3009_s20 + $0x6d8] sm:$0xff] %v1197_v49  ;;  %v1221_v39 = vmul.f32 %v2983_v16, %v421_v36  ;;  %v1222_v40 = vmul.f32 %v2986_v18, %v422_v37  ;;  %v423_v41 = vld [vmem:[%s2963_s25 + $0x7a8] sm:$0xff]  ;;  %v424_v42 = vld [vmem:[%s2963_s25 + $0x7b0] sm:$0xff] }
  0xc0   : > { %1966 = vst [vmem:[%s3009_s20 + $0x6e0] sm:$0xff] %v1198_v50  ;;  %1967 = vst [vmem:[%s3009_s20 + $0x6e8] sm:$0xff] %v1199_v54  ;;  %v425_v43 = vld [vmem:[%s2963_s25 + $0x7b8] sm:$0xff]  ;;  %v1223_v44 = vmul.f32 %v2989_v20, %v423_v41  ;;  %v1224_v45 = vmul.f32 %v2975_v11, %v424_v42  ;;  %v426_v47 = vld [vmem:[%s2963_s25 + $0x7c0] sm:$0xff] }
  0xc1   : > { %1968 = vst [vmem:[%s3009_s20 + $0x6f0] sm:$0xff] %v1200_v55  ;;  %1969 = vst [vmem:[%s3009_s20 + $0x6f8] sm:$0xff] %v1201_v56  ;;  %v1225_v46 = vmul.f32 %v2977_v12, %v425_v43  ;;  %v427_v48 = vld [vmem:[%s2963_s25 + $0x7c8] sm:$0xff]  ;;  %v428_v49 = vld [vmem:[%s2963_s25 + $0x7d0] sm:$0xff]  ;;  %v1226_v50 = vmul.f32 %v2980_v14, %v426_v47 }
  0xc2   : > { %1970 = vst [vmem:[%s3009_s20 + $0x700] sm:$0xff] %v1202_v60  ;;  %1971 = vst [vmem:[%s3009_s20 + $0x708] sm:$0xff] %v1203_v61  ;;  %v1227_v51 = vmul.f32 %v2983_v16, %v427_v48  ;;  %v1228_v52 = vmul.f32 %v2986_v18, %v428_v49  ;;  %v429_v53 = vld [vmem:[%s2963_s25 + $0x7d8] sm:$0xff]  ;;  %v430_v54 = vld [vmem:[%s2963_s25 + $0x7e0] sm:$0xff] }
  0xc3   : > { %1972 = vst [vmem:[%s3009_s20 + $0x710] sm:$0xff] %v1204_v62  ;;  %1973 = vst [vmem:[%s3009_s20 + $0x718] sm:$0xff] %v1205_v2  ;;  %v431_v55 = vld [vmem:[%s2963_s25 + $0x7e8] sm:$0xff]  ;;  %v1229_v56 = vmul.f32 %v2989_v20, %v429_v53  ;;  %v1230_v57 = vmul.f32 %v2975_v11, %v430_v54  ;;  %v432_v59 = vld [vmem:[%s2963_s25 + $0x7f0] sm:$0xff] }
  0xc4   : > { %1974 = vst [vmem:[%s3009_s20 + $0x720] sm:$0xff] %v1206_v3  ;;  %1975 = vst [vmem:[%s3009_s20 + $0x728] sm:$0xff] %v1207_v4  ;;  %v1231_v58 = vmul.f32 %v2977_v12, %v431_v55  ;;  %v433_v60 = vld [vmem:[%s2963_s25 + $0x7f8] sm:$0xff]  ;;  %v434_v61 = vld [vmem:[%s2963_s25 + $0x800] sm:$0xff]  ;;  %v1232_v62 = vmul.f32 %v2980_v14, %v432_v59 }
  0xc5   : > { %1976 = vst [vmem:[%s3009_s20 + $0x730] sm:$0xff] %v1208_v8  ;;  %1977 = vst [vmem:[%s3009_s20 + $0x738] sm:$0xff] %v1209_v9  ;;  %v1233_v63 = vmul.f32 %v2983_v16, %v433_v60  ;;  %v1234_v0 = vmul.f32 %v2986_v18, %v434_v61  ;;  %v435_v1 = vld [vmem:[%s2963_s25 + $0x808] sm:$0xff]  ;;  %v436_v2 = vld [vmem:[%s2963_s25 + $0x810] sm:$0xff] }
  0xc6   : > { %1978 = vst [vmem:[%s3009_s20 + $0x740] sm:$0xff] %v1210_v10  ;;  %1979 = vst [vmem:[%s3009_s20 + $0x748] sm:$0xff] %v1211_v19  ;;  %v437_v3 = vld [vmem:[%s2963_s25 + $0x818] sm:$0xff]  ;;  %v1235_v4 = vmul.f32 %v2989_v20, %v435_v1  ;;  %v1236_v5 = vmul.f32 %v2975_v11, %v436_v2  ;;  %v438_v7 = vld [vmem:[%s2963_s25 + $0x820] sm:$0xff] }
  0xc7   : > { %1980 = vst [vmem:[%s3009_s20 + $0x750] sm:$0xff] %v1212_v21  ;;  %1981 = vst [vmem:[%s3009_s20 + $0x758] sm:$0xff] %v1213_v22  ;;  %v1237_v6 = vmul.f32 %v2977_v12, %v437_v3  ;;  %v439_v8 = vld [vmem:[%s2963_s25 + $0x828] sm:$0xff]  ;;  %v440_v9 = vld [vmem:[%s2963_s25 + $0x830] sm:$0xff]  ;;  %v1238_v10 = vmul.f32 %v2980_v14, %v438_v7 }
  0xc8   : > { %1982 = vst [vmem:[%s3009_s20 + $0x760] sm:$0xff] %v1214_v26  ;;  %1983 = vst [vmem:[%s3009_s20 + $0x768] sm:$0xff] %v1215_v27  ;;  %v1239_v13 = vmul.f32 %v2983_v16, %v439_v8  ;;  %v1240_v15 = vmul.f32 %v2986_v18, %v440_v9  ;;  %v441_v17 = vld [vmem:[%s2963_s25 + $0x838] sm:$0xff]  ;;  %v442_v19 = vld [vmem:[%s2963_s25 + $0x840] sm:$0xff] }
  0xc9   : > { %1984 = vst [vmem:[%s3009_s20 + $0x770] sm:$0xff] %v1216_v28  ;;  %1985 = vst [vmem:[%s3009_s20 + $0x778] sm:$0xff] %v1217_v32  ;;  %v443_v21 = vld [vmem:[%s2963_s25 + $0x848] sm:$0xff]  ;;  %v1241_v22 = vmul.f32 %v2989_v20, %v441_v17  ;;  %v1242_v23 = vmul.f32 %v2975_v11, %v442_v19  ;;  %v444_v25 = vld [vmem:[%s2963_s25 + $0x850] sm:$0xff] }
  0xca   : > { %1986 = vst [vmem:[%s3009_s20 + $0x780] sm:$0xff] %v1218_v33  ;;  %1987 = vst [vmem:[%s3009_s20 + $0x788] sm:$0xff] %v1219_v34  ;;  %v1243_v24 = vmul.f32 %v2977_v12, %v443_v21  ;;  %v445_v26 = vld [vmem:[%s2963_s25 + $0x858] sm:$0xff]  ;;  %v446_v27 = vld [vmem:[%s2963_s25 + $0x860] sm:$0xff]  ;;  %v1244_v28 = vmul.f32 %v2980_v14, %v444_v25 }
  0xcb   : > { %1988 = vst [vmem:[%s3009_s20 + $0x790] sm:$0xff] %v1220_v38  ;;  %1989 = vst [vmem:[%s3009_s20 + $0x798] sm:$0xff] %v1221_v39  ;;  %v1245_v29 = vmul.f32 %v2983_v16, %v445_v26  ;;  %v1246_v30 = vmul.f32 %v2986_v18, %v446_v27  ;;  %v447_v31 = vld [vmem:[%s2963_s25 + $0x868] sm:$0xff]  ;;  %v448_v32 = vld [vmem:[%s2963_s25 + $0x870] sm:$0xff] }
  0xcc   : > { %1990 = vst [vmem:[%s3009_s20 + $0x7a0] sm:$0xff] %v1222_v40  ;;  %1991 = vst [vmem:[%s3009_s20 + $0x7a8] sm:$0xff] %v1223_v44  ;;  %v449_v33 = vld [vmem:[%s2963_s25 + $0x878] sm:$0xff]  ;;  %v1247_v34 = vmul.f32 %v2989_v20, %v447_v31  ;;  %v1248_v35 = vmul.f32 %v2975_v11, %v448_v32  ;;  %v450_v37 = vld [vmem:[%s2963_s25 + $0x880] sm:$0xff] }
  0xcd   : > { %1992 = vst [vmem:[%s3009_s20 + $0x7b0] sm:$0xff] %v1224_v45  ;;  %1993 = vst [vmem:[%s3009_s20 + $0x7b8] sm:$0xff] %v1225_v46  ;;  %v1249_v36 = vmul.f32 %v2977_v12, %v449_v33  ;;  %v451_v38 = vld [vmem:[%s2963_s25 + $0x888] sm:$0xff]  ;;  %v452_v39 = vld [vmem:[%s2963_s25 + $0x890] sm:$0xff]  ;;  %v1250_v40 = vmul.f32 %v2980_v14, %v450_v37 }
  0xce   : > { %1994 = vst [vmem:[%s3009_s20 + $0x7c0] sm:$0xff] %v1226_v50  ;;  %1995 = vst [vmem:[%s3009_s20 + $0x7c8] sm:$0xff] %v1227_v51  ;;  %v1251_v41 = vmul.f32 %v2983_v16, %v451_v38  ;;  %v1252_v42 = vmul.f32 %v2986_v18, %v452_v39  ;;  %v453_v43 = vld [vmem:[%s2963_s25 + $0x898] sm:$0xff]  ;;  %v454_v44 = vld [vmem:[%s2963_s25 + $0x8a0] sm:$0xff] }
  0xcf   : > { %1996 = vst [vmem:[%s3009_s20 + $0x7d0] sm:$0xff] %v1228_v52  ;;  %1997 = vst [vmem:[%s3009_s20 + $0x7d8] sm:$0xff] %v1229_v56  ;;  %v455_v45 = vld [vmem:[%s2963_s25 + $0x8a8] sm:$0xff]  ;;  %v1253_v46 = vmul.f32 %v2989_v20, %v453_v43  ;;  %v1254_v47 = vmul.f32 %v2975_v11, %v454_v44  ;;  %v456_v49 = vld [vmem:[%s2963_s25 + $0x8b0] sm:$0xff] }
  0xd0   : > { %1998 = vst [vmem:[%s3009_s20 + $0x7e0] sm:$0xff] %v1230_v57  ;;  %1999 = vst [vmem:[%s3009_s20 + $0x7e8] sm:$0xff] %v1231_v58  ;;  %v1255_v48 = vmul.f32 %v2977_v12, %v455_v45  ;;  %v457_v50 = vld [vmem:[%s2963_s25 + $0x8b8] sm:$0xff]  ;;  %v458_v51 = vld [vmem:[%s2963_s25 + $0x8c0] sm:$0xff]  ;;  %v1256_v52 = vmul.f32 %v2980_v14, %v456_v49 }
  0xd1   : > { %2000 = vst [vmem:[%s3009_s20 + $0x7f0] sm:$0xff] %v1232_v62  ;;  %2001 = vst [vmem:[%s3009_s20 + $0x7f8] sm:$0xff] %v1233_v63  ;;  %v1257_v53 = vmul.f32 %v2983_v16, %v457_v50  ;;  %v1258_v54 = vmul.f32 %v2986_v18, %v458_v51  ;;  %v459_v55 = vld [vmem:[%s2963_s25 + $0x8c8] sm:$0xff]  ;;  %v460_v56 = vld [vmem:[%s2963_s25 + $0x8d0] sm:$0xff] }
  0xd2   : > { %2002 = vst [vmem:[%s3009_s20 + $0x800] sm:$0xff] %v1234_v0  ;;  %2003 = vst [vmem:[%s3009_s20 + $0x808] sm:$0xff] %v1235_v4  ;;  %v461_v57 = vld [vmem:[%s2963_s25 + $0x8d8] sm:$0xff]  ;;  %v1259_v58 = vmul.f32 %v2989_v20, %v459_v55  ;;  %v1260_v59 = vmul.f32 %v2975_v11, %v460_v56  ;;  %v462_v61 = vld [vmem:[%s2963_s25 + $0x8e0] sm:$0xff] }
  0xd3   : > { %2004 = vst [vmem:[%s3009_s20 + $0x810] sm:$0xff] %v1236_v5  ;;  %2005 = vst [vmem:[%s3009_s20 + $0x818] sm:$0xff] %v1237_v6  ;;  %v1261_v60 = vmul.f32 %v2977_v12, %v461_v57  ;;  %v463_v62 = vld [vmem:[%s2963_s25 + $0x8e8] sm:$0xff]  ;;  %v464_v63 = vld [vmem:[%s2963_s25 + $0x8f0] sm:$0xff]  ;;  %v1262_v0 = vmul.f32 %v2980_v14, %v462_v61 }
  0xd4   : > { %2006 = vst [vmem:[%s3009_s20 + $0x820] sm:$0xff] %v1238_v10  ;;  %2007 = vst [vmem:[%s3009_s20 + $0x828] sm:$0xff] %v1239_v13  ;;  %v1263_v1 = vmul.f32 %v2983_v16, %v463_v62  ;;  %v1264_v2 = vmul.f32 %v2986_v18, %v464_v63  ;;  %v465_v3 = vld [vmem:[%s2963_s25 + $0x8f8] sm:$0xff]  ;;  %v466_v4 = vld [vmem:[%s2963_s25 + $0x900] sm:$0xff] }
  0xd5   : > { %2008 = vst [vmem:[%s3009_s20 + $0x830] sm:$0xff] %v1240_v15  ;;  %2009 = vst [vmem:[%s3009_s20 + $0x838] sm:$0xff] %v1241_v22  ;;  %v467_v5 = vld [vmem:[%s2963_s25 + $0x908] sm:$0xff]  ;;  %v1265_v6 = vmul.f32 %v2989_v20, %v465_v3  ;;  %v1266_v7 = vmul.f32 %v2975_v11, %v466_v4  ;;  %v468_v9 = vld [vmem:[%s2963_s25 + $0x910] sm:$0xff] }
  0xd6   : > { %2010 = vst [vmem:[%s3009_s20 + $0x840] sm:$0xff] %v1242_v23  ;;  %2011 = vst [vmem:[%s3009_s20 + $0x848] sm:$0xff] %v1243_v24  ;;  %v1267_v8 = vmul.f32 %v2977_v12, %v467_v5  ;;  %v469_v10 = vld [vmem:[%s2963_s25 + $0x918] sm:$0xff]  ;;  %v470_v13 = vld [vmem:[%s2963_s25 + $0x920] sm:$0xff]  ;;  %v1268_v15 = vmul.f32 %v2980_v14, %v468_v9 }
  0xd7   : > { %2012 = vst [vmem:[%s3009_s20 + $0x850] sm:$0xff] %v1244_v28  ;;  %2013 = vst [vmem:[%s3009_s20 + $0x858] sm:$0xff] %v1245_v29  ;;  %v1269_v17 = vmul.f32 %v2983_v16, %v469_v10  ;;  %v1270_v19 = vmul.f32 %v2986_v18, %v470_v13  ;;  %v471_v21 = vld [vmem:[%s2963_s25 + $0x928] sm:$0xff]  ;;  %v472_v22 = vld [vmem:[%s2963_s25 + $0x930] sm:$0xff] }
  0xd8   : > { %2014 = vst [vmem:[%s3009_s20 + $0x860] sm:$0xff] %v1246_v30  ;;  %2015 = vst [vmem:[%s3009_s20 + $0x868] sm:$0xff] %v1247_v34  ;;  %v473_v23 = vld [vmem:[%s2963_s25 + $0x938] sm:$0xff]  ;;  %v1271_v24 = vmul.f32 %v2989_v20, %v471_v21  ;;  %v1272_v25 = vmul.f32 %v2975_v11, %v472_v22  ;;  %v474_v27 = vld [vmem:[%s2963_s25 + $0x940] sm:$0xff] }
  0xd9   : > { %2016 = vst [vmem:[%s3009_s20 + $0x870] sm:$0xff] %v1248_v35  ;;  %2017 = vst [vmem:[%s3009_s20 + $0x878] sm:$0xff] %v1249_v36  ;;  %v1273_v26 = vmul.f32 %v2977_v12, %v473_v23  ;;  %v475_v28 = vld [vmem:[%s2963_s25 + $0x948] sm:$0xff]  ;;  %v476_v29 = vld [vmem:[%s2963_s25 + $0x950] sm:$0xff]  ;;  %v1274_v30 = vmul.f32 %v2980_v14, %v474_v27 }
  0xda   : > { %2018 = vst [vmem:[%s3009_s20 + $0x880] sm:$0xff] %v1250_v40  ;;  %2019 = vst [vmem:[%s3009_s20 + $0x888] sm:$0xff] %v1251_v41  ;;  %v1275_v31 = vmul.f32 %v2983_v16, %v475_v28  ;;  %v1276_v32 = vmul.f32 %v2986_v18, %v476_v29  ;;  %v477_v33 = vld [vmem:[%s2963_s25 + $0x958] sm:$0xff]  ;;  %v478_v34 = vld [vmem:[%s2963_s25 + $0x960] sm:$0xff] }
  0xdb   : > { %2020 = vst [vmem:[%s3009_s20 + $0x890] sm:$0xff] %v1252_v42  ;;  %2021 = vst [vmem:[%s3009_s20 + $0x898] sm:$0xff] %v1253_v46  ;;  %v479_v35 = vld [vmem:[%s2963_s25 + $0x968] sm:$0xff]  ;;  %v1277_v36 = vmul.f32 %v2989_v20, %v477_v33  ;;  %v1278_v37 = vmul.f32 %v2975_v11, %v478_v34  ;;  %v480_v39 = vld [vmem:[%s2963_s25 + $0x970] sm:$0xff] }
  0xdc   : > { %2022 = vst [vmem:[%s3009_s20 + $0x8a0] sm:$0xff] %v1254_v47  ;;  %2023 = vst [vmem:[%s3009_s20 + $0x8a8] sm:$0xff] %v1255_v48  ;;  %v1279_v38 = vmul.f32 %v2977_v12, %v479_v35  ;;  %v481_v40 = vld [vmem:[%s2963_s25 + $0x978] sm:$0xff]  ;;  %v482_v41 = vld [vmem:[%s2963_s25 + $0x980] sm:$0xff]  ;;  %v1280_v42 = vmul.f32 %v2980_v14, %v480_v39 }
  0xdd   : > { %2024 = vst [vmem:[%s3009_s20 + $0x8b0] sm:$0xff] %v1256_v52  ;;  %2025 = vst [vmem:[%s3009_s20 + $0x8b8] sm:$0xff] %v1257_v53  ;;  %v1281_v43 = vmul.f32 %v2983_v16, %v481_v40  ;;  %v1282_v44 = vmul.f32 %v2986_v18, %v482_v41  ;;  %v483_v45 = vld [vmem:[%s2963_s25 + $0x988] sm:$0xff]  ;;  %v484_v46 = vld [vmem:[%s2963_s25 + $0x990] sm:$0xff] }
  0xde   : > { %2026 = vst [vmem:[%s3009_s20 + $0x8c0] sm:$0xff] %v1258_v54  ;;  %2027 = vst [vmem:[%s3009_s20 + $0x8c8] sm:$0xff] %v1259_v58  ;;  %v485_v47 = vld [vmem:[%s2963_s25 + $0x998] sm:$0xff]  ;;  %v1283_v48 = vmul.f32 %v2989_v20, %v483_v45  ;;  %v1284_v49 = vmul.f32 %v2975_v11, %v484_v46  ;;  %v486_v51 = vld [vmem:[%s2963_s25 + $0x9a0] sm:$0xff] }
  0xdf   : > { %2028 = vst [vmem:[%s3009_s20 + $0x8d0] sm:$0xff] %v1260_v59  ;;  %2029 = vst [vmem:[%s3009_s20 + $0x8d8] sm:$0xff] %v1261_v60  ;;  %v1285_v50 = vmul.f32 %v2977_v12, %v485_v47  ;;  %v487_v52 = vld [vmem:[%s2963_s25 + $0x9a8] sm:$0xff]  ;;  %v488_v53 = vld [vmem:[%s2963_s25 + $0x9b0] sm:$0xff]  ;;  %v1286_v54 = vmul.f32 %v2980_v14, %v486_v51 }
  0xe0   : > { %2030 = vst [vmem:[%s3009_s20 + $0x8e0] sm:$0xff] %v1262_v0  ;;  %2031 = vst [vmem:[%s3009_s20 + $0x8e8] sm:$0xff] %v1263_v1  ;;  %v1287_v55 = vmul.f32 %v2983_v16, %v487_v52  ;;  %v1288_v56 = vmul.f32 %v2986_v18, %v488_v53  ;;  %v489_v57 = vld [vmem:[%s2963_s25 + $0x9b8] sm:$0xff]  ;;  %v490_v58 = vld [vmem:[%s2963_s25 + $0x9c0] sm:$0xff] }
  0xe1   : > { %2032 = vst [vmem:[%s3009_s20 + $0x8f0] sm:$0xff] %v1264_v2  ;;  %2033 = vst [vmem:[%s3009_s20 + $0x8f8] sm:$0xff] %v1265_v6  ;;  %v491_v59 = vld [vmem:[%s2963_s25 + $0x9c8] sm:$0xff]  ;;  %v1289_v60 = vmul.f32 %v2989_v20, %v489_v57  ;;  %v1290_v61 = vmul.f32 %v2975_v11, %v490_v58  ;;  %v492_v63 = vld [vmem:[%s2963_s25 + $0x9d0] sm:$0xff] }
  0xe2   : > { %2034 = vst [vmem:[%s3009_s20 + $0x900] sm:$0xff] %v1266_v7  ;;  %2035 = vst [vmem:[%s3009_s20 + $0x908] sm:$0xff] %v1267_v8  ;;  %v1291_v62 = vmul.f32 %v2977_v12, %v491_v59  ;;  %v493_v0 = vld [vmem:[%s2963_s25 + $0x9d8] sm:$0xff]  ;;  %v494_v1 = vld [vmem:[%s2963_s25 + $0x9e0] sm:$0xff]  ;;  %v1292_v2 = vmul.f32 %v2980_v14, %v492_v63 }
  0xe3   : > { %2036 = vst [vmem:[%s3009_s20 + $0x910] sm:$0xff] %v1268_v15  ;;  %2037 = vst [vmem:[%s3009_s20 + $0x918] sm:$0xff] %v1269_v17  ;;  %v1293_v3 = vmul.f32 %v2983_v16, %v493_v0  ;;  %v1294_v4 = vmul.f32 %v2986_v18, %v494_v1  ;;  %v495_v5 = vld [vmem:[%s2963_s25 + $0x9e8] sm:$0xff]  ;;  %v496_v6 = vld [vmem:[%s2963_s25 + $0x9f0] sm:$0xff] }
  0xe4   : > { %2038 = vst [vmem:[%s3009_s20 + $0x920] sm:$0xff] %v1270_v19  ;;  %2039 = vst [vmem:[%s3009_s20 + $0x928] sm:$0xff] %v1271_v24  ;;  %v497_v7 = vld [vmem:[%s2963_s25 + $0x9f8] sm:$0xff]  ;;  %v1295_v8 = vmul.f32 %v2989_v20, %v495_v5  ;;  %v1296_v9 = vmul.f32 %v2975_v11, %v496_v6  ;;  %v498_v13 = vld [vmem:[%s2963_s25 + $0xa00] sm:$0xff] }
  0xe5   : > { %2040 = vst [vmem:[%s3009_s20 + $0x930] sm:$0xff] %v1272_v25  ;;  %2041 = vst [vmem:[%s3009_s20 + $0x938] sm:$0xff] %v1273_v26  ;;  %v1297_v10 = vmul.f32 %v2977_v12, %v497_v7  ;;  %v499_v15 = vld [vmem:[%s2963_s25 + $0xa08] sm:$0xff]  ;;  %v500_v17 = vld [vmem:[%s2963_s25 + $0xa10] sm:$0xff]  ;;  %v1298_v19 = vmul.f32 %v2980_v14, %v498_v13 }
  0xe6   : > { %2042 = vst [vmem:[%s3009_s20 + $0x940] sm:$0xff] %v1274_v30  ;;  %2043 = vst [vmem:[%s3009_s20 + $0x948] sm:$0xff] %v1275_v31  ;;  %v1299_v21 = vmul.f32 %v2983_v16, %v499_v15  ;;  %v1300_v22 = vmul.f32 %v2986_v18, %v500_v17  ;;  %v501_v23 = vld [vmem:[%s2963_s25 + $0xa18] sm:$0xff]  ;;  %v502_v24 = vld [vmem:[%s2963_s25 + $0xa20] sm:$0xff] }
  0xe7   : > { %2044 = vst [vmem:[%s3009_s20 + $0x950] sm:$0xff] %v1276_v32  ;;  %2045 = vst [vmem:[%s3009_s20 + $0x958] sm:$0xff] %v1277_v36  ;;  %v503_v25 = vld [vmem:[%s2963_s25 + $0xa28] sm:$0xff]  ;;  %v1301_v26 = vmul.f32 %v2989_v20, %v501_v23  ;;  %v1302_v27 = vmul.f32 %v2975_v11, %v502_v24  ;;  %v504_v29 = vld [vmem:[%s2963_s25 + $0xa30] sm:$0xff] }
  0xe8   : > { %2046 = vst [vmem:[%s3009_s20 + $0x960] sm:$0xff] %v1278_v37  ;;  %2047 = vst [vmem:[%s3009_s20 + $0x968] sm:$0xff] %v1279_v38  ;;  %v1303_v28 = vmul.f32 %v2977_v12, %v503_v25  ;;  %v505_v30 = vld [vmem:[%s2963_s25 + $0xa38] sm:$0xff]  ;;  %v506_v31 = vld [vmem:[%s2963_s25 + $0xa40] sm:$0xff]  ;;  %v1304_v32 = vmul.f32 %v2980_v14, %v504_v29 }
  0xe9   : > { %2048 = vst [vmem:[%s3009_s20 + $0x970] sm:$0xff] %v1280_v42  ;;  %2049 = vst [vmem:[%s3009_s20 + $0x978] sm:$0xff] %v1281_v43  ;;  %v1305_v33 = vmul.f32 %v2983_v16, %v505_v30  ;;  %v1306_v34 = vmul.f32 %v2986_v18, %v506_v31  ;;  %v507_v35 = vld [vmem:[%s2963_s25 + $0xa48] sm:$0xff]  ;;  %v508_v36 = vld [vmem:[%s2963_s25 + $0xa50] sm:$0xff] }
  0xea   : > { %2050 = vst [vmem:[%s3009_s20 + $0x980] sm:$0xff] %v1282_v44  ;;  %2051 = vst [vmem:[%s3009_s20 + $0x988] sm:$0xff] %v1283_v48  ;;  %v509_v37 = vld [vmem:[%s2963_s25 + $0xa58] sm:$0xff]  ;;  %v1307_v38 = vmul.f32 %v2989_v20, %v507_v35  ;;  %v1308_v39 = vmul.f32 %v2975_v11, %v508_v36  ;;  %v510_v41 = vld [vmem:[%s2963_s25 + $0xa60] sm:$0xff] }
  0xeb   : > { %2052 = vst [vmem:[%s3009_s20 + $0x990] sm:$0xff] %v1284_v49  ;;  %2053 = vst [vmem:[%s3009_s20 + $0x998] sm:$0xff] %v1285_v50  ;;  %v1309_v40 = vmul.f32 %v2977_v12, %v509_v37  ;;  %v511_v42 = vld [vmem:[%s2963_s25 + $0xa68] sm:$0xff]  ;;  %v512_v43 = vld [vmem:[%s2963_s25 + $0xa70] sm:$0xff]  ;;  %v1310_v44 = vmul.f32 %v2980_v14, %v510_v41 }
  0xec   : > { %2054 = vst [vmem:[%s3009_s20 + $0x9a0] sm:$0xff] %v1286_v54  ;;  %2055 = vst [vmem:[%s3009_s20 + $0x9a8] sm:$0xff] %v1287_v55  ;;  %v1311_v45 = vmul.f32 %v2983_v16, %v511_v42  ;;  %v1312_v46 = vmul.f32 %v2986_v18, %v512_v43  ;;  %v513_v47 = vld [vmem:[%s2963_s25 + $0xa78] sm:$0xff]  ;;  %v514_v48 = vld [vmem:[%s2963_s25 + $0xa80] sm:$0xff] }
  0xed   : > { %2056 = vst [vmem:[%s3009_s20 + $0x9b0] sm:$0xff] %v1288_v56  ;;  %2057 = vst [vmem:[%s3009_s20 + $0x9b8] sm:$0xff] %v1289_v60  ;;  %v515_v49 = vld [vmem:[%s2963_s25 + $0xa88] sm:$0xff]  ;;  %v1313_v50 = vmul.f32 %v2989_v20, %v513_v47  ;;  %v1314_v51 = vmul.f32 %v2975_v11, %v514_v48  ;;  %v516_v53 = vld [vmem:[%s2963_s25 + $0xa90] sm:$0xff] }
  0xee   : > { %2058 = vst [vmem:[%s3009_s20 + $0x9c0] sm:$0xff] %v1290_v61  ;;  %2059 = vst [vmem:[%s3009_s20 + $0x9c8] sm:$0xff] %v1291_v62  ;;  %v1315_v52 = vmul.f32 %v2977_v12, %v515_v49  ;;  %v517_v54 = vld [vmem:[%s2963_s25 + $0xa98] sm:$0xff]  ;;  %v518_v55 = vld [vmem:[%s2963_s25 + $0xaa0] sm:$0xff]  ;;  %v1316_v56 = vmul.f32 %v2980_v14, %v516_v53 }
  0xef   : > { %2060 = vst [vmem:[%s3009_s20 + $0x9d0] sm:$0xff] %v1292_v2  ;;  %2061 = vst [vmem:[%s3009_s20 + $0x9d8] sm:$0xff] %v1293_v3  ;;  %v1317_v57 = vmul.f32 %v2983_v16, %v517_v54  ;;  %v1318_v58 = vmul.f32 %v2986_v18, %v518_v55  ;;  %v519_v59 = vld [vmem:[%s2963_s25 + $0xaa8] sm:$0xff]  ;;  %v520_v60 = vld [vmem:[%s2963_s25 + $0xab0] sm:$0xff] }
  0xf0   : > { %2062 = vst [vmem:[%s3009_s20 + $0x9e0] sm:$0xff] %v1294_v4  ;;  %2063 = vst [vmem:[%s3009_s20 + $0x9e8] sm:$0xff] %v1295_v8  ;;  %v521_v61 = vld [vmem:[%s2963_s25 + $0xab8] sm:$0xff]  ;;  %v1319_v62 = vmul.f32 %v2989_v20, %v519_v59  ;;  %v1320_v63 = vmul.f32 %v2975_v11, %v520_v60  ;;  %v522_v1 = vld [vmem:[%s2963_s25 + $0xac0] sm:$0xff] }
  0xf1   : > { %2064 = vst [vmem:[%s3009_s20 + $0x9f0] sm:$0xff] %v1296_v9  ;;  %2065 = vst [vmem:[%s3009_s20 + $0x9f8] sm:$0xff] %v1297_v10  ;;  %v1321_v0 = vmul.f32 %v2977_v12, %v521_v61  ;;  %v523_v2 = vld [vmem:[%s2963_s25 + $0xac8] sm:$0xff]  ;;  %v524_v3 = vld [vmem:[%s2963_s25 + $0xad0] sm:$0xff]  ;;  %v1322_v4 = vmul.f32 %v2980_v14, %v522_v1 }
  0xf2   : > { %2066 = vst [vmem:[%s3009_s20 + $0xa00] sm:$0xff] %v1298_v19  ;;  %2067 = vst [vmem:[%s3009_s20 + $0xa08] sm:$0xff] %v1299_v21  ;;  %v1323_v5 = vmul.f32 %v2983_v16, %v523_v2  ;;  %v1324_v6 = vmul.f32 %v2986_v18, %v524_v3  ;;  %v525_v7 = vld [vmem:[%s2963_s25 + $0xad8] sm:$0xff]  ;;  %v526_v8 = vld [vmem:[%s2963_s25 + $0xae0] sm:$0xff] }
  0xf3   : > { %2068 = vst [vmem:[%s3009_s20 + $0xa10] sm:$0xff] %v1300_v22  ;;  %2069 = vst [vmem:[%s3009_s20 + $0xa18] sm:$0xff] %v1301_v26  ;;  %v527_v9 = vld [vmem:[%s2963_s25 + $0xae8] sm:$0xff]  ;;  %v1325_v10 = vmul.f32 %v2989_v20, %v525_v7  ;;  %v1326_v13 = vmul.f32 %v2975_v11, %v526_v8  ;;  %v528_v17 = vld [vmem:[%s2963_s25 + $0xaf0] sm:$0xff] }
  0xf4   : > { %2070 = vst [vmem:[%s3009_s20 + $0xa20] sm:$0xff] %v1302_v27  ;;  %2071 = vst [vmem:[%s3009_s20 + $0xa28] sm:$0xff] %v1303_v28  ;;  %v1327_v15 = vmul.f32 %v2977_v12, %v527_v9  ;;  %v529_v19 = vld [vmem:[%s2963_s25 + $0xaf8] sm:$0xff]  ;;  %v530_v21 = vld [vmem:[%s2963_s25 + $0xb00] sm:$0xff]  ;;  %v1328_v22 = vmul.f32 %v2980_v14, %v528_v17 }
  0xf5   : > { %2072 = vst [vmem:[%s3009_s20 + $0xa30] sm:$0xff] %v1304_v32  ;;  %2073 = vst [vmem:[%s3009_s20 + $0xa38] sm:$0xff] %v1305_v33  ;;  %v1329_v23 = vmul.f32 %v2983_v16, %v529_v19  ;;  %v1330_v24 = vmul.f32 %v2986_v18, %v530_v21  ;;  %v531_v25 = vld [vmem:[%s2963_s25 + $0xb08] sm:$0xff]  ;;  %v532_v26 = vld [vmem:[%s2963_s25 + $0xb10] sm:$0xff] }
  0xf6   : > { %2074 = vst [vmem:[%s3009_s20 + $0xa40] sm:$0xff] %v1306_v34  ;;  %2075 = vst [vmem:[%s3009_s20 + $0xa48] sm:$0xff] %v1307_v38  ;;  %v533_v27 = vld [vmem:[%s2963_s25 + $0xb18] sm:$0xff]  ;;  %v1331_v28 = vmul.f32 %v2989_v20, %v531_v25  ;;  %v1332_v29 = vmul.f32 %v2975_v11, %v532_v26  ;;  %v534_v31 = vld [vmem:[%s2963_s25 + $0xb20] sm:$0xff] }
  0xf7   : > { %2076 = vst [vmem:[%s3009_s20 + $0xa50] sm:$0xff] %v1308_v39  ;;  %2077 = vst [vmem:[%s3009_s20 + $0xa58] sm:$0xff] %v1309_v40  ;;  %v1333_v30 = vmul.f32 %v2977_v12, %v533_v27  ;;  %v535_v32 = vld [vmem:[%s2963_s25 + $0xb28] sm:$0xff]  ;;  %v536_v33 = vld [vmem:[%s2963_s25 + $0xb30] sm:$0xff]  ;;  %v1334_v34 = vmul.f32 %v2980_v14, %v534_v31 }
  0xf8   : > { %2078 = vst [vmem:[%s3009_s20 + $0xa60] sm:$0xff] %v1310_v44  ;;  %2079 = vst [vmem:[%s3009_s20 + $0xa68] sm:$0xff] %v1311_v45  ;;  %v1335_v35 = vmul.f32 %v2983_v16, %v535_v32  ;;  %v1336_v36 = vmul.f32 %v2986_v18, %v536_v33  ;;  %v537_v37 = vld [vmem:[%s2963_s25 + $0xb38] sm:$0xff]  ;;  %v538_v38 = vld [vmem:[%s2963_s25 + $0xb40] sm:$0xff] }
  0xf9   : > { %2080 = vst [vmem:[%s3009_s20 + $0xa70] sm:$0xff] %v1312_v46  ;;  %2081 = vst [vmem:[%s3009_s20 + $0xa78] sm:$0xff] %v1313_v50  ;;  %v539_v39 = vld [vmem:[%s2963_s25 + $0xb48] sm:$0xff]  ;;  %v1337_v40 = vmul.f32 %v2989_v20, %v537_v37  ;;  %v1338_v41 = vmul.f32 %v2975_v11, %v538_v38  ;;  %v540_v43 = vld [vmem:[%s2963_s25 + $0xb50] sm:$0xff] }
  0xfa   : > { %2082 = vst [vmem:[%s3009_s20 + $0xa80] sm:$0xff] %v1314_v51  ;;  %2083 = vst [vmem:[%s3009_s20 + $0xa88] sm:$0xff] %v1315_v52  ;;  %v1339_v42 = vmul.f32 %v2977_v12, %v539_v39  ;;  %v541_v44 = vld [vmem:[%s2963_s25 + $0xb58] sm:$0xff]  ;;  %v542_v45 = vld [vmem:[%s2963_s25 + $0xb60] sm:$0xff]  ;;  %v1340_v46 = vmul.f32 %v2980_v14, %v540_v43 }
  0xfb   : > { %2084 = vst [vmem:[%s3009_s20 + $0xa90] sm:$0xff] %v1316_v56  ;;  %2085 = vst [vmem:[%s3009_s20 + $0xa98] sm:$0xff] %v1317_v57  ;;  %v1341_v47 = vmul.f32 %v2983_v16, %v541_v44  ;;  %v1342_v48 = vmul.f32 %v2986_v18, %v542_v45  ;;  %v543_v49 = vld [vmem:[%s2963_s25 + $0xb68] sm:$0xff]  ;;  %v544_v50 = vld [vmem:[%s2963_s25 + $0xb70] sm:$0xff] }
  0xfc   : > { %2086 = vst [vmem:[%s3009_s20 + $0xaa0] sm:$0xff] %v1318_v58  ;;  %2087 = vst [vmem:[%s3009_s20 + $0xaa8] sm:$0xff] %v1319_v62  ;;  %v545_v51 = vld [vmem:[%s2963_s25 + $0xb78] sm:$0xff]  ;;  %v1343_v52 = vmul.f32 %v2989_v20, %v543_v49  ;;  %v1344_v53 = vmul.f32 %v2975_v11, %v544_v50  ;;  %v546_v55 = vld [vmem:[%s2963_s25 + $0xb80] sm:$0xff] }
  0xfd   : > { %2088 = vst [vmem:[%s3009_s20 + $0xab0] sm:$0xff] %v1320_v63  ;;  %2089 = vst [vmem:[%s3009_s20 + $0xab8] sm:$0xff] %v1321_v0  ;;  %v1345_v54 = vmul.f32 %v2977_v12, %v545_v51  ;;  %v547_v56 = vld [vmem:[%s2963_s25 + $0xb88] sm:$0xff]  ;;  %v548_v57 = vld [vmem:[%s2963_s25 + $0xb90] sm:$0xff]  ;;  %v1346_v58 = vmul.f32 %v2980_v14, %v546_v55 }
  0xfe   : > { %2090 = vst [vmem:[%s3009_s20 + $0xac0] sm:$0xff] %v1322_v4  ;;  %2091 = vst [vmem:[%s3009_s20 + $0xac8] sm:$0xff] %v1323_v5  ;;  %v1347_v59 = vmul.f32 %v2983_v16, %v547_v56  ;;  %v1348_v60 = vmul.f32 %v2986_v18, %v548_v57  ;;  %v549_v61 = vld [vmem:[%s2963_s25 + $0xb98] sm:$0xff]  ;;  %v550_v62 = vld [vmem:[%s2963_s25 + $0xba0] sm:$0xff] }
  0xff   : > { %2092 = vst [vmem:[%s3009_s20 + $0xad0] sm:$0xff] %v1324_v6  ;;  %2093 = vst [vmem:[%s3009_s20 + $0xad8] sm:$0xff] %v1325_v10  ;;  %v551_v63 = vld [vmem:[%s2963_s25 + $0xba8] sm:$0xff]  ;;  %v1349_v0 = vmul.f32 %v2989_v20, %v549_v61  ;;  %v1350_v1 = vmul.f32 %v2975_v11, %v550_v62  ;;  %v552_v3 = vld [vmem:[%s2963_s25 + $0xbb0] sm:$0xff] }
 0x100   : > { %2094 = vst [vmem:[%s3009_s20 + $0xae0] sm:$0xff] %v1326_v13  ;;  %2095 = vst [vmem:[%s3009_s20 + $0xae8] sm:$0xff] %v1327_v15  ;;  %v1351_v2 = vmul.f32 %v2977_v12, %v551_v63  ;;  %v553_v4 = vld [vmem:[%s2963_s25 + $0xbb8] sm:$0xff]  ;;  %v554_v5 = vld [vmem:[%s2963_s25 + $0xbc0] sm:$0xff]  ;;  %v1352_v6 = vmul.f32 %v2980_v14, %v552_v3 }
 0x101   : > { %2096 = vst [vmem:[%s3009_s20 + $0xaf0] sm:$0xff] %v1328_v22  ;;  %2097 = vst [vmem:[%s3009_s20 + $0xaf8] sm:$0xff] %v1329_v23  ;;  %v1353_v7 = vmul.f32 %v2983_v16, %v553_v4  ;;  %v1354_v8 = vmul.f32 %v2986_v18, %v554_v5  ;;  %v555_v9 = vld [vmem:[%s2963_s25 + $0xbc8] sm:$0xff]  ;;  %v556_v10 = vld [vmem:[%s2963_s25 + $0xbd0] sm:$0xff] }
 0x102   : > { %2098 = vst [vmem:[%s3009_s20 + $0xb00] sm:$0xff] %v1330_v24  ;;  %2099 = vst [vmem:[%s3009_s20 + $0xb08] sm:$0xff] %v1331_v28  ;;  %v557_v13 = vld [vmem:[%s2963_s25 + $0xbd8] sm:$0xff]  ;;  %v1355_v15 = vmul.f32 %v2989_v20, %v555_v9  ;;  %v1356_v17 = vmul.f32 %v2975_v11, %v556_v10  ;;  %v558_v21 = vld [vmem:[%s2963_s25 + $0xbe0] sm:$0xff] }
 0x103   : > { %2100 = vst [vmem:[%s3009_s20 + $0xb10] sm:$0xff] %v1332_v29  ;;  %2101 = vst [vmem:[%s3009_s20 + $0xb18] sm:$0xff] %v1333_v30  ;;  %v1357_v19 = vmul.f32 %v2977_v12, %v557_v13  ;;  %v559_v22 = vld [vmem:[%s2963_s25 + $0xbe8] sm:$0xff]  ;;  %v560_v23 = vld [vmem:[%s2963_s25 + $0xbf0] sm:$0xff]  ;;  %v1358_v24 = vmul.f32 %v2980_v14, %v558_v21 }
 0x104   : > { %2102 = vst [vmem:[%s3009_s20 + $0xb20] sm:$0xff] %v1334_v34  ;;  %2103 = vst [vmem:[%s3009_s20 + $0xb28] sm:$0xff] %v1335_v35  ;;  %v1359_v25 = vmul.f32 %v2983_v16, %v559_v22  ;;  %v1360_v26 = vmul.f32 %v2986_v18, %v560_v23  ;;  %v561_v27 = vld [vmem:[%s2963_s25 + $0xbf8] sm:$0xff]  ;;  %v562_v28 = vld [vmem:[%s2963_s25 + $0xc00] sm:$0xff] }
 0x105   : > { %2104 = vst [vmem:[%s3009_s20 + $0xb30] sm:$0xff] %v1336_v36  ;;  %2105 = vst [vmem:[%s3009_s20 + $0xb38] sm:$0xff] %v1337_v40  ;;  %v563_v29 = vld [vmem:[%s2963_s25 + $0xc08] sm:$0xff]  ;;  %v1361_v30 = vmul.f32 %v2989_v20, %v561_v27  ;;  %v1362_v31 = vmul.f32 %v2975_v11, %v562_v28  ;;  %v564_v33 = vld [vmem:[%s2963_s25 + $0xc10] sm:$0xff] }
 0x106   : > { %2106 = vst [vmem:[%s3009_s20 + $0xb40] sm:$0xff] %v1338_v41  ;;  %2107 = vst [vmem:[%s3009_s20 + $0xb48] sm:$0xff] %v1339_v42  ;;  %v1363_v32 = vmul.f32 %v2977_v12, %v563_v29  ;;  %v565_v34 = vld [vmem:[%s2963_s25 + $0xc18] sm:$0xff]  ;;  %v566_v35 = vld [vmem:[%s2963_s25 + $0xc20] sm:$0xff]  ;;  %v1364_v36 = vmul.f32 %v2980_v14, %v564_v33 }
 0x107   : > { %2108 = vst [vmem:[%s3009_s20 + $0xb50] sm:$0xff] %v1340_v46  ;;  %2109 = vst [vmem:[%s3009_s20 + $0xb58] sm:$0xff] %v1341_v47  ;;  %v1365_v37 = vmul.f32 %v2983_v16, %v565_v34  ;;  %v1366_v38 = vmul.f32 %v2986_v18, %v566_v35  ;;  %v567_v39 = vld [vmem:[%s2963_s25 + $0xc28] sm:$0xff]  ;;  %v568_v40 = vld [vmem:[%s2963_s25 + $0xc30] sm:$0xff] }
 0x108   : > { %2110 = vst [vmem:[%s3009_s20 + $0xb60] sm:$0xff] %v1342_v48  ;;  %2111 = vst [vmem:[%s3009_s20 + $0xb68] sm:$0xff] %v1343_v52  ;;  %v569_v41 = vld [vmem:[%s2963_s25 + $0xc38] sm:$0xff]  ;;  %v1367_v42 = vmul.f32 %v2989_v20, %v567_v39  ;;  %v1368_v43 = vmul.f32 %v2975_v11, %v568_v40  ;;  %v570_v45 = vld [vmem:[%s2963_s25 + $0xc40] sm:$0xff] }
 0x109   : > { %2112 = vst [vmem:[%s3009_s20 + $0xb70] sm:$0xff] %v1344_v53  ;;  %2113 = vst [vmem:[%s3009_s20 + $0xb78] sm:$0xff] %v1345_v54  ;;  %v1369_v44 = vmul.f32 %v2977_v12, %v569_v41  ;;  %v571_v46 = vld [vmem:[%s2963_s25 + $0xc48] sm:$0xff]  ;;  %v572_v47 = vld [vmem:[%s2963_s25 + $0xc50] sm:$0xff]  ;;  %v1370_v48 = vmul.f32 %v2980_v14, %v570_v45 }
 0x10a   : > { %2114 = vst [vmem:[%s3009_s20 + $0xb80] sm:$0xff] %v1346_v58  ;;  %2115 = vst [vmem:[%s3009_s20 + $0xb88] sm:$0xff] %v1347_v59  ;;  %v1371_v49 = vmul.f32 %v2983_v16, %v571_v46  ;;  %v1372_v50 = vmul.f32 %v2986_v18, %v572_v47  ;;  %v573_v51 = vld [vmem:[%s2963_s25 + $0xc58] sm:$0xff]  ;;  %v574_v52 = vld [vmem:[%s2963_s25 + $0xc60] sm:$0xff] }
 0x10b   : > { %2116 = vst [vmem:[%s3009_s20 + $0xb90] sm:$0xff] %v1348_v60  ;;  %2117 = vst [vmem:[%s3009_s20 + $0xb98] sm:$0xff] %v1349_v0  ;;  %v575_v53 = vld [vmem:[%s2963_s25 + $0xc68] sm:$0xff]  ;;  %v1373_v54 = vmul.f32 %v2989_v20, %v573_v51  ;;  %v1374_v55 = vmul.f32 %v2975_v11, %v574_v52  ;;  %v576_v57 = vld [vmem:[%s2963_s25 + $0xc70] sm:$0xff] }
 0x10c   : > { %2118 = vst [vmem:[%s3009_s20 + $0xba0] sm:$0xff] %v1350_v1  ;;  %2119 = vst [vmem:[%s3009_s20 + $0xba8] sm:$0xff] %v1351_v2  ;;  %v1375_v56 = vmul.f32 %v2977_v12, %v575_v53  ;;  %v577_v58 = vld [vmem:[%s2963_s25 + $0xc78] sm:$0xff]  ;;  %v578_v59 = vld [vmem:[%s2963_s25 + $0xc80] sm:$0xff]  ;;  %v1376_v60 = vmul.f32 %v2980_v14, %v576_v57 }
 0x10d   : > { %2120 = vst [vmem:[%s3009_s20 + $0xbb0] sm:$0xff] %v1352_v6  ;;  %2121 = vst [vmem:[%s3009_s20 + $0xbb8] sm:$0xff] %v1353_v7  ;;  %v1377_v61 = vmul.f32 %v2983_v16, %v577_v58  ;;  %v1378_v62 = vmul.f32 %v2986_v18, %v578_v59  ;;  %v579_v63 = vld [vmem:[%s2963_s25 + $0xc88] sm:$0xff]  ;;  %v580_v0 = vld [vmem:[%s2963_s25 + $0xc90] sm:$0xff] }
 0x10e   : > { %2122 = vst [vmem:[%s3009_s20 + $0xbc0] sm:$0xff] %v1354_v8  ;;  %2123 = vst [vmem:[%s3009_s20 + $0xbc8] sm:$0xff] %v1355_v15  ;;  %v581_v1 = vld [vmem:[%s2963_s25 + $0xc98] sm:$0xff]  ;;  %v1379_v2 = vmul.f32 %v2989_v20, %v579_v63  ;;  %v1380_v3 = vmul.f32 %v2975_v11, %v580_v0  ;;  %v582_v5 = vld [vmem:[%s2963_s25 + $0xca0] sm:$0xff] }
 0x10f   : > { %2124 = vst [vmem:[%s3009_s20 + $0xbd0] sm:$0xff] %v1356_v17  ;;  %2125 = vst [vmem:[%s3009_s20 + $0xbd8] sm:$0xff] %v1357_v19  ;;  %v1381_v4 = vmul.f32 %v2977_v12, %v581_v1  ;;  %v583_v6 = vld [vmem:[%s2963_s25 + $0xca8] sm:$0xff]  ;;  %v584_v7 = vld [vmem:[%s2963_s25 + $0xcb0] sm:$0xff]  ;;  %v1382_v8 = vmul.f32 %v2980_v14, %v582_v5 }
 0x110   : > { %2126 = vst [vmem:[%s3009_s20 + $0xbe0] sm:$0xff] %v1358_v24  ;;  %2127 = vst [vmem:[%s3009_s20 + $0xbe8] sm:$0xff] %v1359_v25  ;;  %v1383_v9 = vmul.f32 %v2983_v16, %v583_v6  ;;  %v1384_v10 = vmul.f32 %v2986_v18, %v584_v7  ;;  %v585_v13 = vld [vmem:[%s2963_s25 + $0xcb8] sm:$0xff]  ;;  %v586_v15 = vld [vmem:[%s2963_s25 + $0xcc0] sm:$0xff] }
 0x111   : > { %2128 = vst [vmem:[%s3009_s20 + $0xbf0] sm:$0xff] %v1360_v26  ;;  %2129 = vst [vmem:[%s3009_s20 + $0xbf8] sm:$0xff] %v1361_v30  ;;  %v587_v17 = vld [vmem:[%s2963_s25 + $0xcc8] sm:$0xff]  ;;  %v1385_v19 = vmul.f32 %v2989_v20, %v585_v13  ;;  %v1386_v21 = vmul.f32 %v2975_v11, %v586_v15  ;;  %v588_v23 = vld [vmem:[%s2963_s25 + $0xcd0] sm:$0xff] }
 0x112   : > { %2130 = vst [vmem:[%s3009_s20 + $0xc00] sm:$0xff] %v1362_v31  ;;  %2131 = vst [vmem:[%s3009_s20 + $0xc08] sm:$0xff] %v1363_v32  ;;  %v1387_v22 = vmul.f32 %v2977_v12, %v587_v17  ;;  %v589_v24 = vld [vmem:[%s2963_s25 + $0xcd8] sm:$0xff]  ;;  %v590_v25 = vld [vmem:[%s2963_s25 + $0xce0] sm:$0xff]  ;;  %v1388_v26 = vmul.f32 %v2980_v14, %v588_v23 }
 0x113   : > { %2132 = vst [vmem:[%s3009_s20 + $0xc10] sm:$0xff] %v1364_v36  ;;  %2133 = vst [vmem:[%s3009_s20 + $0xc18] sm:$0xff] %v1365_v37  ;;  %v1389_v27 = vmul.f32 %v2983_v16, %v589_v24  ;;  %v1390_v28 = vmul.f32 %v2986_v18, %v590_v25  ;;  %v591_v29 = vld [vmem:[%s2963_s25 + $0xce8] sm:$0xff]  ;;  %v592_v30 = vld [vmem:[%s2963_s25 + $0xcf0] sm:$0xff] }
 0x114   : > { %2134 = vst [vmem:[%s3009_s20 + $0xc20] sm:$0xff] %v1366_v38  ;;  %2135 = vst [vmem:[%s3009_s20 + $0xc28] sm:$0xff] %v1367_v42  ;;  %v593_v31 = vld [vmem:[%s2963_s25 + $0xcf8] sm:$0xff]  ;;  %v1391_v32 = vmul.f32 %v2989_v20, %v591_v29  ;;  %v1392_v33 = vmul.f32 %v2975_v11, %v592_v30  ;;  %v594_v35 = vld [vmem:[%s2963_s25 + $0xd00] sm:$0xff] }
 0x115   : > { %2136 = vst [vmem:[%s3009_s20 + $0xc30] sm:$0xff] %v1368_v43  ;;  %2137 = vst [vmem:[%s3009_s20 + $0xc38] sm:$0xff] %v1369_v44  ;;  %v1393_v34 = vmul.f32 %v2977_v12, %v593_v31  ;;  %v595_v36 = vld [vmem:[%s2963_s25 + $0xd08] sm:$0xff]  ;;  %v596_v37 = vld [vmem:[%s2963_s25 + $0xd10] sm:$0xff]  ;;  %v1394_v38 = vmul.f32 %v2980_v14, %v594_v35 }
 0x116   : > { %2138 = vst [vmem:[%s3009_s20 + $0xc40] sm:$0xff] %v1370_v48  ;;  %2139 = vst [vmem:[%s3009_s20 + $0xc48] sm:$0xff] %v1371_v49  ;;  %v1395_v39 = vmul.f32 %v2983_v16, %v595_v36  ;;  %v1396_v40 = vmul.f32 %v2986_v18, %v596_v37  ;;  %v597_v41 = vld [vmem:[%s2963_s25 + $0xd18] sm:$0xff]  ;;  %v598_v42 = vld [vmem:[%s2963_s25 + $0xd20] sm:$0xff] }
 0x117   : > { %2140 = vst [vmem:[%s3009_s20 + $0xc50] sm:$0xff] %v1372_v50  ;;  %2141 = vst [vmem:[%s3009_s20 + $0xc58] sm:$0xff] %v1373_v54  ;;  %v599_v43 = vld [vmem:[%s2963_s25 + $0xd28] sm:$0xff]  ;;  %v1397_v44 = vmul.f32 %v2989_v20, %v597_v41  ;;  %v1398_v45 = vmul.f32 %v2975_v11, %v598_v42  ;;  %v600_v47 = vld [vmem:[%s2963_s25 + $0xd30] sm:$0xff] }
 0x118   : > { %2142 = vst [vmem:[%s3009_s20 + $0xc60] sm:$0xff] %v1374_v55  ;;  %2143 = vst [vmem:[%s3009_s20 + $0xc68] sm:$0xff] %v1375_v56  ;;  %v1399_v46 = vmul.f32 %v2977_v12, %v599_v43  ;;  %v601_v48 = vld [vmem:[%s2963_s25 + $0xd38] sm:$0xff]  ;;  %v602_v49 = vld [vmem:[%s2963_s25 + $0xd40] sm:$0xff]  ;;  %v1400_v50 = vmul.f32 %v2980_v14, %v600_v47 }
 0x119   : > { %2144 = vst [vmem:[%s3009_s20 + $0xc70] sm:$0xff] %v1376_v60  ;;  %2145 = vst [vmem:[%s3009_s20 + $0xc78] sm:$0xff] %v1377_v61  ;;  %v1401_v51 = vmul.f32 %v2983_v16, %v601_v48  ;;  %v1402_v52 = vmul.f32 %v2986_v18, %v602_v49  ;;  %v603_v53 = vld [vmem:[%s2963_s25 + $0xd48] sm:$0xff]  ;;  %v604_v54 = vld [vmem:[%s2963_s25 + $0xd50] sm:$0xff] }
 0x11a   : > { %2146 = vst [vmem:[%s3009_s20 + $0xc80] sm:$0xff] %v1378_v62  ;;  %2147 = vst [vmem:[%s3009_s20 + $0xc88] sm:$0xff] %v1379_v2  ;;  %v605_v55 = vld [vmem:[%s2963_s25 + $0xd58] sm:$0xff]  ;;  %v1403_v56 = vmul.f32 %v2989_v20, %v603_v53  ;;  %v1404_v57 = vmul.f32 %v2975_v11, %v604_v54  ;;  %v606_v59 = vld [vmem:[%s2963_s25 + $0xd60] sm:$0xff] }
 0x11b   : > { %2148 = vst [vmem:[%s3009_s20 + $0xc90] sm:$0xff] %v1380_v3  ;;  %2149 = vst [vmem:[%s3009_s20 + $0xc98] sm:$0xff] %v1381_v4  ;;  %v1405_v58 = vmul.f32 %v2977_v12, %v605_v55  ;;  %v607_v60 = vld [vmem:[%s2963_s25 + $0xd68] sm:$0xff]  ;;  %v608_v61 = vld [vmem:[%s2963_s25 + $0xd70] sm:$0xff]  ;;  %v1406_v62 = vmul.f32 %v2980_v14, %v606_v59 }
 0x11c   : > { %2150 = vst [vmem:[%s3009_s20 + $0xca0] sm:$0xff] %v1382_v8  ;;  %2151 = vst [vmem:[%s3009_s20 + $0xca8] sm:$0xff] %v1383_v9  ;;  %v1407_v63 = vmul.f32 %v2983_v16, %v607_v60  ;;  %v1408_v0 = vmul.f32 %v2986_v18, %v608_v61  ;;  %v609_v1 = vld [vmem:[%s2963_s25 + $0xd78] sm:$0xff]  ;;  %v610_v2 = vld [vmem:[%s2963_s25 + $0xd80] sm:$0xff] }
 0x11d   : > { %2152 = vst [vmem:[%s3009_s20 + $0xcb0] sm:$0xff] %v1384_v10  ;;  %2153 = vst [vmem:[%s3009_s20 + $0xcb8] sm:$0xff] %v1385_v19  ;;  %v611_v3 = vld [vmem:[%s2963_s25 + $0xd88] sm:$0xff]  ;;  %v1409_v4 = vmul.f32 %v2989_v20, %v609_v1  ;;  %v1410_v5 = vmul.f32 %v2975_v11, %v610_v2  ;;  %v612_v7 = vld [vmem:[%s2963_s25 + $0xd90] sm:$0xff] }
 0x11e   : > { %2154 = vst [vmem:[%s3009_s20 + $0xcc0] sm:$0xff] %v1386_v21  ;;  %2155 = vst [vmem:[%s3009_s20 + $0xcc8] sm:$0xff] %v1387_v22  ;;  %v1411_v6 = vmul.f32 %v2977_v12, %v611_v3  ;;  %v613_v8 = vld [vmem:[%s2963_s25 + $0xd98] sm:$0xff]  ;;  %v614_v9 = vld [vmem:[%s2963_s25 + $0xda0] sm:$0xff]  ;;  %v1412_v10 = vmul.f32 %v2980_v14, %v612_v7 }
 0x11f   : > { %2156 = vst [vmem:[%s3009_s20 + $0xcd0] sm:$0xff] %v1388_v26  ;;  %2157 = vst [vmem:[%s3009_s20 + $0xcd8] sm:$0xff] %v1389_v27  ;;  %v1413_v13 = vmul.f32 %v2983_v16, %v613_v8  ;;  %v1414_v15 = vmul.f32 %v2986_v18, %v614_v9  ;;  %v615_v17 = vld [vmem:[%s2963_s25 + $0xda8] sm:$0xff]  ;;  %v616_v19 = vld [vmem:[%s2963_s25 + $0xdb0] sm:$0xff] }
 0x120   : > { %2158 = vst [vmem:[%s3009_s20 + $0xce0] sm:$0xff] %v1390_v28  ;;  %2159 = vst [vmem:[%s3009_s20 + $0xce8] sm:$0xff] %v1391_v32  ;;  %v617_v21 = vld [vmem:[%s2963_s25 + $0xdb8] sm:$0xff]  ;;  %v1415_v22 = vmul.f32 %v2989_v20, %v615_v17  ;;  %v1416_v23 = vmul.f32 %v2975_v11, %v616_v19  ;;  %v618_v25 = vld [vmem:[%s2963_s25 + $0xdc0] sm:$0xff] }
 0x121   : > { %2160 = vst [vmem:[%s3009_s20 + $0xcf0] sm:$0xff] %v1392_v33  ;;  %2161 = vst [vmem:[%s3009_s20 + $0xcf8] sm:$0xff] %v1393_v34  ;;  %v1417_v24 = vmul.f32 %v2977_v12, %v617_v21  ;;  %v619_v26 = vld [vmem:[%s2963_s25 + $0xdc8] sm:$0xff]  ;;  %v620_v27 = vld [vmem:[%s2963_s25 + $0xdd0] sm:$0xff]  ;;  %v1418_v28 = vmul.f32 %v2980_v14, %v618_v25 }
 0x122   : > { %2162 = vst [vmem:[%s3009_s20 + $0xd00] sm:$0xff] %v1394_v38  ;;  %2163 = vst [vmem:[%s3009_s20 + $0xd08] sm:$0xff] %v1395_v39  ;;  %v1419_v29 = vmul.f32 %v2983_v16, %v619_v26  ;;  %v1420_v30 = vmul.f32 %v2986_v18, %v620_v27  ;;  %v621_v31 = vld [vmem:[%s2963_s25 + $0xdd8] sm:$0xff]  ;;  %v622_v32 = vld [vmem:[%s2963_s25 + $0xde0] sm:$0xff] }
 0x123   : > { %2164 = vst [vmem:[%s3009_s20 + $0xd10] sm:$0xff] %v1396_v40  ;;  %2165 = vst [vmem:[%s3009_s20 + $0xd18] sm:$0xff] %v1397_v44  ;;  %v623_v33 = vld [vmem:[%s2963_s25 + $0xde8] sm:$0xff]  ;;  %v1421_v34 = vmul.f32 %v2989_v20, %v621_v31  ;;  %v1422_v35 = vmul.f32 %v2975_v11, %v622_v32  ;;  %v624_v37 = vld [vmem:[%s2963_s25 + $0xdf0] sm:$0xff] }
 0x124   : > { %2166 = vst [vmem:[%s3009_s20 + $0xd20] sm:$0xff] %v1398_v45  ;;  %2167 = vst [vmem:[%s3009_s20 + $0xd28] sm:$0xff] %v1399_v46  ;;  %v1423_v36 = vmul.f32 %v2977_v12, %v623_v33  ;;  %v625_v38 = vld [vmem:[%s2963_s25 + $0xdf8] sm:$0xff]  ;;  %v626_v39 = vld [vmem:[%s2963_s25 + $0xe00] sm:$0xff]  ;;  %v1424_v40 = vmul.f32 %v2980_v14, %v624_v37 }
 0x125   : > { %2168 = vst [vmem:[%s3009_s20 + $0xd30] sm:$0xff] %v1400_v50  ;;  %2169 = vst [vmem:[%s3009_s20 + $0xd38] sm:$0xff] %v1401_v51  ;;  %v1425_v41 = vmul.f32 %v2983_v16, %v625_v38  ;;  %v1426_v42 = vmul.f32 %v2986_v18, %v626_v39  ;;  %v627_v43 = vld [vmem:[%s2963_s25 + $0xe08] sm:$0xff]  ;;  %v628_v44 = vld [vmem:[%s2963_s25 + $0xe10] sm:$0xff] }
 0x126   : > { %2170 = vst [vmem:[%s3009_s20 + $0xd40] sm:$0xff] %v1402_v52  ;;  %2171 = vst [vmem:[%s3009_s20 + $0xd48] sm:$0xff] %v1403_v56  ;;  %v629_v45 = vld [vmem:[%s2963_s25 + $0xe18] sm:$0xff]  ;;  %v1427_v46 = vmul.f32 %v2989_v20, %v627_v43  ;;  %v1428_v47 = vmul.f32 %v2975_v11, %v628_v44  ;;  %v630_v49 = vld [vmem:[%s2963_s25 + $0xe20] sm:$0xff] }
 0x127   : > { %2172 = vst [vmem:[%s3009_s20 + $0xd50] sm:$0xff] %v1404_v57  ;;  %2173 = vst [vmem:[%s3009_s20 + $0xd58] sm:$0xff] %v1405_v58  ;;  %v1429_v48 = vmul.f32 %v2977_v12, %v629_v45  ;;  %v631_v50 = vld [vmem:[%s2963_s25 + $0xe28] sm:$0xff]  ;;  %v632_v51 = vld [vmem:[%s2963_s25 + $0xe30] sm:$0xff]  ;;  %v1430_v52 = vmul.f32 %v2980_v14, %v630_v49 }
 0x128   : > { %2174 = vst [vmem:[%s3009_s20 + $0xd60] sm:$0xff] %v1406_v62  ;;  %2175 = vst [vmem:[%s3009_s20 + $0xd68] sm:$0xff] %v1407_v63  ;;  %v1431_v53 = vmul.f32 %v2983_v16, %v631_v50  ;;  %v1432_v54 = vmul.f32 %v2986_v18, %v632_v51  ;;  %v633_v55 = vld [vmem:[%s2963_s25 + $0xe38] sm:$0xff]  ;;  %v634_v56 = vld [vmem:[%s2963_s25 + $0xe40] sm:$0xff] }
 0x129   : > { %2176 = vst [vmem:[%s3009_s20 + $0xd70] sm:$0xff] %v1408_v0  ;;  %2177 = vst [vmem:[%s3009_s20 + $0xd78] sm:$0xff] %v1409_v4  ;;  %v635_v57 = vld [vmem:[%s2963_s25 + $0xe48] sm:$0xff]  ;;  %v1433_v58 = vmul.f32 %v2989_v20, %v633_v55  ;;  %v1434_v59 = vmul.f32 %v2975_v11, %v634_v56  ;;  %v636_v61 = vld [vmem:[%s2963_s25 + $0xe50] sm:$0xff] }
 0x12a   : > { %2178 = vst [vmem:[%s3009_s20 + $0xd80] sm:$0xff] %v1410_v5  ;;  %2179 = vst [vmem:[%s3009_s20 + $0xd88] sm:$0xff] %v1411_v6  ;;  %v1435_v60 = vmul.f32 %v2977_v12, %v635_v57  ;;  %v637_v62 = vld [vmem:[%s2963_s25 + $0xe58] sm:$0xff]  ;;  %v638_v63 = vld [vmem:[%s2963_s25 + $0xe60] sm:$0xff]  ;;  %v1436_v0 = vmul.f32 %v2980_v14, %v636_v61 }
 0x12b   : > { %2180 = vst [vmem:[%s3009_s20 + $0xd90] sm:$0xff] %v1412_v10  ;;  %2181 = vst [vmem:[%s3009_s20 + $0xd98] sm:$0xff] %v1413_v13  ;;  %v1437_v1 = vmul.f32 %v2983_v16, %v637_v62  ;;  %v1438_v2 = vmul.f32 %v2986_v18, %v638_v63  ;;  %v639_v3 = vld [vmem:[%s2963_s25 + $0xe68] sm:$0xff]  ;;  %v640_v4 = vld [vmem:[%s2963_s25 + $0xe70] sm:$0xff] }
 0x12c   : > { %2182 = vst [vmem:[%s3009_s20 + $0xda0] sm:$0xff] %v1414_v15  ;;  %2183 = vst [vmem:[%s3009_s20 + $0xda8] sm:$0xff] %v1415_v22  ;;  %v641_v5 = vld [vmem:[%s2963_s25 + $0xe78] sm:$0xff]  ;;  %v1439_v6 = vmul.f32 %v2989_v20, %v639_v3  ;;  %v1440_v7 = vmul.f32 %v2975_v11, %v640_v4  ;;  %v642_v9 = vld [vmem:[%s2963_s25 + $0xe80] sm:$0xff] }
 0x12d   : > { %2184 = vst [vmem:[%s3009_s20 + $0xdb0] sm:$0xff] %v1416_v23  ;;  %2185 = vst [vmem:[%s3009_s20 + $0xdb8] sm:$0xff] %v1417_v24  ;;  %v1441_v8 = vmul.f32 %v2977_v12, %v641_v5  ;;  %v643_v10 = vld [vmem:[%s2963_s25 + $0xe88] sm:$0xff]  ;;  %v644_v13 = vld [vmem:[%s2963_s25 + $0xe90] sm:$0xff]  ;;  %v1442_v15 = vmul.f32 %v2980_v14, %v642_v9 }
 0x12e   : > { %2186 = vst [vmem:[%s3009_s20 + $0xdc0] sm:$0xff] %v1418_v28  ;;  %2187 = vst [vmem:[%s3009_s20 + $0xdc8] sm:$0xff] %v1419_v29  ;;  %v1443_v17 = vmul.f32 %v2983_v16, %v643_v10  ;;  %v1444_v19 = vmul.f32 %v2986_v18, %v644_v13  ;;  %v645_v21 = vld [vmem:[%s2963_s25 + $0xe98] sm:$0xff]  ;;  %v646_v22 = vld [vmem:[%s2963_s25 + $0xea0] sm:$0xff] }
 0x12f   : > { %2188 = vst [vmem:[%s3009_s20 + $0xdd0] sm:$0xff] %v1420_v30  ;;  %2189 = vst [vmem:[%s3009_s20 + $0xdd8] sm:$0xff] %v1421_v34  ;;  %v647_v23 = vld [vmem:[%s2963_s25 + $0xea8] sm:$0xff]  ;;  %v1445_v24 = vmul.f32 %v2989_v20, %v645_v21  ;;  %v1446_v25 = vmul.f32 %v2975_v11, %v646_v22  ;;  %v648_v27 = vld [vmem:[%s2963_s25 + $0xeb0] sm:$0xff] }
 0x130   : > { %2190 = vst [vmem:[%s3009_s20 + $0xde0] sm:$0xff] %v1422_v35  ;;  %2191 = vst [vmem:[%s3009_s20 + $0xde8] sm:$0xff] %v1423_v36  ;;  %v1447_v26 = vmul.f32 %v2977_v12, %v647_v23  ;;  %v649_v28 = vld [vmem:[%s2963_s25 + $0xeb8] sm:$0xff]  ;;  %v650_v29 = vld [vmem:[%s2963_s25 + $0xec0] sm:$0xff]  ;;  %v1448_v30 = vmul.f32 %v2980_v14, %v648_v27 }
 0x131   : > { %2192 = vst [vmem:[%s3009_s20 + $0xdf0] sm:$0xff] %v1424_v40  ;;  %2193 = vst [vmem:[%s3009_s20 + $0xdf8] sm:$0xff] %v1425_v41  ;;  %v1449_v31 = vmul.f32 %v2983_v16, %v649_v28  ;;  %v1450_v32 = vmul.f32 %v2986_v18, %v650_v29  ;;  %v651_v33 = vld [vmem:[%s2963_s25 + $0xec8] sm:$0xff]  ;;  %v652_v34 = vld [vmem:[%s2963_s25 + $0xed0] sm:$0xff] }
 0x132   : > { %2194 = vst [vmem:[%s3009_s20 + $0xe00] sm:$0xff] %v1426_v42  ;;  %2195 = vst [vmem:[%s3009_s20 + $0xe08] sm:$0xff] %v1427_v46  ;;  %v653_v35 = vld [vmem:[%s2963_s25 + $0xed8] sm:$0xff]  ;;  %v1451_v36 = vmul.f32 %v2989_v20, %v651_v33  ;;  %v1452_v37 = vmul.f32 %v2975_v11, %v652_v34  ;;  %v654_v39 = vld [vmem:[%s2963_s25 + $0xee0] sm:$0xff] }
 0x133   : > { %2196 = vst [vmem:[%s3009_s20 + $0xe10] sm:$0xff] %v1428_v47  ;;  %2197 = vst [vmem:[%s3009_s20 + $0xe18] sm:$0xff] %v1429_v48  ;;  %v1453_v38 = vmul.f32 %v2977_v12, %v653_v35  ;;  %v655_v40 = vld [vmem:[%s2963_s25 + $0xee8] sm:$0xff]  ;;  %v656_v41 = vld [vmem:[%s2963_s25 + $0xef0] sm:$0xff]  ;;  %v1454_v42 = vmul.f32 %v2980_v14, %v654_v39 }
 0x134   : > { %2198 = vst [vmem:[%s3009_s20 + $0xe20] sm:$0xff] %v1430_v52  ;;  %2199 = vst [vmem:[%s3009_s20 + $0xe28] sm:$0xff] %v1431_v53  ;;  %v1455_v43 = vmul.f32 %v2983_v16, %v655_v40  ;;  %v1456_v44 = vmul.f32 %v2986_v18, %v656_v41  ;;  %v657_v45 = vld [vmem:[%s2963_s25 + $0xef8] sm:$0xff]  ;;  %v658_v46 = vld [vmem:[%s2963_s25 + $0xf00] sm:$0xff] }
 0x135   : > { %2200 = vst [vmem:[%s3009_s20 + $0xe30] sm:$0xff] %v1432_v54  ;;  %2201 = vst [vmem:[%s3009_s20 + $0xe38] sm:$0xff] %v1433_v58  ;;  %v659_v47 = vld [vmem:[%s2963_s25 + $0xf08] sm:$0xff]  ;;  %v1457_v48 = vmul.f32 %v2989_v20, %v657_v45  ;;  %v1458_v49 = vmul.f32 %v2975_v11, %v658_v46  ;;  %v660_v51 = vld [vmem:[%s2963_s25 + $0xf10] sm:$0xff] }
 0x136   : > { %2202 = vst [vmem:[%s3009_s20 + $0xe40] sm:$0xff] %v1434_v59  ;;  %2203 = vst [vmem:[%s3009_s20 + $0xe48] sm:$0xff] %v1435_v60  ;;  %v1459_v50 = vmul.f32 %v2977_v12, %v659_v47  ;;  %v661_v52 = vld [vmem:[%s2963_s25 + $0xf18] sm:$0xff]  ;;  %v662_v53 = vld [vmem:[%s2963_s25 + $0xf20] sm:$0xff]  ;;  %v1460_v54 = vmul.f32 %v2980_v14, %v660_v51 }
 0x137   : > { %2204 = vst [vmem:[%s3009_s20 + $0xe50] sm:$0xff] %v1436_v0  ;;  %2205 = vst [vmem:[%s3009_s20 + $0xe58] sm:$0xff] %v1437_v1  ;;  %v1461_v55 = vmul.f32 %v2983_v16, %v661_v52  ;;  %v1462_v56 = vmul.f32 %v2986_v18, %v662_v53  ;;  %v663_v57 = vld [vmem:[%s2963_s25 + $0xf28] sm:$0xff]  ;;  %v664_v58 = vld [vmem:[%s2963_s25 + $0xf30] sm:$0xff] }
 0x138   : > { %2206 = vst [vmem:[%s3009_s20 + $0xe60] sm:$0xff] %v1438_v2  ;;  %2207 = vst [vmem:[%s3009_s20 + $0xe68] sm:$0xff] %v1439_v6  ;;  %v665_v59 = vld [vmem:[%s2963_s25 + $0xf38] sm:$0xff]  ;;  %v1463_v60 = vmul.f32 %v2989_v20, %v663_v57  ;;  %v1464_v61 = vmul.f32 %v2975_v11, %v664_v58  ;;  %v666_v63 = vld [vmem:[%s2963_s25 + $0xf40] sm:$0xff] }
 0x139   : > { %2208 = vst [vmem:[%s3009_s20 + $0xe70] sm:$0xff] %v1440_v7  ;;  %2209 = vst [vmem:[%s3009_s20 + $0xe78] sm:$0xff] %v1441_v8  ;;  %v1465_v62 = vmul.f32 %v2977_v12, %v665_v59  ;;  %v667_v0 = vld [vmem:[%s2963_s25 + $0xf48] sm:$0xff]  ;;  %v668_v1 = vld [vmem:[%s2963_s25 + $0xf50] sm:$0xff]  ;;  %v1466_v2 = vmul.f32 %v2980_v14, %v666_v63 }
 0x13a   : > { %2210 = vst [vmem:[%s3009_s20 + $0xe80] sm:$0xff] %v1442_v15  ;;  %2211 = vst [vmem:[%s3009_s20 + $0xe88] sm:$0xff] %v1443_v17  ;;  %v1467_v3 = vmul.f32 %v2983_v16, %v667_v0  ;;  %v1468_v4 = vmul.f32 %v2986_v18, %v668_v1  ;;  %v669_v5 = vld [vmem:[%s2963_s25 + $0xf58] sm:$0xff]  ;;  %v670_v6 = vld [vmem:[%s2963_s25 + $0xf60] sm:$0xff] }
 0x13b   : > { %2212 = vst [vmem:[%s3009_s20 + $0xe90] sm:$0xff] %v1444_v19  ;;  %2213 = vst [vmem:[%s3009_s20 + $0xe98] sm:$0xff] %v1445_v24  ;;  %v671_v7 = vld [vmem:[%s2963_s25 + $0xf68] sm:$0xff]  ;;  %v1469_v8 = vmul.f32 %v2989_v20, %v669_v5  ;;  %v1470_v9 = vmul.f32 %v2975_v11, %v670_v6  ;;  %v672_v13 = vld [vmem:[%s2963_s25 + $0xf70] sm:$0xff] }
 0x13c   : > { %2214 = vst [vmem:[%s3009_s20 + $0xea0] sm:$0xff] %v1446_v25  ;;  %2215 = vst [vmem:[%s3009_s20 + $0xea8] sm:$0xff] %v1447_v26  ;;  %v1471_v10 = vmul.f32 %v2977_v12, %v671_v7  ;;  %v673_v15 = vld [vmem:[%s2963_s25 + $0xf78] sm:$0xff]  ;;  %v674_v17 = vld [vmem:[%s2963_s25 + $0xf80] sm:$0xff]  ;;  %v1472_v19 = vmul.f32 %v2980_v14, %v672_v13 }
 0x13d   : > { %2216 = vst [vmem:[%s3009_s20 + $0xeb0] sm:$0xff] %v1448_v30  ;;  %2217 = vst [vmem:[%s3009_s20 + $0xeb8] sm:$0xff] %v1449_v31  ;;  %v1473_v21 = vmul.f32 %v2983_v16, %v673_v15  ;;  %v1474_v22 = vmul.f32 %v2986_v18, %v674_v17  ;;  %v675_v23 = vld [vmem:[%s2963_s25 + $0xf88] sm:$0xff]  ;;  %v676_v24 = vld [vmem:[%s2963_s25 + $0xf90] sm:$0xff] }
 0x13e   : > { %2218 = vst [vmem:[%s3009_s20 + $0xec0] sm:$0xff] %v1450_v32  ;;  %2219 = vst [vmem:[%s3009_s20 + $0xec8] sm:$0xff] %v1451_v36  ;;  %v677_v25 = vld [vmem:[%s2963_s25 + $0xf98] sm:$0xff]  ;;  %v1475_v26 = vmul.f32 %v2989_v20, %v675_v23  ;;  %v1476_v27 = vmul.f32 %v2975_v11, %v676_v24  ;;  %v678_v29 = vld [vmem:[%s2963_s25 + $0xfa0] sm:$0xff] }
 0x13f   : > { %2220 = vst [vmem:[%s3009_s20 + $0xed0] sm:$0xff] %v1452_v37  ;;  %2221 = vst [vmem:[%s3009_s20 + $0xed8] sm:$0xff] %v1453_v38  ;;  %v1477_v28 = vmul.f32 %v2977_v12, %v677_v25  ;;  %v679_v30 = vld [vmem:[%s2963_s25 + $0xfa8] sm:$0xff]  ;;  %v680_v31 = vld [vmem:[%s2963_s25 + $0xfb0] sm:$0xff]  ;;  %v1478_v32 = vmul.f32 %v2980_v14, %v678_v29 }
 0x140   : > { %2222 = vst [vmem:[%s3009_s20 + $0xee0] sm:$0xff] %v1454_v42  ;;  %2223 = vst [vmem:[%s3009_s20 + $0xee8] sm:$0xff] %v1455_v43  ;;  %v1479_v33 = vmul.f32 %v2983_v16, %v679_v30  ;;  %v1480_v34 = vmul.f32 %v2986_v18, %v680_v31  ;;  %v681_v35 = vld [vmem:[%s2963_s25 + $0xfb8] sm:$0xff]  ;;  %v682_v36 = vld [vmem:[%s2963_s25 + $0xfc0] sm:$0xff] }
 0x141   : > { %2224 = vst [vmem:[%s3009_s20 + $0xef0] sm:$0xff] %v1456_v44  ;;  %2225 = vst [vmem:[%s3009_s20 + $0xef8] sm:$0xff] %v1457_v48  ;;  %v683_v37 = vld [vmem:[%s2963_s25 + $0xfc8] sm:$0xff]  ;;  %v1481_v38 = vmul.f32 %v2989_v20, %v681_v35  ;;  %v1482_v39 = vmul.f32 %v2975_v11, %v682_v36  ;;  %v684_v41 = vld [vmem:[%s2963_s25 + $0xfd0] sm:$0xff] }
 0x142   : > { %2226 = vst [vmem:[%s3009_s20 + $0xf00] sm:$0xff] %v1458_v49  ;;  %2227 = vst [vmem:[%s3009_s20 + $0xf08] sm:$0xff] %v1459_v50  ;;  %v1483_v40 = vmul.f32 %v2977_v12, %v683_v37  ;;  %v685_v42 = vld [vmem:[%s2963_s25 + $0xfd8] sm:$0xff]  ;;  %v686_v43 = vld [vmem:[%s2963_s25 + $0xfe0] sm:$0xff]  ;;  %v1484_v44 = vmul.f32 %v2980_v14, %v684_v41 }
 0x143   : > { %2228 = vst [vmem:[%s3009_s20 + $0xf10] sm:$0xff] %v1460_v54  ;;  %2229 = vst [vmem:[%s3009_s20 + $0xf18] sm:$0xff] %v1461_v55  ;;  %v1485_v45 = vmul.f32 %v2983_v16, %v685_v42  ;;  %v1486_v46 = vmul.f32 %v2986_v18, %v686_v43  ;;  %v687_v47 = vld [vmem:[%s2963_s25 + $0xfe8] sm:$0xff]  ;;  %v688_v48 = vld [vmem:[%s2963_s25 + $0xff0] sm:$0xff] }
 0x144   : > { %2230 = vst [vmem:[%s3009_s20 + $0xf20] sm:$0xff] %v1462_v56  ;;  %2231 = vst [vmem:[%s3009_s20 + $0xf28] sm:$0xff] %v1463_v60  ;;  %v689_v49 = vld [vmem:[%s2963_s25 + $0xff8] sm:$0xff]  ;;  %v1487_v50 = vmul.f32 %v2989_v20, %v687_v47  ;;  %v1488_v51 = vmul.f32 %v2975_v11, %v688_v48  ;;  %v690_v53 = vld [vmem:[%s2963_s25 + $0x1000] sm:$0xff] }
 0x145   : > { %2232 = vst [vmem:[%s3009_s20 + $0xf30] sm:$0xff] %v1464_v61  ;;  %2233 = vst [vmem:[%s3009_s20 + $0xf38] sm:$0xff] %v1465_v62  ;;  %v1489_v52 = vmul.f32 %v2977_v12, %v689_v49  ;;  %v691_v54 = vld [vmem:[%s2963_s25 + $0x1008] sm:$0xff]  ;;  %v692_v55 = vld [vmem:[%s2963_s25 + $0x1010] sm:$0xff]  ;;  %v1490_v56 = vmul.f32 %v2980_v14, %v690_v53 }
 0x146   : > { %2234 = vst [vmem:[%s3009_s20 + $0xf40] sm:$0xff] %v1466_v2  ;;  %2235 = vst [vmem:[%s3009_s20 + $0xf48] sm:$0xff] %v1467_v3  ;;  %v1491_v57 = vmul.f32 %v2983_v16, %v691_v54  ;;  %v1492_v58 = vmul.f32 %v2986_v18, %v692_v55  ;;  %v693_v59 = vld [vmem:[%s2963_s25 + $0x1018] sm:$0xff]  ;;  %v694_v60 = vld [vmem:[%s2963_s25 + $0x1020] sm:$0xff] }
 0x147   : > { %2236 = vst [vmem:[%s3009_s20 + $0xf50] sm:$0xff] %v1468_v4  ;;  %2237 = vst [vmem:[%s3009_s20 + $0xf58] sm:$0xff] %v1469_v8  ;;  %v695_v61 = vld [vmem:[%s2963_s25 + $0x1028] sm:$0xff]  ;;  %v1493_v62 = vmul.f32 %v2989_v20, %v693_v59  ;;  %v1494_v63 = vmul.f32 %v2975_v11, %v694_v60  ;;  %v696_v1 = vld [vmem:[%s2963_s25 + $0x1030] sm:$0xff] }
 0x148   : > { %2238 = vst [vmem:[%s3009_s20 + $0xf60] sm:$0xff] %v1470_v9  ;;  %2239 = vst [vmem:[%s3009_s20 + $0xf68] sm:$0xff] %v1471_v10  ;;  %v1495_v0 = vmul.f32 %v2977_v12, %v695_v61  ;;  %v697_v2 = vld [vmem:[%s2963_s25 + $0x1038] sm:$0xff]  ;;  %v698_v3 = vld [vmem:[%s2963_s25 + $0x1040] sm:$0xff]  ;;  %v1496_v4 = vmul.f32 %v2980_v14, %v696_v1 }
 0x149   : > { %2240 = vst [vmem:[%s3009_s20 + $0xf70] sm:$0xff] %v1472_v19  ;;  %2241 = vst [vmem:[%s3009_s20 + $0xf78] sm:$0xff] %v1473_v21  ;;  %v1497_v5 = vmul.f32 %v2983_v16, %v697_v2  ;;  %v1498_v6 = vmul.f32 %v2986_v18, %v698_v3  ;;  %v699_v7 = vld [vmem:[%s2963_s25 + $0x1048] sm:$0xff]  ;;  %v700_v8 = vld [vmem:[%s2963_s25 + $0x1050] sm:$0xff] }
 0x14a   : > { %2242 = vst [vmem:[%s3009_s20 + $0xf80] sm:$0xff] %v1474_v22  ;;  %2243 = vst [vmem:[%s3009_s20 + $0xf88] sm:$0xff] %v1475_v26  ;;  %v701_v9 = vld [vmem:[%s2963_s25 + $0x1058] sm:$0xff]  ;;  %v1499_v10 = vmul.f32 %v2989_v20, %v699_v7  ;;  %v1500_v13 = vmul.f32 %v2975_v11, %v700_v8  ;;  %v702_v17 = vld [vmem:[%s2963_s25 + $0x1060] sm:$0xff] }
 0x14b   : > { %2244 = vst [vmem:[%s3009_s20 + $0xf90] sm:$0xff] %v1476_v27  ;;  %2245 = vst [vmem:[%s3009_s20 + $0xf98] sm:$0xff] %v1477_v28  ;;  %v1501_v15 = vmul.f32 %v2977_v12, %v701_v9  ;;  %v703_v19 = vld [vmem:[%s2963_s25 + $0x1068] sm:$0xff]  ;;  %v704_v21 = vld [vmem:[%s2963_s25 + $0x1070] sm:$0xff]  ;;  %v1502_v22 = vmul.f32 %v2980_v14, %v702_v17 }
 0x14c   : > { %2246 = vst [vmem:[%s3009_s20 + $0xfa0] sm:$0xff] %v1478_v32  ;;  %2247 = vst [vmem:[%s3009_s20 + $0xfa8] sm:$0xff] %v1479_v33  ;;  %v1503_v23 = vmul.f32 %v2983_v16, %v703_v19  ;;  %v1504_v24 = vmul.f32 %v2986_v18, %v704_v21  ;;  %v705_v25 = vld [vmem:[%s2963_s25 + $0x1078] sm:$0xff]  ;;  %v706_v26 = vld [vmem:[%s2963_s25 + $0x1080] sm:$0xff] }
 0x14d   : > { %2248 = vst [vmem:[%s3009_s20 + $0xfb0] sm:$0xff] %v1480_v34  ;;  %2249 = vst [vmem:[%s3009_s20 + $0xfb8] sm:$0xff] %v1481_v38  ;;  %v707_v27 = vld [vmem:[%s2963_s25 + $0x1088] sm:$0xff]  ;;  %v1505_v28 = vmul.f32 %v2989_v20, %v705_v25  ;;  %v1506_v29 = vmul.f32 %v2975_v11, %v706_v26  ;;  %v708_v31 = vld [vmem:[%s2963_s25 + $0x1090] sm:$0xff] }
 0x14e   : > { %2250 = vst [vmem:[%s3009_s20 + $0xfc0] sm:$0xff] %v1482_v39  ;;  %2251 = vst [vmem:[%s3009_s20 + $0xfc8] sm:$0xff] %v1483_v40  ;;  %v1507_v30 = vmul.f32 %v2977_v12, %v707_v27  ;;  %v709_v32 = vld [vmem:[%s2963_s25 + $0x1098] sm:$0xff]  ;;  %v710_v33 = vld [vmem:[%s2963_s25 + $0x10a0] sm:$0xff]  ;;  %v1508_v34 = vmul.f32 %v2980_v14, %v708_v31 }
 0x14f   : > { %2252 = vst [vmem:[%s3009_s20 + $0xfd0] sm:$0xff] %v1484_v44  ;;  %2253 = vst [vmem:[%s3009_s20 + $0xfd8] sm:$0xff] %v1485_v45  ;;  %v1509_v35 = vmul.f32 %v2983_v16, %v709_v32  ;;  %v1510_v36 = vmul.f32 %v2986_v18, %v710_v33  ;;  %v711_v37 = vld [vmem:[%s2963_s25 + $0x10a8] sm:$0xff]  ;;  %v712_v38 = vld [vmem:[%s2963_s25 + $0x10b0] sm:$0xff] }
 0x150   : > { %2254 = vst [vmem:[%s3009_s20 + $0xfe0] sm:$0xff] %v1486_v46  ;;  %2255 = vst [vmem:[%s3009_s20 + $0xfe8] sm:$0xff] %v1487_v50  ;;  %v713_v39 = vld [vmem:[%s2963_s25 + $0x10b8] sm:$0xff]  ;;  %v1511_v40 = vmul.f32 %v2989_v20, %v711_v37  ;;  %v1512_v41 = vmul.f32 %v2975_v11, %v712_v38  ;;  %v714_v43 = vld [vmem:[%s2963_s25 + $0x10c0] sm:$0xff] }
 0x151   : > { %2256 = vst [vmem:[%s3009_s20 + $0xff0] sm:$0xff] %v1488_v51  ;;  %2257 = vst [vmem:[%s3009_s20 + $0xff8] sm:$0xff] %v1489_v52  ;;  %v1513_v42 = vmul.f32 %v2977_v12, %v713_v39  ;;  %v715_v44 = vld [vmem:[%s2963_s25 + $0x10c8] sm:$0xff]  ;;  %v716_v45 = vld [vmem:[%s2963_s25 + $0x10d0] sm:$0xff]  ;;  %v1514_v46 = vmul.f32 %v2980_v14, %v714_v43 }
 0x152   : > { %2258 = vst [vmem:[%s3009_s20 + $0x1000] sm:$0xff] %v1490_v56  ;;  %2259 = vst [vmem:[%s3009_s20 + $0x1008] sm:$0xff] %v1491_v57  ;;  %v1515_v47 = vmul.f32 %v2983_v16, %v715_v44  ;;  %v1516_v48 = vmul.f32 %v2986_v18, %v716_v45  ;;  %v717_v49 = vld [vmem:[%s2963_s25 + $0x10d8] sm:$0xff]  ;;  %v718_v50 = vld [vmem:[%s2963_s25 + $0x10e0] sm:$0xff] }
 0x153   : > { %2260 = vst [vmem:[%s3009_s20 + $0x1010] sm:$0xff] %v1492_v58  ;;  %2261 = vst [vmem:[%s3009_s20 + $0x1018] sm:$0xff] %v1493_v62  ;;  %v719_v51 = vld [vmem:[%s2963_s25 + $0x10e8] sm:$0xff]  ;;  %v1517_v52 = vmul.f32 %v2989_v20, %v717_v49  ;;  %v1518_v53 = vmul.f32 %v2975_v11, %v718_v50  ;;  %v720_v55 = vld [vmem:[%s2963_s25 + $0x10f0] sm:$0xff] }
 0x154   : > { %2262 = vst [vmem:[%s3009_s20 + $0x1020] sm:$0xff] %v1494_v63  ;;  %2263 = vst [vmem:[%s3009_s20 + $0x1028] sm:$0xff] %v1495_v0  ;;  %v1519_v54 = vmul.f32 %v2977_v12, %v719_v51  ;;  %v721_v56 = vld [vmem:[%s2963_s25 + $0x10f8] sm:$0xff]  ;;  %v722_v57 = vld [vmem:[%s2963_s25 + $0x1100] sm:$0xff]  ;;  %v1520_v58 = vmul.f32 %v2980_v14, %v720_v55 }
 0x155   : > { %2264 = vst [vmem:[%s3009_s20 + $0x1030] sm:$0xff] %v1496_v4  ;;  %2265 = vst [vmem:[%s3009_s20 + $0x1038] sm:$0xff] %v1497_v5  ;;  %v1521_v59 = vmul.f32 %v2983_v16, %v721_v56  ;;  %v1522_v60 = vmul.f32 %v2986_v18, %v722_v57  ;;  %v723_v61 = vld [vmem:[%s2963_s25 + $0x1108] sm:$0xff]  ;;  %v724_v62 = vld [vmem:[%s2963_s25 + $0x1110] sm:$0xff] }
 0x156   : > { %2266 = vst [vmem:[%s3009_s20 + $0x1040] sm:$0xff] %v1498_v6  ;;  %2267 = vst [vmem:[%s3009_s20 + $0x1048] sm:$0xff] %v1499_v10  ;;  %v725_v63 = vld [vmem:[%s2963_s25 + $0x1118] sm:$0xff]  ;;  %v1523_v0 = vmul.f32 %v2989_v20, %v723_v61  ;;  %v1524_v1 = vmul.f32 %v2975_v11, %v724_v62  ;;  %v726_v3 = vld [vmem:[%s2963_s25 + $0x1120] sm:$0xff] }
 0x157   : > { %2268 = vst [vmem:[%s3009_s20 + $0x1050] sm:$0xff] %v1500_v13  ;;  %2269 = vst [vmem:[%s3009_s20 + $0x1058] sm:$0xff] %v1501_v15  ;;  %v1525_v2 = vmul.f32 %v2977_v12, %v725_v63  ;;  %v727_v4 = vld [vmem:[%s2963_s25 + $0x1128] sm:$0xff]  ;;  %v728_v5 = vld [vmem:[%s2963_s25 + $0x1130] sm:$0xff]  ;;  %v1526_v6 = vmul.f32 %v2980_v14, %v726_v3 }
 0x158   : > { %2270 = vst [vmem:[%s3009_s20 + $0x1060] sm:$0xff] %v1502_v22  ;;  %2271 = vst [vmem:[%s3009_s20 + $0x1068] sm:$0xff] %v1503_v23  ;;  %v1527_v7 = vmul.f32 %v2983_v16, %v727_v4  ;;  %v1528_v8 = vmul.f32 %v2986_v18, %v728_v5  ;;  %v729_v9 = vld [vmem:[%s2963_s25 + $0x1138] sm:$0xff]  ;;  %v730_v10 = vld [vmem:[%s2963_s25 + $0x1140] sm:$0xff] }
 0x159   : > { %2272 = vst [vmem:[%s3009_s20 + $0x1070] sm:$0xff] %v1504_v24  ;;  %2273 = vst [vmem:[%s3009_s20 + $0x1078] sm:$0xff] %v1505_v28  ;;  %v731_v13 = vld [vmem:[%s2963_s25 + $0x1148] sm:$0xff]  ;;  %v1529_v15 = vmul.f32 %v2989_v20, %v729_v9  ;;  %v1530_v17 = vmul.f32 %v2975_v11, %v730_v10  ;;  %v732_v21 = vld [vmem:[%s2963_s25 + $0x1150] sm:$0xff] }
 0x15a   : > { %2274 = vst [vmem:[%s3009_s20 + $0x1080] sm:$0xff] %v1506_v29  ;;  %2275 = vst [vmem:[%s3009_s20 + $0x1088] sm:$0xff] %v1507_v30  ;;  %v1531_v19 = vmul.f32 %v2977_v12, %v731_v13  ;;  %v733_v22 = vld [vmem:[%s2963_s25 + $0x1158] sm:$0xff]  ;;  %v734_v23 = vld [vmem:[%s2963_s25 + $0x1160] sm:$0xff]  ;;  %v1532_v24 = vmul.f32 %v2980_v14, %v732_v21 }
 0x15b   : > { %2276 = vst [vmem:[%s3009_s20 + $0x1090] sm:$0xff] %v1508_v34  ;;  %2277 = vst [vmem:[%s3009_s20 + $0x1098] sm:$0xff] %v1509_v35  ;;  %v1533_v25 = vmul.f32 %v2983_v16, %v733_v22  ;;  %v1534_v26 = vmul.f32 %v2986_v18, %v734_v23  ;;  %v735_v27 = vld [vmem:[%s2963_s25 + $0x1168] sm:$0xff]  ;;  %v736_v28 = vld [vmem:[%s2963_s25 + $0x1170] sm:$0xff] }
 0x15c   : > { %2278 = vst [vmem:[%s3009_s20 + $0x10a0] sm:$0xff] %v1510_v36  ;;  %2279 = vst [vmem:[%s3009_s20 + $0x10a8] sm:$0xff] %v1511_v40  ;;  %v737_v29 = vld [vmem:[%s2963_s25 + $0x1178] sm:$0xff]  ;;  %v1535_v30 = vmul.f32 %v2989_v20, %v735_v27  ;;  %v1536_v31 = vmul.f32 %v2975_v11, %v736_v28  ;;  %v738_v33 = vld [vmem:[%s2963_s25 + $0x1180] sm:$0xff] }
 0x15d   : > { %2280 = vst [vmem:[%s3009_s20 + $0x10b0] sm:$0xff] %v1512_v41  ;;  %2281 = vst [vmem:[%s3009_s20 + $0x10b8] sm:$0xff] %v1513_v42  ;;  %v1537_v32 = vmul.f32 %v2977_v12, %v737_v29  ;;  %v739_v34 = vld [vmem:[%s2963_s25 + $0x1188] sm:$0xff]  ;;  %v740_v35 = vld [vmem:[%s2963_s25 + $0x1190] sm:$0xff]  ;;  %v1538_v36 = vmul.f32 %v2980_v14, %v738_v33 }
 0x15e   : > { %2282 = vst [vmem:[%s3009_s20 + $0x10c0] sm:$0xff] %v1514_v46  ;;  %2283 = vst [vmem:[%s3009_s20 + $0x10c8] sm:$0xff] %v1515_v47  ;;  %v1539_v37 = vmul.f32 %v2983_v16, %v739_v34  ;;  %v1540_v38 = vmul.f32 %v2986_v18, %v740_v35  ;;  %v741_v39 = vld [vmem:[%s2963_s25 + $0x1198] sm:$0xff]  ;;  %v742_v40 = vld [vmem:[%s2963_s25 + $0x11a0] sm:$0xff] }
 0x15f   : > { %2284 = vst [vmem:[%s3009_s20 + $0x10d0] sm:$0xff] %v1516_v48  ;;  %2285 = vst [vmem:[%s3009_s20 + $0x10d8] sm:$0xff] %v1517_v52  ;;  %v743_v41 = vld [vmem:[%s2963_s25 + $0x11a8] sm:$0xff]  ;;  %v1541_v42 = vmul.f32 %v2989_v20, %v741_v39  ;;  %v1542_v43 = vmul.f32 %v2975_v11, %v742_v40  ;;  %v744_v45 = vld [vmem:[%s2963_s25 + $0x11b0] sm:$0xff] }
 0x160   : > { %2286 = vst [vmem:[%s3009_s20 + $0x10e0] sm:$0xff] %v1518_v53  ;;  %2287 = vst [vmem:[%s3009_s20 + $0x10e8] sm:$0xff] %v1519_v54  ;;  %v1543_v44 = vmul.f32 %v2977_v12, %v743_v41  ;;  %v745_v46 = vld [vmem:[%s2963_s25 + $0x11b8] sm:$0xff]  ;;  %v746_v47 = vld [vmem:[%s2963_s25 + $0x11c0] sm:$0xff]  ;;  %v1544_v48 = vmul.f32 %v2980_v14, %v744_v45 }
 0x161   : > { %2288 = vst [vmem:[%s3009_s20 + $0x10f0] sm:$0xff] %v1520_v58  ;;  %2289 = vst [vmem:[%s3009_s20 + $0x10f8] sm:$0xff] %v1521_v59  ;;  %v1545_v49 = vmul.f32 %v2983_v16, %v745_v46  ;;  %v1546_v50 = vmul.f32 %v2986_v18, %v746_v47  ;;  %v747_v51 = vld [vmem:[%s2963_s25 + $0x11c8] sm:$0xff]  ;;  %v748_v52 = vld [vmem:[%s2963_s25 + $0x11d0] sm:$0xff] }
 0x162   : > { %2290 = vst [vmem:[%s3009_s20 + $0x1100] sm:$0xff] %v1522_v60  ;;  %2291 = vst [vmem:[%s3009_s20 + $0x1108] sm:$0xff] %v1523_v0  ;;  %v749_v53 = vld [vmem:[%s2963_s25 + $0x11d8] sm:$0xff]  ;;  %v1547_v54 = vmul.f32 %v2989_v20, %v747_v51  ;;  %v1548_v55 = vmul.f32 %v2975_v11, %v748_v52  ;;  %v750_v57 = vld [vmem:[%s2963_s25 + $0x11e0] sm:$0xff] }
 0x163   : > { %2292 = vst [vmem:[%s3009_s20 + $0x1110] sm:$0xff] %v1524_v1  ;;  %2293 = vst [vmem:[%s3009_s20 + $0x1118] sm:$0xff] %v1525_v2  ;;  %v1549_v56 = vmul.f32 %v2977_v12, %v749_v53  ;;  %v751_v58 = vld [vmem:[%s2963_s25 + $0x11e8] sm:$0xff]  ;;  %v752_v59 = vld [vmem:[%s2963_s25 + $0x11f0] sm:$0xff]  ;;  %v1550_v60 = vmul.f32 %v2980_v14, %v750_v57 }
 0x164   : > { %2294 = vst [vmem:[%s3009_s20 + $0x1120] sm:$0xff] %v1526_v6  ;;  %2295 = vst [vmem:[%s3009_s20 + $0x1128] sm:$0xff] %v1527_v7  ;;  %v1551_v61 = vmul.f32 %v2983_v16, %v751_v58  ;;  %v1552_v62 = vmul.f32 %v2986_v18, %v752_v59  ;;  %v753_v63 = vld [vmem:[%s2963_s25 + $0x11f8] sm:$0xff]  ;;  %v754_v0 = vld [vmem:[%s2963_s25 + $0x1200] sm:$0xff] }
 0x165   : > { %2296 = vst [vmem:[%s3009_s20 + $0x1130] sm:$0xff] %v1528_v8  ;;  %2297 = vst [vmem:[%s3009_s20 + $0x1138] sm:$0xff] %v1529_v15  ;;  %v755_v1 = vld [vmem:[%s2963_s25 + $0x1208] sm:$0xff]  ;;  %v1553_v2 = vmul.f32 %v2989_v20, %v753_v63  ;;  %v1554_v3 = vmul.f32 %v2975_v11, %v754_v0  ;;  %v756_v5 = vld [vmem:[%s2963_s25 + $0x1210] sm:$0xff] }
 0x166   : > { %2298 = vst [vmem:[%s3009_s20 + $0x1140] sm:$0xff] %v1530_v17  ;;  %2299 = vst [vmem:[%s3009_s20 + $0x1148] sm:$0xff] %v1531_v19  ;;  %v1555_v4 = vmul.f32 %v2977_v12, %v755_v1  ;;  %v757_v6 = vld [vmem:[%s2963_s25 + $0x1218] sm:$0xff]  ;;  %v758_v7 = vld [vmem:[%s2963_s25 + $0x1220] sm:$0xff]  ;;  %v1556_v8 = vmul.f32 %v2980_v14, %v756_v5 }
 0x167   : > { %2300 = vst [vmem:[%s3009_s20 + $0x1150] sm:$0xff] %v1532_v24  ;;  %2301 = vst [vmem:[%s3009_s20 + $0x1158] sm:$0xff] %v1533_v25  ;;  %v1557_v9 = vmul.f32 %v2983_v16, %v757_v6  ;;  %v1558_v10 = vmul.f32 %v2986_v18, %v758_v7  ;;  %v759_v13 = vld [vmem:[%s2963_s25 + $0x1228] sm:$0xff]  ;;  %v760_v15 = vld [vmem:[%s2963_s25 + $0x1230] sm:$0xff] }
 0x168   : > { %2302 = vst [vmem:[%s3009_s20 + $0x1160] sm:$0xff] %v1534_v26  ;;  %2303 = vst [vmem:[%s3009_s20 + $0x1168] sm:$0xff] %v1535_v30  ;;  %v761_v17 = vld [vmem:[%s2963_s25 + $0x1238] sm:$0xff]  ;;  %v1559_v19 = vmul.f32 %v2989_v20, %v759_v13  ;;  %v1560_v21 = vmul.f32 %v2975_v11, %v760_v15  ;;  %v762_v23 = vld [vmem:[%s2963_s25 + $0x1240] sm:$0xff] }
 0x169   : > { %2304 = vst [vmem:[%s3009_s20 + $0x1170] sm:$0xff] %v1536_v31  ;;  %2305 = vst [vmem:[%s3009_s20 + $0x1178] sm:$0xff] %v1537_v32  ;;  %v1561_v22 = vmul.f32 %v2977_v12, %v761_v17  ;;  %v763_v24 = vld [vmem:[%s2963_s25 + $0x1248] sm:$0xff]  ;;  %v764_v25 = vld [vmem:[%s2963_s25 + $0x1250] sm:$0xff]  ;;  %v1562_v26 = vmul.f32 %v2980_v14, %v762_v23 }
 0x16a   : > { %2306 = vst [vmem:[%s3009_s20 + $0x1180] sm:$0xff] %v1538_v36  ;;  %2307 = vst [vmem:[%s3009_s20 + $0x1188] sm:$0xff] %v1539_v37  ;;  %v1563_v27 = vmul.f32 %v2983_v16, %v763_v24  ;;  %v1564_v28 = vmul.f32 %v2986_v18, %v764_v25  ;;  %v765_v29 = vld [vmem:[%s2963_s25 + $0x1258] sm:$0xff]  ;;  %v766_v30 = vld [vmem:[%s2963_s25 + $0x1260] sm:$0xff] }
 0x16b   : > { %2308 = vst [vmem:[%s3009_s20 + $0x1190] sm:$0xff] %v1540_v38  ;;  %2309 = vst [vmem:[%s3009_s20 + $0x1198] sm:$0xff] %v1541_v42  ;;  %v767_v31 = vld [vmem:[%s2963_s25 + $0x1268] sm:$0xff]  ;;  %v1565_v32 = vmul.f32 %v2989_v20, %v765_v29  ;;  %v1566_v33 = vmul.f32 %v2975_v11, %v766_v30  ;;  %v768_v35 = vld [vmem:[%s2963_s25 + $0x1270] sm:$0xff] }
 0x16c   : > { %2310 = vst [vmem:[%s3009_s20 + $0x11a0] sm:$0xff] %v1542_v43  ;;  %2311 = vst [vmem:[%s3009_s20 + $0x11a8] sm:$0xff] %v1543_v44  ;;  %v1567_v34 = vmul.f32 %v2977_v12, %v767_v31  ;;  %v769_v36 = vld [vmem:[%s2963_s25 + $0x1278] sm:$0xff]  ;;  %v770_v37 = vld [vmem:[%s2963_s25 + $0x1280] sm:$0xff]  ;;  %v1568_v38 = vmul.f32 %v2980_v14, %v768_v35 }
 0x16d   : > { %2312 = vst [vmem:[%s3009_s20 + $0x11b0] sm:$0xff] %v1544_v48  ;;  %2313 = vst [vmem:[%s3009_s20 + $0x11b8] sm:$0xff] %v1545_v49  ;;  %v1569_v39 = vmul.f32 %v2983_v16, %v769_v36  ;;  %v1570_v40 = vmul.f32 %v2986_v18, %v770_v37  ;;  %v771_v41 = vld [vmem:[%s2963_s25 + $0x1288] sm:$0xff]  ;;  %v772_v42 = vld [vmem:[%s2963_s25 + $0x1290] sm:$0xff] }
 0x16e   : > { %2314 = vst [vmem:[%s3009_s20 + $0x11c0] sm:$0xff] %v1546_v50  ;;  %2315 = vst [vmem:[%s3009_s20 + $0x11c8] sm:$0xff] %v1547_v54  ;;  %v773_v43 = vld [vmem:[%s2963_s25 + $0x1298] sm:$0xff]  ;;  %v1571_v44 = vmul.f32 %v2989_v20, %v771_v41  ;;  %v1572_v45 = vmul.f32 %v2975_v11, %v772_v42  ;;  %v774_v47 = vld [vmem:[%s2963_s25 + $0x12a0] sm:$0xff] }
 0x16f   : > { %2316 = vst [vmem:[%s3009_s20 + $0x11d0] sm:$0xff] %v1548_v55  ;;  %2317 = vst [vmem:[%s3009_s20 + $0x11d8] sm:$0xff] %v1549_v56  ;;  %v1573_v46 = vmul.f32 %v2977_v12, %v773_v43  ;;  %v775_v48 = vld [vmem:[%s2963_s25 + $0x12a8] sm:$0xff]  ;;  %v776_v49 = vld [vmem:[%s2963_s25 + $0x12b0] sm:$0xff]  ;;  %v1574_v50 = vmul.f32 %v2980_v14, %v774_v47 }
 0x170   : > { %2318 = vst [vmem:[%s3009_s20 + $0x11e0] sm:$0xff] %v1550_v60  ;;  %2319 = vst [vmem:[%s3009_s20 + $0x11e8] sm:$0xff] %v1551_v61  ;;  %v1575_v51 = vmul.f32 %v2983_v16, %v775_v48  ;;  %v1576_v52 = vmul.f32 %v2986_v18, %v776_v49  ;;  %v777_v53 = vld [vmem:[%s2963_s25 + $0x12b8] sm:$0xff]  ;;  %v778_v54 = vld [vmem:[%s2963_s25 + $0x12c0] sm:$0xff] }
 0x171   : > { %2320 = vst [vmem:[%s3009_s20 + $0x11f0] sm:$0xff] %v1552_v62  ;;  %2321 = vst [vmem:[%s3009_s20 + $0x11f8] sm:$0xff] %v1553_v2  ;;  %v779_v55 = vld [vmem:[%s2963_s25 + $0x12c8] sm:$0xff]  ;;  %v1577_v56 = vmul.f32 %v2989_v20, %v777_v53  ;;  %v1578_v57 = vmul.f32 %v2975_v11, %v778_v54  ;;  %v780_v59 = vld [vmem:[%s2963_s25 + $0x12d0] sm:$0xff] }
 0x172   : > { %2322 = vst [vmem:[%s3009_s20 + $0x1200] sm:$0xff] %v1554_v3  ;;  %2323 = vst [vmem:[%s3009_s20 + $0x1208] sm:$0xff] %v1555_v4  ;;  %v1579_v58 = vmul.f32 %v2977_v12, %v779_v55  ;;  %v781_v60 = vld [vmem:[%s2963_s25 + $0x12d8] sm:$0xff]  ;;  %v782_v61 = vld [vmem:[%s2963_s25 + $0x12e0] sm:$0xff]  ;;  %v1580_v62 = vmul.f32 %v2980_v14, %v780_v59 }
 0x173   : > { %2324 = vst [vmem:[%s3009_s20 + $0x1210] sm:$0xff] %v1556_v8  ;;  %2325 = vst [vmem:[%s3009_s20 + $0x1218] sm:$0xff] %v1557_v9  ;;  %v1581_v63 = vmul.f32 %v2983_v16, %v781_v60  ;;  %v1582_v0 = vmul.f32 %v2986_v18, %v782_v61  ;;  %v783_v1 = vld [vmem:[%s2963_s25 + $0x12e8] sm:$0xff]  ;;  %v784_v2 = vld [vmem:[%s2963_s25 + $0x12f0] sm:$0xff] }
 0x174   : > { %2326 = vst [vmem:[%s3009_s20 + $0x1220] sm:$0xff] %v1558_v10  ;;  %2327 = vst [vmem:[%s3009_s20 + $0x1228] sm:$0xff] %v1559_v19  ;;  %v785_v3 = vld [vmem:[%s2963_s25 + $0x12f8] sm:$0xff]  ;;  %v1583_v4 = vmul.f32 %v2989_v20, %v783_v1  ;;  %v1584_v5 = vmul.f32 %v2975_v11, %v784_v2  ;;  %v786_v7 = vld [vmem:[%s2963_s25 + $0x1300] sm:$0xff] }
 0x175   : > { %2328 = vst [vmem:[%s3009_s20 + $0x1230] sm:$0xff] %v1560_v21  ;;  %2329 = vst [vmem:[%s3009_s20 + $0x1238] sm:$0xff] %v1561_v22  ;;  %v1585_v6 = vmul.f32 %v2977_v12, %v785_v3  ;;  %v787_v8 = vld [vmem:[%s2963_s25 + $0x1308] sm:$0xff]  ;;  %v788_v9 = vld [vmem:[%s2963_s25 + $0x1310] sm:$0xff]  ;;  %v1586_v10 = vmul.f32 %v2980_v14, %v786_v7 }
 0x176   : > { %2330 = vst [vmem:[%s3009_s20 + $0x1240] sm:$0xff] %v1562_v26  ;;  %2331 = vst [vmem:[%s3009_s20 + $0x1248] sm:$0xff] %v1563_v27  ;;  %v1587_v13 = vmul.f32 %v2983_v16, %v787_v8  ;;  %v1588_v15 = vmul.f32 %v2986_v18, %v788_v9  ;;  %v789_v17 = vld [vmem:[%s2963_s25 + $0x1318] sm:$0xff]  ;;  %v790_v19 = vld [vmem:[%s2963_s25 + $0x1320] sm:$0xff] }
 0x177   : > { %2332 = vst [vmem:[%s3009_s20 + $0x1250] sm:$0xff] %v1564_v28  ;;  %2333 = vst [vmem:[%s3009_s20 + $0x1258] sm:$0xff] %v1565_v32  ;;  %v791_v21 = vld [vmem:[%s2963_s25 + $0x1328] sm:$0xff]  ;;  %v1589_v22 = vmul.f32 %v2989_v20, %v789_v17  ;;  %v1590_v23 = vmul.f32 %v2975_v11, %v790_v19  ;;  %v792_v25 = vld [vmem:[%s2963_s25 + $0x1330] sm:$0xff] }
 0x178   : > { %2334 = vst [vmem:[%s3009_s20 + $0x1260] sm:$0xff] %v1566_v33  ;;  %2335 = vst [vmem:[%s3009_s20 + $0x1268] sm:$0xff] %v1567_v34  ;;  %v1591_v24 = vmul.f32 %v2977_v12, %v791_v21  ;;  %v793_v26 = vld [vmem:[%s2963_s25 + $0x1338] sm:$0xff]  ;;  %v794_v27 = vld [vmem:[%s2963_s25 + $0x1340] sm:$0xff]  ;;  %v1592_v28 = vmul.f32 %v2980_v14, %v792_v25 }
 0x179   : > { %2336 = vst [vmem:[%s3009_s20 + $0x1270] sm:$0xff] %v1568_v38  ;;  %2337 = vst [vmem:[%s3009_s20 + $0x1278] sm:$0xff] %v1569_v39  ;;  %v1593_v29 = vmul.f32 %v2983_v16, %v793_v26  ;;  %v1594_v30 = vmul.f32 %v2986_v18, %v794_v27  ;;  %v795_v31 = vld [vmem:[%s2963_s25 + $0x1348] sm:$0xff]  ;;  %v796_v32 = vld [vmem:[%s2963_s25 + $0x1350] sm:$0xff] }
 0x17a   : > { %2338 = vst [vmem:[%s3009_s20 + $0x1280] sm:$0xff] %v1570_v40  ;;  %2339 = vst [vmem:[%s3009_s20 + $0x1288] sm:$0xff] %v1571_v44  ;;  %v797_v33 = vld [vmem:[%s2963_s25 + $0x1358] sm:$0xff]  ;;  %v1595_v34 = vmul.f32 %v2989_v20, %v795_v31  ;;  %v1596_v35 = vmul.f32 %v2975_v11, %v796_v32  ;;  %v798_v37 = vld [vmem:[%s2963_s25 + $0x1360] sm:$0xff] }
 0x17b   : > { %2340 = vst [vmem:[%s3009_s20 + $0x1290] sm:$0xff] %v1572_v45  ;;  %2341 = vst [vmem:[%s3009_s20 + $0x1298] sm:$0xff] %v1573_v46  ;;  %v1597_v36 = vmul.f32 %v2977_v12, %v797_v33  ;;  %v799_v38 = vld [vmem:[%s2963_s25 + $0x1368] sm:$0xff]  ;;  %v800_v39 = vld [vmem:[%s2963_s25 + $0x1370] sm:$0xff]  ;;  %v1598_v40 = vmul.f32 %v2980_v14, %v798_v37 }
 0x17c   : > { %2342 = vst [vmem:[%s3009_s20 + $0x12a0] sm:$0xff] %v1574_v50  ;;  %2343 = vst [vmem:[%s3009_s20 + $0x12a8] sm:$0xff] %v1575_v51  ;;  %v1599_v41 = vmul.f32 %v2983_v16, %v799_v38  ;;  %v1600_v42 = vmul.f32 %v2986_v18, %v800_v39  ;;  %v801_v43 = vld [vmem:[%s2963_s25 + $0x1378] sm:$0xff]  ;;  %v802_v44 = vld [vmem:[%s2963_s25 + $0x1380] sm:$0xff] }
 0x17d   : > { %2344 = vst [vmem:[%s3009_s20 + $0x12b0] sm:$0xff] %v1576_v52  ;;  %2345 = vst [vmem:[%s3009_s20 + $0x12b8] sm:$0xff] %v1577_v56  ;;  %v803_v45 = vld [vmem:[%s2963_s25 + $0x1388] sm:$0xff]  ;;  %v1601_v46 = vmul.f32 %v2989_v20, %v801_v43  ;;  %v1602_v47 = vmul.f32 %v2975_v11, %v802_v44  ;;  %v804_v49 = vld [vmem:[%s2963_s25 + $0x1390] sm:$0xff] }
 0x17e   : > { %2346 = vst [vmem:[%s3009_s20 + $0x12c0] sm:$0xff] %v1578_v57  ;;  %2347 = vst [vmem:[%s3009_s20 + $0x12c8] sm:$0xff] %v1579_v58  ;;  %v1603_v48 = vmul.f32 %v2977_v12, %v803_v45  ;;  %v805_v50 = vld [vmem:[%s2963_s25 + $0x1398] sm:$0xff]  ;;  %v806_v51 = vld [vmem:[%s2963_s25 + $0x13a0] sm:$0xff]  ;;  %v1604_v52 = vmul.f32 %v2980_v14, %v804_v49 }
 0x17f   : > { %2348 = vst [vmem:[%s3009_s20 + $0x12d0] sm:$0xff] %v1580_v62  ;;  %2349 = vst [vmem:[%s3009_s20 + $0x12d8] sm:$0xff] %v1581_v63  ;;  %v1605_v53 = vmul.f32 %v2983_v16, %v805_v50  ;;  %v1606_v54 = vmul.f32 %v2986_v18, %v806_v51  ;;  %v807_v55 = vld [vmem:[%s2963_s25 + $0x13a8] sm:$0xff]  ;;  %v808_v56 = vld [vmem:[%s2963_s25 + $0x13b0] sm:$0xff] }
 0x180   : > { %2350 = vst [vmem:[%s3009_s20 + $0x12e0] sm:$0xff] %v1582_v0  ;;  %2351 = vst [vmem:[%s3009_s20 + $0x12e8] sm:$0xff] %v1583_v4  ;;  %v809_v57 = vld [vmem:[%s2963_s25 + $0x13b8] sm:$0xff]  ;;  %v1607_v58 = vmul.f32 %v2989_v20, %v807_v55  ;;  %v1608_v59 = vmul.f32 %v2975_v11, %v808_v56  ;;  %v810_v61 = vld [vmem:[%s2963_s25 + $0x13c0] sm:$0xff] }
 0x181   : > { %2352 = vst [vmem:[%s3009_s20 + $0x12f0] sm:$0xff] %v1584_v5  ;;  %2353 = vst [vmem:[%s3009_s20 + $0x12f8] sm:$0xff] %v1585_v6  ;;  %v1609_v60 = vmul.f32 %v2977_v12, %v809_v57  ;;  %v811_v62 = vld [vmem:[%s2963_s25 + $0x13c8] sm:$0xff]  ;;  %v812_v63 = vld [vmem:[%s2963_s25 + $0x13d0] sm:$0xff]  ;;  %v1610_v0 = vmul.f32 %v2980_v14, %v810_v61 }
 0x182   : > { %2354 = vst [vmem:[%s3009_s20 + $0x1300] sm:$0xff] %v1586_v10  ;;  %2355 = vst [vmem:[%s3009_s20 + $0x1308] sm:$0xff] %v1587_v13  ;;  %v1611_v1 = vmul.f32 %v2983_v16, %v811_v62  ;;  %v1612_v2 = vmul.f32 %v2986_v18, %v812_v63  ;;  %v813_v3 = vld [vmem:[%s2963_s25 + $0x13d8] sm:$0xff]  ;;  %v814_v4 = vld [vmem:[%s2963_s25 + $0x13e0] sm:$0xff] }
 0x183   : > { %2356 = vst [vmem:[%s3009_s20 + $0x1310] sm:$0xff] %v1588_v15  ;;  %2357 = vst [vmem:[%s3009_s20 + $0x1318] sm:$0xff] %v1589_v22  ;;  %v815_v5 = vld [vmem:[%s2963_s25 + $0x13e8] sm:$0xff]  ;;  %v1613_v6 = vmul.f32 %v2989_v20, %v813_v3  ;;  %v1614_v7 = vmul.f32 %v2975_v11, %v814_v4  ;;  %v816_v9 = vld [vmem:[%s2963_s25 + $0x13f0] sm:$0xff] }
 0x184   : > { %2358 = vst [vmem:[%s3009_s20 + $0x1320] sm:$0xff] %v1590_v23  ;;  %2359 = vst [vmem:[%s3009_s20 + $0x1328] sm:$0xff] %v1591_v24  ;;  %v1615_v8 = vmul.f32 %v2977_v12, %v815_v5  ;;  %v817_v10 = vld [vmem:[%s2963_s25 + $0x13f8] sm:$0xff]  ;;  %v818_v13 = vld [vmem:[%s2963_s25 + $0x1400] sm:$0xff]  ;;  %v1616_v15 = vmul.f32 %v2980_v14, %v816_v9 }
 0x185   : > { %2360 = vst [vmem:[%s3009_s20 + $0x1330] sm:$0xff] %v1592_v28  ;;  %2361 = vst [vmem:[%s3009_s20 + $0x1338] sm:$0xff] %v1593_v29  ;;  %v1617_v17 = vmul.f32 %v2983_v16, %v817_v10  ;;  %v1618_v19 = vmul.f32 %v2986_v18, %v818_v13  ;;  %v819_v21 = vld [vmem:[%s2963_s25 + $0x1408] sm:$0xff]  ;;  %v820_v22 = vld [vmem:[%s2963_s25 + $0x1410] sm:$0xff] }
 0x186   : > { %2362 = vst [vmem:[%s3009_s20 + $0x1340] sm:$0xff] %v1594_v30  ;;  %2363 = vst [vmem:[%s3009_s20 + $0x1348] sm:$0xff] %v1595_v34  ;;  %v821_v23 = vld [vmem:[%s2963_s25 + $0x1418] sm:$0xff]  ;;  %v1619_v24 = vmul.f32 %v2989_v20, %v819_v21  ;;  %v1620_v25 = vmul.f32 %v2975_v11, %v820_v22  ;;  %v822_v27 = vld [vmem:[%s2963_s25 + $0x1420] sm:$0xff] }
 0x187   : > { %2364 = vst [vmem:[%s3009_s20 + $0x1350] sm:$0xff] %v1596_v35  ;;  %2365 = vst [vmem:[%s3009_s20 + $0x1358] sm:$0xff] %v1597_v36  ;;  %v1621_v26 = vmul.f32 %v2977_v12, %v821_v23  ;;  %v823_v28 = vld [vmem:[%s2963_s25 + $0x1428] sm:$0xff]  ;;  %v824_v29 = vld [vmem:[%s2963_s25 + $0x1430] sm:$0xff]  ;;  %v1622_v30 = vmul.f32 %v2980_v14, %v822_v27 }
 0x188   : > { %2366 = vst [vmem:[%s3009_s20 + $0x1360] sm:$0xff] %v1598_v40  ;;  %2367 = vst [vmem:[%s3009_s20 + $0x1368] sm:$0xff] %v1599_v41  ;;  %v1623_v31 = vmul.f32 %v2983_v16, %v823_v28  ;;  %v1624_v32 = vmul.f32 %v2986_v18, %v824_v29  ;;  %v825_v33 = vld [vmem:[%s2963_s25 + $0x1438] sm:$0xff]  ;;  %v826_v34 = vld [vmem:[%s2963_s25 + $0x1440] sm:$0xff] }
 0x189   : > { %2368 = vst [vmem:[%s3009_s20 + $0x1370] sm:$0xff] %v1600_v42  ;;  %2369 = vst [vmem:[%s3009_s20 + $0x1378] sm:$0xff] %v1601_v46  ;;  %v827_v35 = vld [vmem:[%s2963_s25 + $0x1448] sm:$0xff]  ;;  %v1625_v36 = vmul.f32 %v2989_v20, %v825_v33  ;;  %v1626_v37 = vmul.f32 %v2975_v11, %v826_v34  ;;  %v828_v39 = vld [vmem:[%s2963_s25 + $0x1450] sm:$0xff] }
 0x18a   : > { %2370 = vst [vmem:[%s3009_s20 + $0x1380] sm:$0xff] %v1602_v47  ;;  %2371 = vst [vmem:[%s3009_s20 + $0x1388] sm:$0xff] %v1603_v48  ;;  %v1627_v38 = vmul.f32 %v2977_v12, %v827_v35  ;;  %v829_v40 = vld [vmem:[%s2963_s25 + $0x1458] sm:$0xff]  ;;  %v830_v41 = vld [vmem:[%s2963_s25 + $0x1460] sm:$0xff]  ;;  %v1628_v42 = vmul.f32 %v2980_v14, %v828_v39 }
 0x18b   : > { %2372 = vst [vmem:[%s3009_s20 + $0x1390] sm:$0xff] %v1604_v52  ;;  %2373 = vst [vmem:[%s3009_s20 + $0x1398] sm:$0xff] %v1605_v53  ;;  %v1629_v43 = vmul.f32 %v2983_v16, %v829_v40  ;;  %v1630_v44 = vmul.f32 %v2986_v18, %v830_v41  ;;  %v831_v45 = vld [vmem:[%s2963_s25 + $0x1468] sm:$0xff]  ;;  %v832_v46 = vld [vmem:[%s2963_s25 + $0x1470] sm:$0xff] }
 0x18c   : > { %2374 = vst [vmem:[%s3009_s20 + $0x13a0] sm:$0xff] %v1606_v54  ;;  %2375 = vst [vmem:[%s3009_s20 + $0x13a8] sm:$0xff] %v1607_v58  ;;  %v833_v47 = vld [vmem:[%s2963_s25 + $0x1478] sm:$0xff]  ;;  %v1631_v48 = vmul.f32 %v2989_v20, %v831_v45  ;;  %v1632_v49 = vmul.f32 %v2975_v11, %v832_v46  ;;  %v834_v51 = vld [vmem:[%s2963_s25 + $0x1480] sm:$0xff] }
 0x18d   : > { %2376 = vst [vmem:[%s3009_s20 + $0x13b0] sm:$0xff] %v1608_v59  ;;  %2377 = vst [vmem:[%s3009_s20 + $0x13b8] sm:$0xff] %v1609_v60  ;;  %v1633_v50 = vmul.f32 %v2977_v12, %v833_v47  ;;  %v835_v52 = vld [vmem:[%s2963_s25 + $0x1488] sm:$0xff]  ;;  %v836_v53 = vld [vmem:[%s2963_s25 + $0x1490] sm:$0xff]  ;;  %v1634_v54 = vmul.f32 %v2980_v14, %v834_v51 }
 0x18e   : > { %2378 = vst [vmem:[%s3009_s20 + $0x13c0] sm:$0xff] %v1610_v0  ;;  %2379 = vst [vmem:[%s3009_s20 + $0x13c8] sm:$0xff] %v1611_v1  ;;  %v1635_v55 = vmul.f32 %v2983_v16, %v835_v52  ;;  %v1636_v56 = vmul.f32 %v2986_v18, %v836_v53  ;;  %v837_v57 = vld [vmem:[%s2963_s25 + $0x1498] sm:$0xff]  ;;  %v838_v58 = vld [vmem:[%s2963_s25 + $0x14a0] sm:$0xff] }
 0x18f   : > { %2380 = vst [vmem:[%s3009_s20 + $0x13d0] sm:$0xff] %v1612_v2  ;;  %2381 = vst [vmem:[%s3009_s20 + $0x13d8] sm:$0xff] %v1613_v6  ;;  %v839_v59 = vld [vmem:[%s2963_s25 + $0x14a8] sm:$0xff]  ;;  %v1637_v60 = vmul.f32 %v2989_v20, %v837_v57  ;;  %v1638_v61 = vmul.f32 %v2975_v11, %v838_v58  ;;  %v840_v63 = vld [vmem:[%s2963_s25 + $0x14b0] sm:$0xff] }
 0x190   : > { %2382 = vst [vmem:[%s3009_s20 + $0x13e0] sm:$0xff] %v1614_v7  ;;  %2383 = vst [vmem:[%s3009_s20 + $0x13e8] sm:$0xff] %v1615_v8  ;;  %v1639_v62 = vmul.f32 %v2977_v12, %v839_v59  ;;  %v841_v0 = vld [vmem:[%s2963_s25 + $0x14b8] sm:$0xff]  ;;  %v842_v1 = vld [vmem:[%s2963_s25 + $0x14c0] sm:$0xff]  ;;  %v1640_v2 = vmul.f32 %v2980_v14, %v840_v63 }
 0x191   : > { %2384 = vst [vmem:[%s3009_s20 + $0x13f0] sm:$0xff] %v1616_v15  ;;  %2385 = vst [vmem:[%s3009_s20 + $0x13f8] sm:$0xff] %v1617_v17  ;;  %v1641_v3 = vmul.f32 %v2983_v16, %v841_v0  ;;  %v1642_v4 = vmul.f32 %v2986_v18, %v842_v1  ;;  %v843_v5 = vld [vmem:[%s2963_s25 + $0x14c8] sm:$0xff]  ;;  %v844_v6 = vld [vmem:[%s2963_s25 + $0x14d0] sm:$0xff] }
 0x192   : > { %2386 = vst [vmem:[%s3009_s20 + $0x1400] sm:$0xff] %v1618_v19  ;;  %2387 = vst [vmem:[%s3009_s20 + $0x1408] sm:$0xff] %v1619_v24  ;;  %v845_v7 = vld [vmem:[%s2963_s25 + $0x14d8] sm:$0xff]  ;;  %v1643_v8 = vmul.f32 %v2989_v20, %v843_v5  ;;  %v1644_v9 = vmul.f32 %v2975_v11, %v844_v6  ;;  %v846_v13 = vld [vmem:[%s2963_s25 + $0x14e0] sm:$0xff] }
 0x193   : > { %2388 = vst [vmem:[%s3009_s20 + $0x1410] sm:$0xff] %v1620_v25  ;;  %2389 = vst [vmem:[%s3009_s20 + $0x1418] sm:$0xff] %v1621_v26  ;;  %v1645_v10 = vmul.f32 %v2977_v12, %v845_v7  ;;  %v847_v15 = vld [vmem:[%s2963_s25 + $0x14e8] sm:$0xff]  ;;  %v848_v17 = vld [vmem:[%s2963_s25 + $0x14f0] sm:$0xff]  ;;  %v1646_v19 = vmul.f32 %v2980_v14, %v846_v13 }
 0x194   : > { %2390 = vst [vmem:[%s3009_s20 + $0x1420] sm:$0xff] %v1622_v30  ;;  %2391 = vst [vmem:[%s3009_s20 + $0x1428] sm:$0xff] %v1623_v31  ;;  %v1647_v21 = vmul.f32 %v2983_v16, %v847_v15  ;;  %v1648_v22 = vmul.f32 %v2986_v18, %v848_v17  ;;  %v849_v23 = vld [vmem:[%s2963_s25 + $0x14f8] sm:$0xff]  ;;  %v850_v24 = vld [vmem:[%s2963_s25 + $0x1500] sm:$0xff] }
 0x195   : > { %2392 = vst [vmem:[%s3009_s20 + $0x1430] sm:$0xff] %v1624_v32  ;;  %2393 = vst [vmem:[%s3009_s20 + $0x1438] sm:$0xff] %v1625_v36  ;;  %v851_v25 = vld [vmem:[%s2963_s25 + $0x1508] sm:$0xff]  ;;  %v1649_v26 = vmul.f32 %v2989_v20, %v849_v23  ;;  %v1650_v27 = vmul.f32 %v2975_v11, %v850_v24  ;;  %v852_v29 = vld [vmem:[%s2963_s25 + $0x1510] sm:$0xff] }
 0x196   : > { %2394 = vst [vmem:[%s3009_s20 + $0x1440] sm:$0xff] %v1626_v37  ;;  %2395 = vst [vmem:[%s3009_s20 + $0x1448] sm:$0xff] %v1627_v38  ;;  %v1651_v28 = vmul.f32 %v2977_v12, %v851_v25  ;;  %v853_v30 = vld [vmem:[%s2963_s25 + $0x1518] sm:$0xff]  ;;  %v854_v31 = vld [vmem:[%s2963_s25 + $0x1520] sm:$0xff]  ;;  %v1652_v32 = vmul.f32 %v2980_v14, %v852_v29 }
 0x197   : > { %2396 = vst [vmem:[%s3009_s20 + $0x1450] sm:$0xff] %v1628_v42  ;;  %2397 = vst [vmem:[%s3009_s20 + $0x1458] sm:$0xff] %v1629_v43  ;;  %v1653_v33 = vmul.f32 %v2983_v16, %v853_v30  ;;  %v1654_v34 = vmul.f32 %v2986_v18, %v854_v31  ;;  %v855_v35 = vld [vmem:[%s2963_s25 + $0x1528] sm:$0xff]  ;;  %v856_v36 = vld [vmem:[%s2963_s25 + $0x1530] sm:$0xff] }
 0x198   : > { %2398 = vst [vmem:[%s3009_s20 + $0x1460] sm:$0xff] %v1630_v44  ;;  %2399 = vst [vmem:[%s3009_s20 + $0x1468] sm:$0xff] %v1631_v48  ;;  %v857_v37 = vld [vmem:[%s2963_s25 + $0x1538] sm:$0xff]  ;;  %v1655_v38 = vmul.f32 %v2989_v20, %v855_v35  ;;  %v1656_v39 = vmul.f32 %v2975_v11, %v856_v36  ;;  %v858_v41 = vld [vmem:[%s2963_s25 + $0x1540] sm:$0xff] }
 0x199   : > { %2400 = vst [vmem:[%s3009_s20 + $0x1470] sm:$0xff] %v1632_v49  ;;  %2401 = vst [vmem:[%s3009_s20 + $0x1478] sm:$0xff] %v1633_v50  ;;  %v1657_v40 = vmul.f32 %v2977_v12, %v857_v37  ;;  %v859_v42 = vld [vmem:[%s2963_s25 + $0x1548] sm:$0xff]  ;;  %v860_v43 = vld [vmem:[%s2963_s25 + $0x1550] sm:$0xff]  ;;  %v1658_v44 = vmul.f32 %v2980_v14, %v858_v41 }
 0x19a   : > { %2402 = vst [vmem:[%s3009_s20 + $0x1480] sm:$0xff] %v1634_v54  ;;  %2403 = vst [vmem:[%s3009_s20 + $0x1488] sm:$0xff] %v1635_v55  ;;  %v1659_v45 = vmul.f32 %v2983_v16, %v859_v42  ;;  %v1660_v46 = vmul.f32 %v2986_v18, %v860_v43  ;;  %v861_v47 = vld [vmem:[%s2963_s25 + $0x1558] sm:$0xff]  ;;  %v862_v48 = vld [vmem:[%s2963_s25 + $0x1560] sm:$0xff] }
 0x19b   : > { %2404 = vst [vmem:[%s3009_s20 + $0x1490] sm:$0xff] %v1636_v56  ;;  %2405 = vst [vmem:[%s3009_s20 + $0x1498] sm:$0xff] %v1637_v60  ;;  %v863_v49 = vld [vmem:[%s2963_s25 + $0x1568] sm:$0xff]  ;;  %v1661_v50 = vmul.f32 %v2989_v20, %v861_v47  ;;  %v1662_v51 = vmul.f32 %v2975_v11, %v862_v48  ;;  %v864_v53 = vld [vmem:[%s2963_s25 + $0x1570] sm:$0xff] }
 0x19c   : > { %2406 = vst [vmem:[%s3009_s20 + $0x14a0] sm:$0xff] %v1638_v61  ;;  %2407 = vst [vmem:[%s3009_s20 + $0x14a8] sm:$0xff] %v1639_v62  ;;  %v1663_v52 = vmul.f32 %v2977_v12, %v863_v49  ;;  %v865_v54 = vld [vmem:[%s2963_s25 + $0x1578] sm:$0xff]  ;;  %v866_v55 = vld [vmem:[%s2963_s25 + $0x1580] sm:$0xff]  ;;  %v1664_v56 = vmul.f32 %v2980_v14, %v864_v53 }
 0x19d   : > { %2408 = vst [vmem:[%s3009_s20 + $0x14b0] sm:$0xff] %v1640_v2  ;;  %2409 = vst [vmem:[%s3009_s20 + $0x14b8] sm:$0xff] %v1641_v3  ;;  %v1665_v57 = vmul.f32 %v2983_v16, %v865_v54  ;;  %v1666_v58 = vmul.f32 %v2986_v18, %v866_v55  ;;  %v867_v59 = vld [vmem:[%s2963_s25 + $0x1588] sm:$0xff]  ;;  %v868_v60 = vld [vmem:[%s2963_s25 + $0x1590] sm:$0xff] }
 0x19e   : > { %2410 = vst [vmem:[%s3009_s20 + $0x14c0] sm:$0xff] %v1642_v4  ;;  %2411 = vst [vmem:[%s3009_s20 + $0x14c8] sm:$0xff] %v1643_v8  ;;  %v869_v61 = vld [vmem:[%s2963_s25 + $0x1598] sm:$0xff]  ;;  %v1667_v62 = vmul.f32 %v2989_v20, %v867_v59  ;;  %v1668_v63 = vmul.f32 %v2975_v11, %v868_v60  ;;  %v870_v1 = vld [vmem:[%s2963_s25 + $0x15a0] sm:$0xff] }
 0x19f   : > { %2412 = vst [vmem:[%s3009_s20 + $0x14d0] sm:$0xff] %v1644_v9  ;;  %2413 = vst [vmem:[%s3009_s20 + $0x14d8] sm:$0xff] %v1645_v10  ;;  %v1669_v0 = vmul.f32 %v2977_v12, %v869_v61  ;;  %v871_v2 = vld [vmem:[%s2963_s25 + $0x15a8] sm:$0xff]  ;;  %v872_v3 = vld [vmem:[%s2963_s25 + $0x15b0] sm:$0xff]  ;;  %v1670_v4 = vmul.f32 %v2980_v14, %v870_v1 }
 0x1a0   : > { %2414 = vst [vmem:[%s3009_s20 + $0x14e0] sm:$0xff] %v1646_v19  ;;  %2415 = vst [vmem:[%s3009_s20 + $0x14e8] sm:$0xff] %v1647_v21  ;;  %v1671_v5 = vmul.f32 %v2983_v16, %v871_v2  ;;  %v1672_v6 = vmul.f32 %v2986_v18, %v872_v3  ;;  %v873_v7 = vld [vmem:[%s2963_s25 + $0x15b8] sm:$0xff]  ;;  %v874_v8 = vld [vmem:[%s2963_s25 + $0x15c0] sm:$0xff] }
 0x1a1   : > { %2416 = vst [vmem:[%s3009_s20 + $0x14f0] sm:$0xff] %v1648_v22  ;;  %2417 = vst [vmem:[%s3009_s20 + $0x14f8] sm:$0xff] %v1649_v26  ;;  %v875_v9 = vld [vmem:[%s2963_s25 + $0x15c8] sm:$0xff]  ;;  %v1673_v10 = vmul.f32 %v2989_v20, %v873_v7  ;;  %v1674_v13 = vmul.f32 %v2975_v11, %v874_v8  ;;  %v876_v17 = vld [vmem:[%s2963_s25 + $0x15d0] sm:$0xff] }
 0x1a2   : > { %2418 = vst [vmem:[%s3009_s20 + $0x1500] sm:$0xff] %v1650_v27  ;;  %2419 = vst [vmem:[%s3009_s20 + $0x1508] sm:$0xff] %v1651_v28  ;;  %v1675_v15 = vmul.f32 %v2977_v12, %v875_v9  ;;  %v877_v19 = vld [vmem:[%s2963_s25 + $0x15d8] sm:$0xff]  ;;  %v878_v21 = vld [vmem:[%s2963_s25 + $0x15e0] sm:$0xff]  ;;  %v1676_v22 = vmul.f32 %v2980_v14, %v876_v17 }
 0x1a3   : > { %2420 = vst [vmem:[%s3009_s20 + $0x1510] sm:$0xff] %v1652_v32  ;;  %2421 = vst [vmem:[%s3009_s20 + $0x1518] sm:$0xff] %v1653_v33  ;;  %v1677_v23 = vmul.f32 %v2983_v16, %v877_v19  ;;  %v1678_v24 = vmul.f32 %v2986_v18, %v878_v21  ;;  %v879_v25 = vld [vmem:[%s2963_s25 + $0x15e8] sm:$0xff]  ;;  %v880_v26 = vld [vmem:[%s2963_s25 + $0x15f0] sm:$0xff] }
 0x1a4   : > { %2422 = vst [vmem:[%s3009_s20 + $0x1520] sm:$0xff] %v1654_v34  ;;  %2423 = vst [vmem:[%s3009_s20 + $0x1528] sm:$0xff] %v1655_v38  ;;  %v881_v27 = vld [vmem:[%s2963_s25 + $0x15f8] sm:$0xff]  ;;  %v1679_v28 = vmul.f32 %v2989_v20, %v879_v25  ;;  %v1680_v29 = vmul.f32 %v2975_v11, %v880_v26  ;;  %v882_v31 = vld [vmem:[%s2963_s25 + $0x1600] sm:$0xff] }
 0x1a5   : > { %2424 = vst [vmem:[%s3009_s20 + $0x1530] sm:$0xff] %v1656_v39  ;;  %2425 = vst [vmem:[%s3009_s20 + $0x1538] sm:$0xff] %v1657_v40  ;;  %v1681_v30 = vmul.f32 %v2977_v12, %v881_v27  ;;  %v883_v32 = vld [vmem:[%s2963_s25 + $0x1608] sm:$0xff]  ;;  %v884_v33 = vld [vmem:[%s2963_s25 + $0x1610] sm:$0xff]  ;;  %v1682_v34 = vmul.f32 %v2980_v14, %v882_v31 }
 0x1a6   : > { %2426 = vst [vmem:[%s3009_s20 + $0x1540] sm:$0xff] %v1658_v44  ;;  %2427 = vst [vmem:[%s3009_s20 + $0x1548] sm:$0xff] %v1659_v45  ;;  %v1683_v35 = vmul.f32 %v2983_v16, %v883_v32  ;;  %v1684_v36 = vmul.f32 %v2986_v18, %v884_v33  ;;  %v885_v37 = vld [vmem:[%s2963_s25 + $0x1618] sm:$0xff]  ;;  %v886_v38 = vld [vmem:[%s2963_s25 + $0x1620] sm:$0xff] }
 0x1a7   : > { %2428 = vst [vmem:[%s3009_s20 + $0x1550] sm:$0xff] %v1660_v46  ;;  %2429 = vst [vmem:[%s3009_s20 + $0x1558] sm:$0xff] %v1661_v50  ;;  %v887_v39 = vld [vmem:[%s2963_s25 + $0x1628] sm:$0xff]  ;;  %v1685_v40 = vmul.f32 %v2989_v20, %v885_v37  ;;  %v1686_v41 = vmul.f32 %v2975_v11, %v886_v38  ;;  %v888_v43 = vld [vmem:[%s2963_s25 + $0x1630] sm:$0xff] }
 0x1a8   : > { %2430 = vst [vmem:[%s3009_s20 + $0x1560] sm:$0xff] %v1662_v51  ;;  %2431 = vst [vmem:[%s3009_s20 + $0x1568] sm:$0xff] %v1663_v52  ;;  %v1687_v42 = vmul.f32 %v2977_v12, %v887_v39  ;;  %v889_v44 = vld [vmem:[%s2963_s25 + $0x1638] sm:$0xff]  ;;  %v890_v45 = vld [vmem:[%s2963_s25 + $0x1640] sm:$0xff]  ;;  %v1688_v46 = vmul.f32 %v2980_v14, %v888_v43 }
 0x1a9   : > { %2432 = vst [vmem:[%s3009_s20 + $0x1570] sm:$0xff] %v1664_v56  ;;  %2433 = vst [vmem:[%s3009_s20 + $0x1578] sm:$0xff] %v1665_v57  ;;  %v1689_v47 = vmul.f32 %v2983_v16, %v889_v44  ;;  %v1690_v48 = vmul.f32 %v2986_v18, %v890_v45  ;;  %v891_v49 = vld [vmem:[%s2963_s25 + $0x1648] sm:$0xff]  ;;  %v892_v50 = vld [vmem:[%s2963_s25 + $0x1650] sm:$0xff] }
 0x1aa   : > { %2434 = vst [vmem:[%s3009_s20 + $0x1580] sm:$0xff] %v1666_v58  ;;  %2435 = vst [vmem:[%s3009_s20 + $0x1588] sm:$0xff] %v1667_v62  ;;  %v893_v51 = vld [vmem:[%s2963_s25 + $0x1658] sm:$0xff]  ;;  %v1691_v52 = vmul.f32 %v2989_v20, %v891_v49  ;;  %v1692_v53 = vmul.f32 %v2975_v11, %v892_v50  ;;  %v894_v55 = vld [vmem:[%s2963_s25 + $0x1660] sm:$0xff] }
 0x1ab   : > { %2436 = vst [vmem:[%s3009_s20 + $0x1590] sm:$0xff] %v1668_v63  ;;  %2437 = vst [vmem:[%s3009_s20 + $0x1598] sm:$0xff] %v1669_v0  ;;  %v1693_v54 = vmul.f32 %v2977_v12, %v893_v51  ;;  %v895_v56 = vld [vmem:[%s2963_s25 + $0x1668] sm:$0xff]  ;;  %v896_v57 = vld [vmem:[%s2963_s25 + $0x1670] sm:$0xff]  ;;  %v1694_v58 = vmul.f32 %v2980_v14, %v894_v55 }
 0x1ac   : > { %2438 = vst [vmem:[%s3009_s20 + $0x15a0] sm:$0xff] %v1670_v4  ;;  %2439 = vst [vmem:[%s3009_s20 + $0x15a8] sm:$0xff] %v1671_v5  ;;  %v1695_v59 = vmul.f32 %v2983_v16, %v895_v56  ;;  %v1696_v60 = vmul.f32 %v2986_v18, %v896_v57  ;;  %v897_v61 = vld [vmem:[%s2963_s25 + $0x1678] sm:$0xff]  ;;  %v898_v62 = vld [vmem:[%s2963_s25 + $0x1680] sm:$0xff] }
 0x1ad   : > { %2440 = vst [vmem:[%s3009_s20 + $0x15b0] sm:$0xff] %v1672_v6  ;;  %2441 = vst [vmem:[%s3009_s20 + $0x15b8] sm:$0xff] %v1673_v10  ;;  %v899_v63 = vld [vmem:[%s2963_s25 + $0x1688] sm:$0xff]  ;;  %v1697_v0 = vmul.f32 %v2989_v20, %v897_v61  ;;  %v1698_v1 = vmul.f32 %v2975_v11, %v898_v62  ;;  %v900_v3 = vld [vmem:[%s2963_s25 + $0x1690] sm:$0xff] }
 0x1ae   : > { %2442 = vst [vmem:[%s3009_s20 + $0x15c0] sm:$0xff] %v1674_v13  ;;  %2443 = vst [vmem:[%s3009_s20 + $0x15c8] sm:$0xff] %v1675_v15  ;;  %v1699_v2 = vmul.f32 %v2977_v12, %v899_v63  ;;  %v901_v4 = vld [vmem:[%s2963_s25 + $0x1698] sm:$0xff]  ;;  %v902_v5 = vld [vmem:[%s2963_s25 + $0x16a0] sm:$0xff]  ;;  %v1700_v6 = vmul.f32 %v2980_v14, %v900_v3 }
 0x1af   : > { %2444 = vst [vmem:[%s3009_s20 + $0x15d0] sm:$0xff] %v1676_v22  ;;  %2445 = vst [vmem:[%s3009_s20 + $0x15d8] sm:$0xff] %v1677_v23  ;;  %v1701_v7 = vmul.f32 %v2983_v16, %v901_v4  ;;  %v1702_v8 = vmul.f32 %v2986_v18, %v902_v5  ;;  %v903_v9 = vld [vmem:[%s2963_s25 + $0x16a8] sm:$0xff]  ;;  %v904_v10 = vld [vmem:[%s2963_s25 + $0x16b0] sm:$0xff] }
 0x1b0   : > { %2446 = vst [vmem:[%s3009_s20 + $0x15e0] sm:$0xff] %v1678_v24  ;;  %2447 = vst [vmem:[%s3009_s20 + $0x15e8] sm:$0xff] %v1679_v28  ;;  %v905_v13 = vld [vmem:[%s2963_s25 + $0x16b8] sm:$0xff]  ;;  %v1703_v15 = vmul.f32 %v2989_v20, %v903_v9  ;;  %v1704_v17 = vmul.f32 %v2975_v11, %v904_v10  ;;  %v906_v21 = vld [vmem:[%s2963_s25 + $0x16c0] sm:$0xff] }
 0x1b1   : > { %2448 = vst [vmem:[%s3009_s20 + $0x15f0] sm:$0xff] %v1680_v29  ;;  %2449 = vst [vmem:[%s3009_s20 + $0x15f8] sm:$0xff] %v1681_v30  ;;  %v1705_v19 = vmul.f32 %v2977_v12, %v905_v13  ;;  %v907_v22 = vld [vmem:[%s2963_s25 + $0x16c8] sm:$0xff]  ;;  %v908_v23 = vld [vmem:[%s2963_s25 + $0x16d0] sm:$0xff]  ;;  %v1706_v24 = vmul.f32 %v2980_v14, %v906_v21 }
 0x1b2   : > { %2450 = vst [vmem:[%s3009_s20 + $0x1600] sm:$0xff] %v1682_v34  ;;  %2451 = vst [vmem:[%s3009_s20 + $0x1608] sm:$0xff] %v1683_v35  ;;  %v1707_v25 = vmul.f32 %v2983_v16, %v907_v22  ;;  %v1708_v26 = vmul.f32 %v2986_v18, %v908_v23  ;;  %v909_v27 = vld [vmem:[%s2963_s25 + $0x16d8] sm:$0xff]  ;;  %v910_v28 = vld [vmem:[%s2963_s25 + $0x16e0] sm:$0xff] }
 0x1b3   : > { %2452 = vst [vmem:[%s3009_s20 + $0x1610] sm:$0xff] %v1684_v36  ;;  %2453 = vst [vmem:[%s3009_s20 + $0x1618] sm:$0xff] %v1685_v40  ;;  %v911_v29 = vld [vmem:[%s2963_s25 + $0x16e8] sm:$0xff]  ;;  %v1709_v30 = vmul.f32 %v2989_v20, %v909_v27  ;;  %v1710_v31 = vmul.f32 %v2975_v11, %v910_v28  ;;  %v912_v33 = vld [vmem:[%s2963_s25 + $0x16f0] sm:$0xff] }
 0x1b4   : > { %2454 = vst [vmem:[%s3009_s20 + $0x1620] sm:$0xff] %v1686_v41  ;;  %2455 = vst [vmem:[%s3009_s20 + $0x1628] sm:$0xff] %v1687_v42  ;;  %v1711_v32 = vmul.f32 %v2977_v12, %v911_v29  ;;  %v913_v34 = vld [vmem:[%s2963_s25 + $0x16f8] sm:$0xff]  ;;  %v914_v35 = vld [vmem:[%s2963_s25 + $0x1700] sm:$0xff]  ;;  %v1712_v36 = vmul.f32 %v2980_v14, %v912_v33 }
 0x1b5   : > { %2456 = vst [vmem:[%s3009_s20 + $0x1630] sm:$0xff] %v1688_v46  ;;  %2457 = vst [vmem:[%s3009_s20 + $0x1638] sm:$0xff] %v1689_v47  ;;  %v1713_v37 = vmul.f32 %v2983_v16, %v913_v34  ;;  %v1714_v38 = vmul.f32 %v2986_v18, %v914_v35  ;;  %v915_v39 = vld [vmem:[%s2963_s25 + $0x1708] sm:$0xff]  ;;  %v916_v40 = vld [vmem:[%s2963_s25 + $0x1710] sm:$0xff] }
 0x1b6   : > { %2458 = vst [vmem:[%s3009_s20 + $0x1640] sm:$0xff] %v1690_v48  ;;  %2459 = vst [vmem:[%s3009_s20 + $0x1648] sm:$0xff] %v1691_v52  ;;  %v917_v41 = vld [vmem:[%s2963_s25 + $0x1718] sm:$0xff]  ;;  %v1715_v42 = vmul.f32 %v2989_v20, %v915_v39  ;;  %v1716_v43 = vmul.f32 %v2975_v11, %v916_v40  ;;  %v918_v45 = vld [vmem:[%s2963_s25 + $0x1720] sm:$0xff] }
 0x1b7   : > { %2460 = vst [vmem:[%s3009_s20 + $0x1650] sm:$0xff] %v1692_v53  ;;  %2461 = vst [vmem:[%s3009_s20 + $0x1658] sm:$0xff] %v1693_v54  ;;  %v1717_v44 = vmul.f32 %v2977_v12, %v917_v41  ;;  %v919_v46 = vld [vmem:[%s2963_s25 + $0x1728] sm:$0xff]  ;;  %v920_v47 = vld [vmem:[%s2963_s25 + $0x1730] sm:$0xff]  ;;  %v1718_v48 = vmul.f32 %v2980_v14, %v918_v45 }
 0x1b8   : > { %2462 = vst [vmem:[%s3009_s20 + $0x1660] sm:$0xff] %v1694_v58  ;;  %2463 = vst [vmem:[%s3009_s20 + $0x1668] sm:$0xff] %v1695_v59  ;;  %v1719_v49 = vmul.f32 %v2983_v16, %v919_v46  ;;  %v1720_v50 = vmul.f32 %v2986_v18, %v920_v47  ;;  %v921_v51 = vld [vmem:[%s2963_s25 + $0x1738] sm:$0xff]  ;;  %v922_v52 = vld [vmem:[%s2963_s25 + $0x1740] sm:$0xff] }
 0x1b9   : > { %2464 = vst [vmem:[%s3009_s20 + $0x1670] sm:$0xff] %v1696_v60  ;;  %2465 = vst [vmem:[%s3009_s20 + $0x1678] sm:$0xff] %v1697_v0  ;;  %v923_v53 = vld [vmem:[%s2963_s25 + $0x1748] sm:$0xff]  ;;  %v1721_v54 = vmul.f32 %v2989_v20, %v921_v51  ;;  %v1722_v55 = vmul.f32 %v2975_v11, %v922_v52  ;;  %v924_v57 = vld [vmem:[%s2963_s25 + $0x1750] sm:$0xff] }
 0x1ba   : > { %2466 = vst [vmem:[%s3009_s20 + $0x1680] sm:$0xff] %v1698_v1  ;;  %2467 = vst [vmem:[%s3009_s20 + $0x1688] sm:$0xff] %v1699_v2  ;;  %v1723_v56 = vmul.f32 %v2977_v12, %v923_v53  ;;  %v925_v58 = vld [vmem:[%s2963_s25 + $0x1758] sm:$0xff]  ;;  %v926_v59 = vld [vmem:[%s2963_s25 + $0x1760] sm:$0xff]  ;;  %v1724_v60 = vmul.f32 %v2980_v14, %v924_v57 }
 0x1bb   : > { %2468 = vst [vmem:[%s3009_s20 + $0x1690] sm:$0xff] %v1700_v6  ;;  %2469 = vst [vmem:[%s3009_s20 + $0x1698] sm:$0xff] %v1701_v7  ;;  %v1725_v61 = vmul.f32 %v2983_v16, %v925_v58  ;;  %v1726_v62 = vmul.f32 %v2986_v18, %v926_v59  ;;  %v927_v63 = vld [vmem:[%s2963_s25 + $0x1768] sm:$0xff]  ;;  %v928_v0 = vld [vmem:[%s2963_s25 + $0x1770] sm:$0xff] }
 0x1bc   : > { %2470 = vst [vmem:[%s3009_s20 + $0x16a0] sm:$0xff] %v1702_v8  ;;  %2471 = vst [vmem:[%s3009_s20 + $0x16a8] sm:$0xff] %v1703_v15  ;;  %v929_v1 = vld [vmem:[%s2963_s25 + $0x1778] sm:$0xff]  ;;  %v1727_v2 = vmul.f32 %v2989_v20, %v927_v63  ;;  %v1728_v3 = vmul.f32 %v2975_v11, %v928_v0  ;;  %v930_v5 = vld [vmem:[%s2963_s25 + $0x1780] sm:$0xff] }
 0x1bd   : > { %2472 = vst [vmem:[%s3009_s20 + $0x16b0] sm:$0xff] %v1704_v17  ;;  %2473 = vst [vmem:[%s3009_s20 + $0x16b8] sm:$0xff] %v1705_v19  ;;  %v1729_v4 = vmul.f32 %v2977_v12, %v929_v1  ;;  %v931_v6 = vld [vmem:[%s2963_s25 + $0x1788] sm:$0xff]  ;;  %v932_v7 = vld [vmem:[%s2963_s25 + $0x1790] sm:$0xff]  ;;  %v1730_v8 = vmul.f32 %v2980_v14, %v930_v5 }
 0x1be   : > { %2474 = vst [vmem:[%s3009_s20 + $0x16c0] sm:$0xff] %v1706_v24  ;;  %2475 = vst [vmem:[%s3009_s20 + $0x16c8] sm:$0xff] %v1707_v25  ;;  %v1731_v9 = vmul.f32 %v2983_v16, %v931_v6  ;;  %v1732_v10 = vmul.f32 %v2986_v18, %v932_v7  ;;  %v933_v13 = vld [vmem:[%s2963_s25 + $0x1798] sm:$0xff]  ;;  %v934_v15 = vld [vmem:[%s2963_s25 + $0x17a0] sm:$0xff] }
 0x1bf   : > { %2476 = vst [vmem:[%s3009_s20 + $0x16d0] sm:$0xff] %v1708_v26  ;;  %2477 = vst [vmem:[%s3009_s20 + $0x16d8] sm:$0xff] %v1709_v30  ;;  %v935_v17 = vld [vmem:[%s2963_s25 + $0x17a8] sm:$0xff]  ;;  %v1733_v19 = vmul.f32 %v2989_v20, %v933_v13  ;;  %v1734_v21 = vmul.f32 %v2975_v11, %v934_v15  ;;  %v936_v23 = vld [vmem:[%s2963_s25 + $0x17b0] sm:$0xff] }
 0x1c0   : > { %2478 = vst [vmem:[%s3009_s20 + $0x16e0] sm:$0xff] %v1710_v31  ;;  %2479 = vst [vmem:[%s3009_s20 + $0x16e8] sm:$0xff] %v1711_v32  ;;  %v1735_v22 = vmul.f32 %v2977_v12, %v935_v17  ;;  %v937_v24 = vld [vmem:[%s2963_s25 + $0x17b8] sm:$0xff]  ;;  %v938_v25 = vld [vmem:[%s2963_s25 + $0x17c0] sm:$0xff]  ;;  %v1736_v26 = vmul.f32 %v2980_v14, %v936_v23 }
 0x1c1   : > { %2480 = vst [vmem:[%s3009_s20 + $0x16f0] sm:$0xff] %v1712_v36  ;;  %2481 = vst [vmem:[%s3009_s20 + $0x16f8] sm:$0xff] %v1713_v37  ;;  %v1737_v27 = vmul.f32 %v2983_v16, %v937_v24  ;;  %v1738_v28 = vmul.f32 %v2986_v18, %v938_v25  ;;  %v939_v29 = vld [vmem:[%s2963_s25 + $0x17c8] sm:$0xff]  ;;  %v940_v30 = vld [vmem:[%s2963_s25 + $0x17d0] sm:$0xff] }
 0x1c2   : > { %2482 = vst [vmem:[%s3009_s20 + $0x1700] sm:$0xff] %v1714_v38  ;;  %2483 = vst [vmem:[%s3009_s20 + $0x1708] sm:$0xff] %v1715_v42  ;;  %v941_v31 = vld [vmem:[%s2963_s25 + $0x17d8] sm:$0xff]  ;;  %v1739_v32 = vmul.f32 %v2989_v20, %v939_v29  ;;  %v1740_v33 = vmul.f32 %v2975_v11, %v940_v30  ;;  %v942_v35 = vld [vmem:[%s2963_s25 + $0x17e0] sm:$0xff] }
 0x1c3   : > { %2484 = vst [vmem:[%s3009_s20 + $0x1710] sm:$0xff] %v1716_v43  ;;  %2485 = vst [vmem:[%s3009_s20 + $0x1718] sm:$0xff] %v1717_v44  ;;  %v1741_v34 = vmul.f32 %v2977_v12, %v941_v31  ;;  %v943_v36 = vld [vmem:[%s2963_s25 + $0x17e8] sm:$0xff]  ;;  %v944_v37 = vld [vmem:[%s2963_s25 + $0x17f0] sm:$0xff]  ;;  %v1742_v38 = vmul.f32 %v2980_v14, %v942_v35 }
 0x1c4   : > { %2486 = vst [vmem:[%s3009_s20 + $0x1720] sm:$0xff] %v1718_v48  ;;  %2487 = vst [vmem:[%s3009_s20 + $0x1728] sm:$0xff] %v1719_v49  ;;  %v1743_v39 = vmul.f32 %v2983_v16, %v943_v36  ;;  %v1744_v11 = vmul.f32 %v2986_v18, %v944_v37  ;;  %v945_v40 = vld [vmem:[%s2963_s25 + $0x17f8] sm:$0xff] }
 0x1c5   : > { %2488 = vst [vmem:[%s3009_s20 + $0x1730] sm:$0xff] %v1720_v50  ;;  %2489 = vst [vmem:[%s3009_s20 + $0x1738] sm:$0xff] %v1721_v54  ;;  %v1745_v12 = vmul.f32 %v2989_v20, %v945_v40 }
 0x1c6   : > { %2490 = vst [vmem:[%s3009_s20 + $0x1740] sm:$0xff] %v1722_v55  ;;  %2491 = vst [vmem:[%s3009_s20 + $0x1748] sm:$0xff] %v1723_v56 }
 0x1c7   : > { %2492 = vst [vmem:[%s3009_s20 + $0x1750] sm:$0xff] %v1724_v60  ;;  %2493 = vst [vmem:[%s3009_s20 + $0x1758] sm:$0xff] %v1725_v61 }
 0x1c8   : > { %2494 = vst [vmem:[%s3009_s20 + $0x1760] sm:$0xff] %v1726_v62  ;;  %2495 = vst [vmem:[%s3009_s20 + $0x1768] sm:$0xff] %v1727_v2 }
 0x1c9   : > { %2496 = vst [vmem:[%s3009_s20 + $0x1770] sm:$0xff] %v1728_v3  ;;  %2497 = vst [vmem:[%s3009_s20 + $0x1778] sm:$0xff] %v1729_v4 }
 0x1ca   : > { %2498 = vst [vmem:[%s3009_s20 + $0x1780] sm:$0xff] %v1730_v8  ;;  %2499 = vst [vmem:[%s3009_s20 + $0x1788] sm:$0xff] %v1731_v9 }
 0x1cb   : > { %2500 = vst [vmem:[%s3009_s20 + $0x1790] sm:$0xff] %v1732_v10  ;;  %2501 = vst [vmem:[%s3009_s20 + $0x1798] sm:$0xff] %v1733_v19 }
 0x1cc   : > { %2502 = vst [vmem:[%s3009_s20 + $0x17a0] sm:$0xff] %v1734_v21  ;;  %2503 = vst [vmem:[%s3009_s20 + $0x17a8] sm:$0xff] %v1735_v22 }
 0x1cd   : > { %2504 = vst [vmem:[%s3009_s20 + $0x17b0] sm:$0xff] %v1736_v26  ;;  %2505 = vst [vmem:[%s3009_s20 + $0x17b8] sm:$0xff] %v1737_v27 }
 0x1ce   : > { %2506 = vst [vmem:[%s3009_s20 + $0x17c0] sm:$0xff] %v1738_v28  ;;  %2507 = vst [vmem:[%s3009_s20 + $0x17c8] sm:$0xff] %v1739_v32 }
 0x1cf   : > { %2508 = vst [vmem:[%s3009_s20 + $0x17d0] sm:$0xff] %v1740_v33  ;;  %2509 = vst [vmem:[%s3009_s20 + $0x17d8] sm:$0xff] %v1741_v34 }
 0x1d0   : > { %2510 = vst [vmem:[%s3009_s20 + $0x17e0] sm:$0xff] %v1742_v38  ;;  %2511 = vst [vmem:[%s3009_s20 + $0x17e8] sm:$0xff] %v1743_v39 }
 0x1d1   : > { %2512 = vst [vmem:[%s3009_s20 + $0x17f0] sm:$0xff] %v1744_v11  ;;  %2513 = vst [vmem:[%s3009_s20 + $0x17f8] sm:$0xff] %v1745_v12 }
 0x1d2   : > { %2758 = shalt.err (!%p2755_p0)
}
 0x1d3   : > { %s2759_s3 = scalar_lea.hbm %s5292_s17, 98304  ;;  %s2763_s6 = scalar_lea.hbm %s5347_s2, 196608 }
 0x1d4   : > { %p2760_p4 = scmp.ne.s32.totalorder %s5292_s17, %s2759_s3  ;;  %p2764_p6 = scmp.lt.s32.totalorder %s5292_s17, %s5347_s2 }
 0x1d5   : > { %p2765_p13 = scmp.lt.s32.totalorder %s2763_s6, %s2759_s3 }
 0x1d6   : > { %p2761_p11 = pnand %p2760_p4, %p5364_p1 }
 0x1d7   : > { %p2766_p3 = por %p2765_p13, %p2764_p6 }
 0x1d8   : > { %p2762_p5 = pneg %p2761_p11 }
 0x1da   : > { %p2767_p12 = pnand %p2766_p3, %p2762_p5 }
 0x1dc   : > { %2770 = shalt.err (!%p2767_p12)
}
 0x1dd   : > { %s2820_s24 = smov 768   ;;  %s2821_s25 = smov 48  }
 0x1de   : > { %2636 = dma.vmem_to_hbm [thread:$0]  (%p5364_p1), %s5294_s28, 98304, %s5292_s17, %s2515_s13, %s2820_s24, %s2820_s24, %s2821_s25  }
 0x1df PF: > { %s2544_s20 = sand.u32 1, %s2801_s9   ;;  %p5365_p7 = scmp.ne.s32.totalorder %s5355_s22, 0 }
 0x1e0   : > { %p5366_p8 = scmp.ge.s32.totalorder %s2813_s12, 2  ;;  %s2545_s23 = scalar_lea.sflag [#allocation4], %s2544_s20 }
 0x1e2   : > { %p2647_p9 = pnand %p5366_p8, %p5365_p7 }
 0x1e4   : > { %p2648_p10 = pneg %p2647_p9 }
 0x1e6   : > { %2796 = dma.done.wait (%p2648_p10), %s2545_s23, 98304  }
 0x1e7   : > { %2798 = vsyncadd (%p2648_p10), %s2545_s23, 4294868992  ;;  %p16_p2 = scmp.ge.s32.totalorder %s2862_s15, 4   ;;  %s5367_s9 = smov %s2805_s10 }
 0x1e8   : > { %s5368_s10 = smov %s2809_s11  ;;  %s5369_s11 = smov %s2874_s18 }
 0x1e9   : > { %s5370_s12 = smov %s2862_s15  ;;  %18 = sbr.rel (!%p16_p2) target bundleno = 6 (0x6), region = 77 }
 0x1ee   :  { %2550 = vsyncpa [#allocation3], 1 }
 0x1ef   :  { %2552 = vsyncpa [#allocation3 + $0x1], 1 }
 0x1f0   :  { %2553 = vsyncpa [#allocation6], 1 }
 0x1f1   :  { %2554 = vsyncpa [#allocation4], 1 }
 0x1f2   :  { %2556 = vsyncpa [#allocation4 + $0x1], 1 }

</bundles_post_ra>
